<compile_context>
chip_gen: v5e
topology: v5e:2x2
jax: 0.10.0
libtpu: 0.0.40
codegen_flags: <defaults>
</compile_context>

<pallas_src>
import functools

import jax
import jax.numpy as jnp
from jax import lax
from jax.experimental import pallas as pl
from jax.experimental.pallas import tpu as pltpu


# --------------------------- fused conv3x3 + epilogue Pallas kernel ---------------------------

def _conv3x3_row_kernel(x0_ref, x1_ref, x2_ref, w_ref, b_ref, *rest,
                        out_w, activation):
    """One output row: 9 unrolled MXU dots (taps) accumulated in f32 registers + fused epilogue."""
    if activation in ("gdn", "igdn"):
        g_ref, beta_ref, o_ref = rest
    else:
        (o_ref,) = rest

    acc = None
    for r, row_ref in enumerate((x0_ref, x1_ref, x2_ref)):
        row = row_ref[0, 0, :, :]                                   # (W+2, Cin)
        for dj in range(3):
            seg = row[dj:dj + out_w, :].astype(jnp.bfloat16)        # (W, Cin) bf16
            part = jnp.dot(seg, w_ref[r * 3 + dj],
                           preferred_element_type=jnp.float32)      # (W, CoutP) f32
            acc = part if acc is None else acc + part

    y = acc + b_ref[...]                                            # (W, CoutP) + (1, CoutP)

    if activation in ("gdn", "igdn"):
        # GDN:  y * rsqrt(beta + y^2 @ gamma)   /   IGDN: y * sqrt(beta + y^2 @ gamma)
        t = jnp.dot(y * y, g_ref[...],
                    preferred_element_type=jnp.float32) + beta_ref[...]
        y = y * (jnp.sqrt(t) if activation == "igdn" else lax.rsqrt(t))
    elif activation == "floor":                                     # torch.floor on the latent
        y = jnp.floor(y)
    elif activation == "clamp01":                                   # recon.clamp(0.0, 1.0)
        y = jnp.clip(y, 0.0, 1.0)

    o_ref[0, 0, :, :] = y.astype(o_ref.dtype)


def conv3x3_fused(x, w3, bias, gamma=None, beta=None, *, activation=None,
                  out_dtype=jnp.bfloat16):
    """Fused 3x3 stride-1 'same' conv + bias + activation epilogue.

    x:     (N, H, W, Cin)  NHWC
    w3:    (9, Cin, CoutP) bf16, tap-major [dy*3 + dx]
    bias:  (CoutP,)        f32
    gamma: (CoutP, CoutP), beta: (CoutP,)  -- only for activation in {"gdn", "igdn"}
    """
    n, h, w, cin = x.shape
    coutp = w3.shape[-1]
    xp = jnp.pad(x, ((0, 0), (1, 1), (1, 1), (0, 0)))               # halo pad only
    wp = w + 2

    has_gdn = activation in ("gdn", "igdn")
    kern = functools.partial(_conv3x3_row_kernel, out_w=w, activation=activation)

    def row_spec(r):
        # one padded input row per tap row: rows y, y+1, y+2 of the halo-padded input
        return pl.BlockSpec((1, 1, wp, cin), lambda b, y, r=r: (b, y + r, 0, 0))

    in_specs = [row_spec(0), row_spec(1), row_spec(2),
                pl.BlockSpec((9, cin, coutp), lambda b, y: (0, 0, 0)),   # fetched once (constant)
                pl.BlockSpec((1, coutp), lambda b, y: (0, 0))]
    args = [xp, xp, xp, w3, bias.reshape(1, coutp).astype(jnp.float32)]
    if has_gdn:
        in_specs += [pl.BlockSpec((coutp, coutp), lambda b, y: (0, 0)),
                     pl.BlockSpec((1, coutp), lambda b, y: (0, 0))]
        args += [gamma.astype(jnp.float32),
                 beta.reshape(1, coutp).astype(jnp.float32)]

    return pl.pallas_call(
        kern,
        out_shape=jax.ShapeDtypeStruct((n, h, w, coutp), out_dtype),
        grid_spec=pltpu.PrefetchScalarGridSpec(
            num_scalar_prefetch=0,
            grid=(n, h),
            in_specs=in_specs,
            out_specs=pl.BlockSpec((1, 1, w, coutp), lambda b, y: (b, y, 0, 0))),
        compiler_params=pltpu.CompilerParams(
            dimension_semantics=("parallel", "parallel")),
    )(*args)


# --------------------------- layout plumbing (cheap XLA reshuffles) ---------------------------

def space_to_depth(x):
    n, h, w, c = x.shape
    x = x.reshape(n, h // 2, 2, w // 2, 2, c).transpose(0, 1, 3, 2, 4, 5)
    return x.reshape(n, h // 2, w // 2, 4 * c)       # channel order (py, px, c)


def depth_to_space(x):
    n, h, w, c4 = x.shape
    c = c4 // 4
    x = x.reshape(n, h, w, 2, 2, c).transpose(0, 1, 3, 2, 4, 5)
    return x.reshape(n, 2 * h, 2 * w, c)             # inverse of the (py, px, co) packing


# --------------------------- weight conversions (done once, weights are tiny) ---------------------------

def enc_conv5_to_w3(w5):
    """5x5 / stride-2 / pad-2 conv (HWIO) -> 3x3 stride-1 conv over the space-to-depth input.
    Returns (9, 4*Cin, Cout); input-channel order (py, px, c) matches space_to_depth."""
    k, _, cin, cout = w5.shape
    assert k == 5
    zeros = jnp.zeros((cin, cout), w5.dtype)
    taps = []
    for dy in range(3):
        for dx in range(3):
            blocks = []
            for py in range(2):
                for px in range(2):
                    ki, kj = 2 * dy + py, 2 * dx + px
                    blocks.append(w5[ki, kj] if (ki < 5 and kj < 5) else zeros)
            taps.append(jnp.concatenate(blocks, axis=0))            # (4*Cin, Cout)
    return jnp.stack(taps, axis=0)                                  # (9, 4*Cin, Cout)


def dec_deconv5_to_w3(w5):
    """5x5 / stride-2 / pad-2 / output_padding-1 ConvTranspose2d weight w5[ky,kx,ci,co] ->
    3x3 stride-1 conv whose output packs the 4 sub-pixel phases.
    Returns (9, Cin, 4*Cout); output-channel order (py, px, co) matches depth_to_space."""
    k, _, cin, cout = w5.shape
    assert k == 5
    zeros = jnp.zeros((cin, cout), w5.dtype)
    taps = []
    for dy in range(3):
        for dx in range(3):
            phases = []
            for py in range(2):
                for px in range(2):
                    ky, kx = 4 + py - 2 * dy, 4 + px - 2 * dx
                    phases.append(w5[ky, kx] if (ky < 5 and kx < 5) else zeros)
            taps.append(jnp.concatenate(phases, axis=-1))           # (Cin, 4*Cout)
    return jnp.stack(taps, axis=0)                                  # (9, Cin, 4*Cout)


def _block_diag4(gamma):
    """IGDN gamma for the phase-packed layout: phases are distinct pixels -> block diagonal."""
    c = gamma.shape[0]
    out = jnp.zeros((4 * c, 4 * c), gamma.dtype)
    for p in range(4):
        out = out.at[p * c:(p + 1) * c, p * c:(p + 1) * c].set(gamma)
    return out


# --------------------------- model: Comp_decompressor ---------------------------

def init_params(key, out_channel_N=32, out_channel_M=48):
    """Synthetic parameters in the original 5x5 layout.
    Conv weights are HWIO (5,5,Cin,Cout); deconv weights are w5[ky,kx,Cin,Cout] with
    ConvTranspose2d semantics (PyTorch's (Cin,Cout,5,5) transposed to (5,5,Cin,Cout)).
    GDN beta/gamma are generated directly as positive tensors (the repo's lower-bound
    reparameterization is a training-time detail; forward-equivalent)."""
    cn, cm = out_channel_N, out_channel_M
    keys = jax.random.split(key, 8)

    def conv_w(k_, cin, cout):
        std = 1.0 / (25.0 * cin) ** 0.5
        return std * jax.random.normal(k_, (5, 5, cin, cout), jnp.float32)

    def gdn_p(c):
        return {"gamma": 0.1 * jnp.eye(c, dtype=jnp.float32) + 0.001,
                "beta": jnp.ones((c,), jnp.float32)}

    enc = [
        {"w": conv_w(keys[0], 3, cn), "b": jnp.zeros((cn,), jnp.float32), **gdn_p(cn)},
        {"w": conv_w(keys[1], cn, cn), "b": jnp.zeros((cn,), jnp.float32), **gdn_p(cn)},
        {"w": conv_w(keys[2], cn, cn), "b": jnp.zeros((cn,), jnp.float32), **gdn_p(cn)},
        {"w": conv_w(keys[3], cn, cm), "b": jnp.zeros((cm,), jnp.float32)},
    ]
    dec = [
        {"w": conv_w(keys[4], cm, cn), "b": jnp.zeros((cn,), jnp.float32), **gdn_p(cn)},
        {"w": conv_w(keys[5], cn, cn), "b": jnp.zeros((cn,), jnp.float32), **gdn_p(cn)},
        {"w": conv_w(keys[6], cn, cn), "b": jnp.zeros((cn,), jnp.float32), **gdn_p(cn)},
        {"w": conv_w(keys[7], cn, 3), "b": 0.5 * jnp.ones((3,), jnp.float32)},
    ]
    return {"enc": enc, "dec": dec}


def prepare_params(raw):
    """Convert once to the fused-kernel layout (bf16 3x3 weights, phase-packed decoder params)."""
    enc, dec = [], []
    for layer in raw["enc"]:
        p = {"w3": enc_conv5_to_w3(layer["w"]).astype(jnp.bfloat16), "b": layer["b"]}
        if "gamma" in layer:
            p["gamma"], p["beta"] = layer["gamma"], layer["beta"]
        enc.append(p)
    for layer in raw["dec"]:
        p = {"w3": dec_deconv5_to_w3(layer["w"]).astype(jnp.bfloat16),
             "b": jnp.tile(layer["b"], 4)}                          # bias repeated per phase
        if "gamma" in layer:
            p["gamma"] = _block_diag4(layer["gamma"])
            p["beta"] = jnp.tile(layer["beta"], 4)
        dec.append(p)
    return {"enc": enc, "dec": dec}


def comp_decompressor_forward(prep, input_image_nchw):
    x = jnp.transpose(input_image_nchw, (0, 2, 3, 1)).astype(jnp.float32)   # NCHW -> NHWC

    # ---- Analysis_net: 4x [space-to-depth + fused conv3x3]; GDN fused, torch.floor fused ----
    h = x
    for i, layer in enumerate(prep["enc"]):
        act = "gdn" if i < 3 else "floor"
        odt = jnp.bfloat16 if i < 3 else jnp.float32          # latent kept f32 (exact floor values)
        h = conv3x3_fused(space_to_depth(h), layer["w3"], layer["b"],
                          layer.get("gamma"), layer.get("beta"),
                          activation=act, out_dtype=odt)

    # ---- Synthesis_net: 4x [fused phase-packed conv3x3 + depth-to-space]; IGDN / clamp fused ----
    for i, layer in enumerate(prep["dec"]):
        act = "igdn" if i < 3 else "clamp01"
        odt = jnp.bfloat16 if i < 3 else jnp.float32
        h = conv3x3_fused(h, layer["w3"], layer["b"],
                          layer.get("gamma"), layer.get("beta"),
                          activation=act, out_dtype=odt)
        h = depth_to_space(h)

    return jnp.transpose(h, (0, 3, 1, 2))                     # NHWC -> NCHW


# --------------------------- plain-JAX layer references (for self-check) ---------------------------

def _ref_conv_s2(x, w5, b):
    y = lax.conv_general_dilated(x, w5, (2, 2), ((2, 2), (2, 2)),
                                 dimension_numbers=("NHWC", "HWIO", "NHWC"))
    return y + b


def _ref_deconv_s2(x, w5, b):
    # ConvTranspose2d(stride=2, padding=2, output_padding=1) == dilate(2) + pad(2,3) + flipped conv
    y = lax.conv_general_dilated(x, w5[::-1, ::-1, :, :], (1, 1), ((2, 3), (2, 3)),
                                 lhs_dilation=(2, 2),
                                 dimension_numbers=("NHWC", "HWIO", "NHWC"))
    return y + b


def _ref_gdn(x, gamma, beta, inverse):
    t = jnp.einsum("nhwc,co->nhwo", x * x, gamma) + beta
    return x * jnp.sqrt(t) if inverse else x * lax.rsqrt(t)


if __name__ == "__main__":
    key = jax.random.PRNGKey(0)
    kp, kx, kd = jax.random.split(key, 3)

    # small synthetic config: out_channel_N=32, out_channel_M=48, image 2x3x32x32
    raw = init_params(kp, out_channel_N=32, out_channel_M=48)
    prep = prepare_params(raw)
    input_image = jax.random.uniform(kx, (2, 3, 32, 32), jnp.float32)

    fwd = jax.jit(comp_decompressor_forward)
    out = jax.block_until_ready(fwd(prep, input_image))

    assert out.shape == (2, 3, 32, 32), out.shape
    assert bool(jnp.isfinite(out).all())
    assert bool((out >= 0.0).all()) and bool((out <= 1.0).all())

    # --- layer-level cross-checks of the fused kernels against plain-JAX references ---
    x_nhwc = jnp.transpose(input_image, (0, 2, 3, 1))
    e0, pe0 = raw["enc"][0], prep["enc"][0]
    ref_e = _ref_gdn(_ref_conv_s2(x_nhwc, e0["w"], e0["b"]), e0["gamma"], e0["beta"], False)
    pal_e = conv3x3_fused(space_to_depth(x_nhwc), pe0["w3"], pe0["b"],
                          pe0["gamma"], pe0["beta"], activation="gdn",
                          out_dtype=jnp.float32)
    err_e = float(jnp.max(jnp.abs(pal_e - ref_e)))

    d1, pd1 = raw["dec"][1], prep["dec"][1]
    x_dec = 0.5 * jax.random.normal(kd, (2, 4, 4, 32), jnp.float32)
    ref_d = _ref_gdn(_ref_deconv_s2(x_dec, d1["w"], d1["b"]), d1["gamma"], d1["beta"], True)
    pal_d = depth_to_space(conv3x3_fused(x_dec, pd1["w3"], pd1["b"],
                                         pd1["gamma"], pd1["beta"], activation="igdn",
                                         out_dtype=jnp.float32))
    err_d = float(jnp.max(jnp.abs(pal_d - ref_d)))
    assert err_e < 5e-2 and err_d < 5e-2, (err_e, err_d)

    print("KERNEL_OK")
</pallas_src>

<mosaic_0001>
module attributes {stable_mosaic.version = 11 : i64} {
  func.func @_conv3x3_row_kernel(%arg0: i32, %arg1: i32, %arg2: memref<1x1x18x12xf32, #tpu.memory_space<vmem>>, %arg3: memref<1x1x18x12xf32, #tpu.memory_space<vmem>>, %arg4: memref<1x1x18x12xf32, #tpu.memory_space<vmem>>, %arg5: memref<9x12x32xbf16, #tpu.memory_space<vmem>>, %arg6: memref<1x32xf32, #tpu.memory_space<vmem>>, %arg7: memref<32x32xf32, #tpu.memory_space<vmem>>, %arg8: memref<1x32xf32, #tpu.memory_space<vmem>>, %arg9: memref<1x1x16x32xbf16, #tpu.memory_space<vmem>>) attributes {dimension_semantics = [#tpu.dimension_semantics<parallel>, #tpu.dimension_semantics<parallel>], iteration_bounds = array<i64: 2, 16>, scalar_prefetch = 0 : i64, scratch_operands = 0 : i64, tpu.core_type = #tpu.core_type<tc>, window_params = [{transform_indices = @transform_0, window_bounds = array<i64: 1, 1, 18, 12>}, {transform_indices = @transform_1, window_bounds = array<i64: 1, 1, 18, 12>}, {transform_indices = @transform_2, window_bounds = array<i64: 1, 1, 18, 12>}, {pipeline_mode = #tpu.pipeline_mode<synchronous>, transform_indices = @transform_3, window_bounds = array<i64: 9, 12, 32>}, {pipeline_mode = #tpu.pipeline_mode<synchronous>, transform_indices = @transform_4, window_bounds = array<i64: 1, 32>}, {pipeline_mode = #tpu.pipeline_mode<synchronous>, transform_indices = @transform_5, window_bounds = array<i64: 32, 32>}, {pipeline_mode = #tpu.pipeline_mode<synchronous>, transform_indices = @transform_6, window_bounds = array<i64: 1, 32>}, {transform_indices = @transform_7, window_bounds = array<i64: 1, 1, 16, 32>}]} {
    %c0 = arith.constant 0 : index
    %c0_0 = arith.constant 0 : index
    %c0_1 = arith.constant 0 : index
    %c0_2 = arith.constant 0 : index
    %0 = vector.load %arg2[%c0, %c0_0, %c0_1, %c0_2] : memref<1x1x18x12xf32, #tpu.memory_space<vmem>>, vector<1x1x18x12xf32>
    %1 = vector.shape_cast %0 : vector<1x1x18x12xf32> to vector<18x12xf32>
    %2 = vector.extract_strided_slice %1 {offsets = [0, 0], sizes = [16, 12], strides = [1, 1]} : vector<18x12xf32> to vector<16x12xf32>
    %3 = arith.truncf %2 : vector<16x12xf32> to vector<16x12xbf16>
    %c0_3 = arith.constant 0 : index
    %c0_4 = arith.constant 0 : index
    %c0_5 = arith.constant 0 : index
    %4 = vector.load %arg5[%c0_3, %c0_4, %c0_5] : memref<9x12x32xbf16, #tpu.memory_space<vmem>>, vector<1x12x32xbf16>
    %5 = vector.shape_cast %4 : vector<1x12x32xbf16> to vector<12x32xbf16>
    %cst = arith.constant dense<0.000000e+00> : vector<16x32xf32>
    %6 = tpu.matmul %3, %5, %cst {dimension_numbers = #tpu.dot_dimension_numbers<[1], [0], [0], [1], [0, 0, 1, 1], [], []>} : vector<16x12xbf16>, vector<12x32xbf16>, vector<16x32xf32> -> vector<16x32xf32>
    %7 = vector.extract_strided_slice %1 {offsets = [1, 0], sizes = [16, 12], strides = [1, 1]} : vector<18x12xf32> to vector<16x12xf32>
    %8 = arith.truncf %7 : vector<16x12xf32> to vector<16x12xbf16>
    %c1 = arith.constant 1 : index
    %c0_6 = arith.constant 0 : index
    %c0_7 = arith.constant 0 : index
    %9 = vector.load %arg5[%c1, %c0_6, %c0_7] : memref<9x12x32xbf16, #tpu.memory_space<vmem>>, vector<1x12x32xbf16>
    %10 = vector.shape_cast %9 : vector<1x12x32xbf16> to vector<12x32xbf16>
    %cst_8 = arith.constant dense<0.000000e+00> : vector<16x32xf32>
    %11 = tpu.matmul %8, %10, %cst_8 {dimension_numbers = #tpu.dot_dimension_numbers<[1], [0], [0], [1], [0, 0, 1, 1], [], []>} : vector<16x12xbf16>, vector<12x32xbf16>, vector<16x32xf32> -> vector<16x32xf32>
    %12 = arith.addf %6, %11 : vector<16x32xf32>
    %13 = vector.extract_strided_slice %1 {offsets = [2, 0], sizes = [16, 12], strides = [1, 1]} : vector<18x12xf32> to vector<16x12xf32>
    %14 = arith.truncf %13 : vector<16x12xf32> to vector<16x12xbf16>
    %c2 = arith.constant 2 : index
    %c0_9 = arith.constant 0 : index
    %c0_10 = arith.constant 0 : index
    %15 = vector.load %arg5[%c2, %c0_9, %c0_10] : memref<9x12x32xbf16, #tpu.memory_space<vmem>>, vector<1x12x32xbf16>
    %16 = vector.shape_cast %15 : vector<1x12x32xbf16> to vector<12x32xbf16>
    %cst_11 = arith.constant dense<0.000000e+00> : vector<16x32xf32>
    %17 = tpu.matmul %14, %16, %cst_11 {dimension_numbers = #tpu.dot_dimension_numbers<[1], [0], [0], [1], [0, 0, 1, 1], [], []>} : vector<16x12xbf16>, vector<12x32xbf16>, vector<16x32xf32> -> vector<16x32xf32>
    %18 = arith.addf %12, %17 : vector<16x32xf32>
    %c0_12 = arith.constant 0 : index
    %c0_13 = arith.constant 0 : index
    %c0_14 = arith.constant 0 : index
    %c0_15 = arith.constant 0 : index
    %19 = vector.load %arg3[%c0_12, %c0_13, %c0_14, %c0_15] : memref<1x1x18x12xf32, #tpu.memory_space<vmem>>, vector<1x1x18x12xf32>
    %20 = vector.shape_cast %19 : vector<1x1x18x12xf32> to vector<18x12xf32>
    %21 = vector.extract_strided_slice %20 {offsets = [0, 0], sizes = [16, 12], strides = [1, 1]} : vector<18x12xf32> to vector<16x12xf32>
    %22 = arith.truncf %21 : vector<16x12xf32> to vector<16x12xbf16>
    %c3 = arith.constant 3 : index
    %c0_16 = arith.constant 0 : index
    %c0_17 = arith.constant 0 : index
    %23 = vector.load %arg5[%c3, %c0_16, %c0_17] : memref<9x12x32xbf16, #tpu.memory_space<vmem>>, vector<1x12x32xbf16>
    %24 = vector.shape_cast %23 : vector<1x12x32xbf16> to vector<12x32xbf16>
    %cst_18 = arith.constant dense<0.000000e+00> : vector<16x32xf32>
    %25 = tpu.matmul %22, %24, %cst_18 {dimension_numbers = #tpu.dot_dimension_numbers<[1], [0], [0], [1], [0, 0, 1, 1], [], []>} : vector<16x12xbf16>, vector<12x32xbf16>, vector<16x32xf32> -> vector<16x32xf32>
    %26 = arith.addf %18, %25 : vector<16x32xf32>
    %27 = vector.extract_strided_slice %20 {offsets = [1, 0], sizes = [16, 12], strides = [1, 1]} : vector<18x12xf32> to vector<16x12xf32>
    %28 = arith.truncf %27 : vector<16x12xf32> to vector<16x12xbf16>
    %c4 = arith.constant 4 : index
    %c0_19 = arith.constant 0 : index
    %c0_20 = arith.constant 0 : index
    %29 = vector.load %arg5[%c4, %c0_19, %c0_20] : memref<9x12x32xbf16, #tpu.memory_space<vmem>>, vector<1x12x32xbf16>
    %30 = vector.shape_cast %29 : vector<1x12x32xbf16> to vector<12x32xbf16>
    %cst_21 = arith.constant dense<0.000000e+00> : vector<16x32xf32>
    %31 = tpu.matmul %28, %30, %cst_21 {dimension_numbers = #tpu.dot_dimension_numbers<[1], [0], [0], [1], [0, 0, 1, 1], [], []>} : vector<16x12xbf16>, vector<12x32xbf16>, vector<16x32xf32> -> vector<16x32xf32>
    %32 = arith.addf %26, %31 : vector<16x32xf32>
    %33 = vector.extract_strided_slice %20 {offsets = [2, 0], sizes = [16, 12], strides = [1, 1]} : vector<18x12xf32> to vector<16x12xf32>
    %34 = arith.truncf %33 : vector<16x12xf32> to vector<16x12xbf16>
    %c5 = arith.constant 5 : index
    %c0_22 = arith.constant 0 : index
    %c0_23 = arith.constant 0 : index
    %35 = vector.load %arg5[%c5, %c0_22, %c0_23] : memref<9x12x32xbf16, #tpu.memory_space<vmem>>, vector<1x12x32xbf16>
    %36 = vector.shape_cast %35 : vector<1x12x32xbf16> to vector<12x32xbf16>
    %cst_24 = arith.constant dense<0.000000e+00> : vector<16x32xf32>
    %37 = tpu.matmul %34, %36, %cst_24 {dimension_numbers = #tpu.dot_dimension_numbers<[1], [0], [0], [1], [0, 0, 1, 1], [], []>} : vector<16x12xbf16>, vector<12x32xbf16>, vector<16x32xf32> -> vector<16x32xf32>
    %38 = arith.addf %32, %37 : vector<16x32xf32>
    %c0_25 = arith.constant 0 : index
    %c0_26 = arith.constant 0 : index
    %c0_27 = arith.constant 0 : index
    %c0_28 = arith.constant 0 : index
    %39 = vector.load %arg4[%c0_25, %c0_26, %c0_27, %c0_28] : memref<1x1x18x12xf32, #tpu.memory_space<vmem>>, vector<1x1x18x12xf32>
    %40 = vector.shape_cast %39 : vector<1x1x18x12xf32> to vector<18x12xf32>
    %41 = vector.extract_strided_slice %40 {offsets = [0, 0], sizes = [16, 12], strides = [1, 1]} : vector<18x12xf32> to vector<16x12xf32>
    %42 = arith.truncf %41 : vector<16x12xf32> to vector<16x12xbf16>
    %c6 = arith.constant 6 : index
    %c0_29 = arith.constant 0 : index
    %c0_30 = arith.constant 0 : index
    %43 = vector.load %arg5[%c6, %c0_29, %c0_30] : memref<9x12x32xbf16, #tpu.memory_space<vmem>>, vector<1x12x32xbf16>
    %44 = vector.shape_cast %43 : vector<1x12x32xbf16> to vector<12x32xbf16>
    %cst_31 = arith.constant dense<0.000000e+00> : vector<16x32xf32>
    %45 = tpu.matmul %42, %44, %cst_31 {dimension_numbers = #tpu.dot_dimension_numbers<[1], [0], [0], [1], [0, 0, 1, 1], [], []>} : vector<16x12xbf16>, vector<12x32xbf16>, vector<16x32xf32> -> vector<16x32xf32>
    %46 = arith.addf %38, %45 : vector<16x32xf32>
    %47 = vector.extract_strided_slice %40 {offsets = [1, 0], sizes = [16, 12], strides = [1, 1]} : vector<18x12xf32> to vector<16x12xf32>
    %48 = arith.truncf %47 : vector<16x12xf32> to vector<16x12xbf16>
    %c7 = arith.constant 7 : index
    %c0_32 = arith.constant 0 : index
    %c0_33 = arith.constant 0 : index
    %49 = vector.load %arg5[%c7, %c0_32, %c0_33] : memref<9x12x32xbf16, #tpu.memory_space<vmem>>, vector<1x12x32xbf16>
    %50 = vector.shape_cast %49 : vector<1x12x32xbf16> to vector<12x32xbf16>
    %cst_34 = arith.constant dense<0.000000e+00> : vector<16x32xf32>
    %51 = tpu.matmul %48, %50, %cst_34 {dimension_numbers = #tpu.dot_dimension_numbers<[1], [0], [0], [1], [0, 0, 1, 1], [], []>} : vector<16x12xbf16>, vector<12x32xbf16>, vector<16x32xf32> -> vector<16x32xf32>
    %52 = arith.addf %46, %51 : vector<16x32xf32>
    %53 = vector.extract_strided_slice %40 {offsets = [2, 0], sizes = [16, 12], strides = [1, 1]} : vector<18x12xf32> to vector<16x12xf32>
    %54 = arith.truncf %53 : vector<16x12xf32> to vector<16x12xbf16>
    %c8 = arith.constant 8 : index
    %c0_35 = arith.constant 0 : index
    %c0_36 = arith.constant 0 : index
    %55 = vector.load %arg5[%c8, %c0_35, %c0_36] : memref<9x12x32xbf16, #tpu.memory_space<vmem>>, vector<1x12x32xbf16>
    %56 = vector.shape_cast %55 : vector<1x12x32xbf16> to vector<12x32xbf16>
    %cst_37 = arith.constant dense<0.000000e+00> : vector<16x32xf32>
    %57 = tpu.matmul %54, %56, %cst_37 {dimension_numbers = #tpu.dot_dimension_numbers<[1], [0], [0], [1], [0, 0, 1, 1], [], []>} : vector<16x12xbf16>, vector<12x32xbf16>, vector<16x32xf32> -> vector<16x32xf32>
    %58 = arith.addf %52, %57 : vector<16x32xf32>
    %c0_38 = arith.constant 0 : index
    %c0_39 = arith.constant 0 : index
    %59 = vector.load %arg6[%c0_38, %c0_39] : memref<1x32xf32, #tpu.memory_space<vmem>>, vector<1x32xf32>
    %60 = vector.broadcast %59 : vector<1x32xf32> to vector<16x32xf32>
    %61 = arith.addf %58, %60 : vector<16x32xf32>
    %62 = arith.mulf %61, %61 : vector<16x32xf32>
    %c0_40 = arith.constant 0 : index
    %c0_41 = arith.constant 0 : index
    %63 = vector.load %arg7[%c0_40, %c0_41] : memref<32x32xf32, #tpu.memory_space<vmem>>, vector<32x32xf32>
    %cst_42 = arith.constant dense<0.000000e+00> : vector<16x32xf32>
    %64 = tpu.matmul %62, %63, %cst_42 {dimension_numbers = #tpu.dot_dimension_numbers<[1], [0], [0], [1], [0, 0, 1, 1], [], []>} : vector<16x32xf32>, vector<32x32xf32>, vector<16x32xf32> -> vector<16x32xf32>
    %c0_43 = arith.constant 0 : index
    %c0_44 = arith.constant 0 : index
    %65 = vector.load %arg8[%c0_43, %c0_44] : memref<1x32xf32, #tpu.memory_space<vmem>>, vector<1x32xf32>
    %66 = vector.broadcast %65 : vector<1x32xf32> to vector<16x32xf32>
    %67 = arith.addf %64, %66 : vector<16x32xf32>
    %68 = math.rsqrt %67 : vector<16x32xf32>
    %69 = arith.mulf %61, %68 : vector<16x32xf32>
    %70 = arith.truncf %69 : vector<16x32xf32> to vector<16x32xbf16>
    %c0_45 = arith.constant 0 : index
    %c0_46 = arith.constant 0 : index
    %c0_47 = arith.constant 0 : index
    %c0_48 = arith.constant 0 : index
    %71 = vector.load %arg9[%c0_45, %c0_46, %c0_47, %c0_48] : memref<1x1x16x32xbf16, #tpu.memory_space<vmem>>, vector<1x1x16x32xbf16>
    %72 = vector.shape_cast %71 : vector<1x1x16x32xbf16> to vector<16x32xbf16>
    %73 = vector.shape_cast %70 : vector<16x32xbf16> to vector<1x1x16x32xbf16>
    tpu.vector_store %arg9[%c0_45, %c0_46, %c0_47, %c0_48], %73 {strides = array<i32>} : memref<1x1x16x32xbf16, #tpu.memory_space<vmem>>, vector<1x1x16x32xbf16>,
    return
  }
  func.func @transform_0(%arg0: i32, %arg1: i32) -> (i32, i32, i32, i32) {
    %c0_i32 = arith.constant 0 : i32
    %0 = arith.addi %arg1, %c0_i32 : i32
    %c0_i32_0 = arith.constant 0 : i32
    %c0_i32_1 = arith.constant 0 : i32
    %c0_i32_2 = arith.constant 0 : i32
    return %arg0, %0, %c0_i32_0, %c0_i32_1 : i32, i32, i32, i32
  }
  func.func @transform_1(%arg0: i32, %arg1: i32) -> (i32, i32, i32, i32) {
    %c1_i32 = arith.constant 1 : i32
    %0 = arith.addi %arg1, %c1_i32 : i32
    %c0_i32 = arith.constant 0 : i32
    %c0_i32_0 = arith.constant 0 : i32
    %c0_i32_1 = arith.constant 0 : i32
    return %arg0, %0, %c0_i32, %c0_i32_0 : i32, i32, i32, i32
  }
  func.func @transform_2(%arg0: i32, %arg1: i32) -> (i32, i32, i32, i32) {
    %c2_i32 = arith.constant 2 : i32
    %0 = arith.addi %arg1, %c2_i32 : i32
    %c0_i32 = arith.constant 0 : i32
    %c0_i32_0 = arith.constant 0 : i32
    %c0_i32_1 = arith.constant 0 : i32
    return %arg0, %0, %c0_i32, %c0_i32_0 : i32, i32, i32, i32
  }
  func.func @transform_3(%arg0: i32, %arg1: i32) -> (i32, i32, i32) {
    %c0_i32 = arith.constant 0 : i32
    %c0_i32_0 = arith.constant 0 : i32
    %c0_i32_1 = arith.constant 0 : i32
    %c0_i32_2 = arith.constant 0 : i32
    return %c0_i32, %c0_i32_0, %c0_i32_1 : i32, i32, i32
  }
  func.func @transform_4(%arg0: i32, %arg1: i32) -> (i32, i32) {
    %c0_i32 = arith.constant 0 : i32
    %c0_i32_0 = arith.constant 0 : i32
    %c0_i32_1 = arith.constant 0 : i32
    return %c0_i32, %c0_i32_0 : i32, i32
  }
  func.func @transform_5(%arg0: i32, %arg1: i32) -> (i32, i32) {
    %c0_i32 = arith.constant 0 : i32
    %c0_i32_0 = arith.constant 0 : i32
    %c0_i32_1 = arith.constant 0 : i32
    return %c0_i32, %c0_i32_0 : i32, i32
  }
  func.func @transform_6(%arg0: i32, %arg1: i32) -> (i32, i32) {
    %c0_i32 = arith.constant 0 : i32
    %c0_i32_0 = arith.constant 0 : i32
    %c0_i32_1 = arith.constant 0 : i32
    return %c0_i32, %c0_i32_0 : i32, i32
  }
  func.func @transform_7(%arg0: i32, %arg1: i32) -> (i32, i32, i32, i32) {
    %c0_i32 = arith.constant 0 : i32
    %c0_i32_0 = arith.constant 0 : i32
    %c0_i32_1 = arith.constant 0 : i32
    return %arg0, %arg1, %c0_i32, %c0_i32_0 : i32, i32, i32, i32
  }
}

module attributes {stable_mosaic.version = 11 : i64} {
  func.func @_conv3x3_row_kernel(%arg0: i32, %arg1: i32, %arg2: memref<1x1x10x128xbf16, #tpu.memory_space<vmem>>, %arg3: memref<1x1x10x128xbf16, #tpu.memory_space<vmem>>, %arg4: memref<1x1x10x128xbf16, #tpu.memory_space<vmem>>, %arg5: memref<9x128x32xbf16, #tpu.memory_space<vmem>>, %arg6: memref<1x32xf32, #tpu.memory_space<vmem>>, %arg7: memref<32x32xf32, #tpu.memory_space<vmem>>, %arg8: memref<1x32xf32, #tpu.memory_space<vmem>>, %arg9: memref<1x1x8x32xbf16, #tpu.memory_space<vmem>>) attributes {dimension_semantics = [#tpu.dimension_semantics<parallel>, #tpu.dimension_semantics<parallel>], iteration_bounds = array<i64: 2, 8>, scalar_prefetch = 0 : i64, scratch_operands = 0 : i64, tpu.core_type = #tpu.core_type<tc>, window_params = [{transform_indices = @transform_0, window_bounds = array<i64: 1, 1, 10, 128>}, {transform_indices = @transform_1, window_bounds = array<i64: 1, 1, 10, 128>}, {transform_indices = @transform_2, window_bounds = array<i64: 1, 1, 10, 128>}, {pipeline_mode = #tpu.pipeline_mode<synchronous>, transform_indices = @transform_3, window_bounds = array<i64: 9, 128, 32>}, {pipeline_mode = #tpu.pipeline_mode<synchronous>, transform_indices = @transform_4, window_bounds = array<i64: 1, 32>}, {pipeline_mode = #tpu.pipeline_mode<synchronous>, transform_indices = @transform_5, window_bounds = array<i64: 32, 32>}, {pipeline_mode = #tpu.pipeline_mode<synchronous>, transform_indices = @transform_6, window_bounds = array<i64: 1, 32>}, {transform_indices = @transform_7, window_bounds = array<i64: 1, 1, 8, 32>}]} {
    %c0 = arith.constant 0 : index
    %c0_0 = arith.constant 0 : index
    %c0_1 = arith.constant 0 : index
    %c0_2 = arith.constant 0 : index
    %0 = vector.load %arg2[%c0, %c0_0, %c0_1, %c0_2] : memref<1x1x10x128xbf16, #tpu.memory_space<vmem>>, vector<1x1x10x128xbf16>
    %1 = vector.shape_cast %0 : vector<1x1x10x128xbf16> to vector<10x128xbf16>
    %2 = vector.extract_strided_slice %1 {offsets = [0, 0], sizes = [8, 128], strides = [1, 1]} : vector<10x128xbf16> to vector<8x128xbf16>
    %c0_3 = arith.constant 0 : index
    %c0_4 = arith.constant 0 : index
    %c0_5 = arith.constant 0 : index
    %3 = vector.load %arg5[%c0_3, %c0_4, %c0_5] : memref<9x128x32xbf16, #tpu.memory_space<vmem>>, vector<1x128x32xbf16>
    %4 = vector.shape_cast %3 : vector<1x128x32xbf16> to vector<128x32xbf16>
    %cst = arith.constant dense<0.000000e+00> : vector<8x32xf32>
    %5 = tpu.matmul %2, %4, %cst {dimension_numbers = #tpu.dot_dimension_numbers<[1], [0], [0], [1], [0, 0, 1, 1], [], []>} : vector<8x128xbf16>, vector<128x32xbf16>, vector<8x32xf32> -> vector<8x32xf32>
    %6 = vector.extract_strided_slice %1 {offsets = [1, 0], sizes = [8, 128], strides = [1, 1]} : vector<10x128xbf16> to vector<8x128xbf16>
    %c1 = arith.constant 1 : index
    %c0_6 = arith.constant 0 : index
    %c0_7 = arith.constant 0 : index
    %7 = vector.load %arg5[%c1, %c0_6, %c0_7] : memref<9x128x32xbf16, #tpu.memory_space<vmem>>, vector<1x128x32xbf16>
    %8 = vector.shape_cast %7 : vector<1x128x32xbf16> to vector<128x32xbf16>
    %cst_8 = arith.constant dense<0.000000e+00> : vector<8x32xf32>
    %9 = tpu.matmul %6, %8, %cst_8 {dimension_numbers = #tpu.dot_dimension_numbers<[1], [0], [0], [1], [0, 0, 1, 1], [], []>} : vector<8x128xbf16>, vector<128x32xbf16>, vector<8x32xf32> -> vector<8x32xf32>
    %10 = arith.addf %5, %9 : vector<8x32xf32>
    %11 = vector.extract_strided_slice %1 {offsets = [2, 0], sizes = [8, 128], strides = [1, 1]} : vector<10x128xbf16> to vector<8x128xbf16>
    %c2 = arith.constant 2 : index
    %c0_9 = arith.constant 0 : index
    %c0_10 = arith.constant 0 : index
    %12 = vector.load %arg5[%c2, %c0_9, %c0_10] : memref<9x128x32xbf16, #tpu.memory_space<vmem>>, vector<1x128x32xbf16>
    %13 = vector.shape_cast %12 : vector<1x128x32xbf16> to vector<128x32xbf16>
    %cst_11 = arith.constant dense<0.000000e+00> : vector<8x32xf32>
    %14 = tpu.matmul %11, %13, %cst_11 {dimension_numbers = #tpu.dot_dimension_numbers<[1], [0], [0], [1], [0, 0, 1, 1], [], []>} : vector<8x128xbf16>, vector<128x32xbf16>, vector<8x32xf32> -> vector<8x32xf32>
    %15 = arith.addf %10, %14 : vector<8x32xf32>
    %c0_12 = arith.constant 0 : index
    %c0_13 = arith.constant 0 : index
    %c0_14 = arith.constant 0 : index
    %c0_15 = arith.constant 0 : index
    %16 = vector.load %arg3[%c0_12, %c0_13, %c0_14, %c0_15] : memref<1x1x10x128xbf16, #tpu.memory_space<vmem>>, vector<1x1x10x128xbf16>
    %17 = vector.shape_cast %16 : vector<1x1x10x128xbf16> to vector<10x128xbf16>
    %18 = vector.extract_strided_slice %17 {offsets = [0, 0], sizes = [8, 128], strides = [1, 1]} : vector<10x128xbf16> to vector<8x128xbf16>
    %c3 = arith.constant 3 : index
    %c0_16 = arith.constant 0 : index
    %c0_17 = arith.constant 0 : index
    %19 = vector.load %arg5[%c3, %c0_16, %c0_17] : memref<9x128x32xbf16, #tpu.memory_space<vmem>>, vector<1x128x32xbf16>
    %20 = vector.shape_cast %19 : vector<1x128x32xbf16> to vector<128x32xbf16>
    %cst_18 = arith.constant dense<0.000000e+00> : vector<8x32xf32>
    %21 = tpu.matmul %18, %20, %cst_18 {dimension_numbers = #tpu.dot_dimension_numbers<[1], [0], [0], [1], [0, 0, 1, 1], [], []>} : vector<8x128xbf16>, vector<128x32xbf16>, vector<8x32xf32> -> vector<8x32xf32>
    %22 = arith.addf %15, %21 : vector<8x32xf32>
    %23 = vector.extract_strided_slice %17 {offsets = [1, 0], sizes = [8, 128], strides = [1, 1]} : vector<10x128xbf16> to vector<8x128xbf16>
    %c4 = arith.constant 4 : index
    %c0_19 = arith.constant 0 : index
    %c0_20 = arith.constant 0 : index
    %24 = vector.load %arg5[%c4, %c0_19, %c0_20] : memref<9x128x32xbf16, #tpu.memory_space<vmem>>, vector<1x128x32xbf16>
    %25 = vector.shape_cast %24 : vector<1x128x32xbf16> to vector<128x32xbf16>
    %cst_21 = arith.constant dense<0.000000e+00> : vector<8x32xf32>
    %26 = tpu.matmul %23, %25, %cst_21 {dimension_numbers = #tpu.dot_dimension_numbers<[1], [0], [0], [1], [0, 0, 1, 1], [], []>} : vector<8x128xbf16>, vector<128x32xbf16>, vector<8x32xf32> -> vector<8x32xf32>
    %27 = arith.addf %22, %26 : vector<8x32xf32>
    %28 = vector.extract_strided_slice %17 {offsets = [2, 0], sizes = [8, 128], strides = [1, 1]} : vector<10x128xbf16> to vector<8x128xbf16>
    %c5 = arith.constant 5 : index
    %c0_22 = arith.constant 0 : index
    %c0_23 = arith.constant 0 : index
    %29 = vector.load %arg5[%c5, %c0_22, %c0_23] : memref<9x128x32xbf16, #tpu.memory_space<vmem>>, vector<1x128x32xbf16>
    %30 = vector.shape_cast %29 : vector<1x128x32xbf16> to vector<128x32xbf16>
    %cst_24 = arith.constant dense<0.000000e+00> : vector<8x32xf32>
    %31 = tpu.matmul %28, %30, %cst_24 {dimension_numbers = #tpu.dot_dimension_numbers<[1], [0], [0], [1], [0, 0, 1, 1], [], []>} : vector<8x128xbf16>, vector<128x32xbf16>, vector<8x32xf32> -> vector<8x32xf32>
    %32 = arith.addf %27, %31 : vector<8x32xf32>
    %c0_25 = arith.constant 0 : index
    %c0_26 = arith.constant 0 : index
    %c0_27 = arith.constant 0 : index
    %c0_28 = arith.constant 0 : index
    %33 = vector.load %arg4[%c0_25, %c0_26, %c0_27, %c0_28] : memref<1x1x10x128xbf16, #tpu.memory_space<vmem>>, vector<1x1x10x128xbf16>
    %34 = vector.shape_cast %33 : vector<1x1x10x128xbf16> to vector<10x128xbf16>
    %35 = vector.extract_strided_slice %34 {offsets = [0, 0], sizes = [8, 128], strides = [1, 1]} : vector<10x128xbf16> to vector<8x128xbf16>
    %c6 = arith.constant 6 : index
    %c0_29 = arith.constant 0 : index
    %c0_30 = arith.constant 0 : index
    %36 = vector.load %arg5[%c6, %c0_29, %c0_30] : memref<9x128x32xbf16, #tpu.memory_space<vmem>>, vector<1x128x32xbf16>
    %37 = vector.shape_cast %36 : vector<1x128x32xbf16> to vector<128x32xbf16>
    %cst_31 = arith.constant dense<0.000000e+00> : vector<8x32xf32>
    %38 = tpu.matmul %35, %37, %cst_31 {dimension_numbers = #tpu.dot_dimension_numbers<[1], [0], [0], [1], [0, 0, 1, 1], [], []>} : vector<8x128xbf16>, vector<128x32xbf16>, vector<8x32xf32> -> vector<8x32xf32>
    %39 = arith.addf %32, %38 : vector<8x32xf32>
    %40 = vector.extract_strided_slice %34 {offsets = [1, 0], sizes = [8, 128], strides = [1, 1]} : vector<10x128xbf16> to vector<8x128xbf16>
    %c7 = arith.constant 7 : index
    %c0_32 = arith.constant 0 : index
    %c0_33 = arith.constant 0 : index
    %41 = vector.load %arg5[%c7, %c0_32, %c0_33] : memref<9x128x32xbf16, #tpu.memory_space<vmem>>, vector<1x128x32xbf16>
    %42 = vector.shape_cast %41 : vector<1x128x32xbf16> to vector<128x32xbf16>
    %cst_34 = arith.constant dense<0.000000e+00> : vector<8x32xf32>
    %43 = tpu.matmul %40, %42, %cst_34 {dimension_numbers = #tpu.dot_dimension_numbers<[1], [0], [0], [1], [0, 0, 1, 1], [], []>} : vector<8x128xbf16>, vector<128x32xbf16>, vector<8x32xf32> -> vector<8x32xf32>
    %44 = arith.addf %39, %43 : vector<8x32xf32>
    %45 = vector.extract_strided_slice %34 {offsets = [2, 0], sizes = [8, 128], strides = [1, 1]} : vector<10x128xbf16> to vector<8x128xbf16>
    %c8 = arith.constant 8 : index
    %c0_35 = arith.constant 0 : index
    %c0_36 = arith.constant 0 : index
    %46 = vector.load %arg5[%c8, %c0_35, %c0_36] : memref<9x128x32xbf16, #tpu.memory_space<vmem>>, vector<1x128x32xbf16>
    %47 = vector.shape_cast %46 : vector<1x128x32xbf16> to vector<128x32xbf16>
    %cst_37 = arith.constant dense<0.000000e+00> : vector<8x32xf32>
    %48 = tpu.matmul %45, %47, %cst_37 {dimension_numbers = #tpu.dot_dimension_numbers<[1], [0], [0], [1], [0, 0, 1, 1], [], []>} : vector<8x128xbf16>, vector<128x32xbf16>, vector<8x32xf32> -> vector<8x32xf32>
    %49 = arith.addf %44, %48 : vector<8x32xf32>
    %c0_38 = arith.constant 0 : index
    %c0_39 = arith.constant 0 : index
    %50 = vector.load %arg6[%c0_38, %c0_39] : memref<1x32xf32, #tpu.memory_space<vmem>>, vector<1x32xf32>
    %51 = vector.broadcast %50 : vector<1x32xf32> to vector<8x32xf32>
    %52 = arith.addf %49, %51 : vector<8x32xf32>
    %53 = arith.mulf %52, %52 : vector<8x32xf32>
    %c0_40 = arith.constant 0 : index
    %c0_41 = arith.constant 0 : index
    %54 = vector.load %arg7[%c0_40, %c0_41] : memref<32x32xf32, #tpu.memory_space<vmem>>, vector<32x32xf32>
    %cst_42 = arith.constant dense<0.000000e+00> : vector<8x32xf32>
    %55 = tpu.matmul %53, %54, %cst_42 {dimension_numbers = #tpu.dot_dimension_numbers<[1], [0], [0], [1], [0, 0, 1, 1], [], []>} : vector<8x32xf32>, vector<32x32xf32>, vector<8x32xf32> -> vector<8x32xf32>
    %c0_43 = arith.constant 0 : index
    %c0_44 = arith.constant 0 : index
    %56 = vector.load %arg8[%c0_43, %c0_44] : memref<1x32xf32, #tpu.memory_space<vmem>>, vector<1x32xf32>
    %57 = vector.broadcast %56 : vector<1x32xf32> to vector<8x32xf32>
    %58 = arith.addf %55, %57 : vector<8x32xf32>
    %59 = math.rsqrt %58 : vector<8x32xf32>
    %60 = arith.mulf %52, %59 : vector<8x32xf32>
    %61 = arith.truncf %60 : vector<8x32xf32> to vector<8x32xbf16>
    %c0_45 = arith.constant 0 : index
    %c0_46 = arith.constant 0 : index
    %c0_47 = arith.constant 0 : index
    %c0_48 = arith.constant 0 : index
    %62 = vector.load %arg9[%c0_45, %c0_46, %c0_47, %c0_48] : memref<1x1x8x32xbf16, #tpu.memory_space<vmem>>, vector<1x1x8x32xbf16>
    %63 = vector.shape_cast %62 : vector<1x1x8x32xbf16> to vector<8x32xbf16>
    %64 = vector.shape_cast %61 : vector<8x32xbf16> to vector<1x1x8x32xbf16>
    tpu.vector_store %arg9[%c0_45, %c0_46, %c0_47, %c0_48], %64 {strides = array<i32>} : memref<1x1x8x32xbf16, #tpu.memory_space<vmem>>, vector<1x1x8x32xbf16>,
    return
  }
  func.func @transform_0(%arg0: i32, %arg1: i32) -> (i32, i32, i32, i32) {
    %c0_i32 = arith.constant 0 : i32
    %0 = arith.addi %arg1, %c0_i32 : i32
    %c0_i32_0 = arith.constant 0 : i32
    %c0_i32_1 = arith.constant 0 : i32
    %c0_i32_2 = arith.constant 0 : i32
    return %arg0, %0, %c0_i32_0, %c0_i32_1 : i32, i32, i32, i32
  }
  func.func @transform_1(%arg0: i32, %arg1: i32) -> (i32, i32, i32, i32) {
    %c1_i32 = arith.constant 1 : i32
    %0 = arith.addi %arg1, %c1_i32 : i32
    %c0_i32 = arith.constant 0 : i32
    %c0_i32_0 = arith.constant 0 : i32
    %c0_i32_1 = arith.constant 0 : i32
    return %arg0, %0, %c0_i32, %c0_i32_0 : i32, i32, i32, i32
  }
  func.func @transform_2(%arg0: i32, %arg1: i32) -> (i32, i32, i32, i32) {
    %c2_i32 = arith.constant 2 : i32
    %0 = arith.addi %arg1, %c2_i32 : i32
    %c0_i32 = arith.constant 0 : i32
    %c0_i32_0 = arith.constant 0 : i32
    %c0_i32_1 = arith.constant 0 : i32
    return %arg0, %0, %c0_i32, %c0_i32_0 : i32, i32, i32, i32
  }
  func.func @transform_3(%arg0: i32, %arg1: i32) -> (i32, i32, i32) {
    %c0_i32 = arith.constant 0 : i32
    %c0_i32_0 = arith.constant 0 : i32
    %c0_i32_1 = arith.constant 0 : i32
    %c0_i32_2 = arith.constant 0 : i32
    return %c0_i32, %c0_i32_0, %c0_i32_1 : i32, i32, i32
  }
  func.func @transform_4(%arg0: i32, %arg1: i32) -> (i32, i32) {
    %c0_i32 = arith.constant 0 : i32
    %c0_i32_0 = arith.constant 0 : i32
    %c0_i32_1 = arith.constant 0 : i32
    return %c0_i32, %c0_i32_0 : i32, i32
  }
  func.func @transform_5(%arg0: i32, %arg1: i32) -> (i32, i32) {
    %c0_i32 = arith.constant 0 : i32
    %c0_i32_0 = arith.constant 0 : i32
    %c0_i32_1 = arith.constant 0 : i32
    return %c0_i32, %c0_i32_0 : i32, i32
  }
  func.func @transform_6(%arg0: i32, %arg1: i32) -> (i32, i32) {
    %c0_i32 = arith.constant 0 : i32
    %c0_i32_0 = arith.constant 0 : i32
    %c0_i32_1 = arith.constant 0 : i32
    return %c0_i32, %c0_i32_0 : i32, i32
  }
  func.func @transform_7(%arg0: i32, %arg1: i32) -> (i32, i32, i32, i32) {
    %c0_i32 = arith.constant 0 : i32
    %c0_i32_0 = arith.constant 0 : i32
    %c0_i32_1 = arith.constant 0 : i32
    return %arg0, %arg1, %c0_i32, %c0_i32_0 : i32, i32, i32, i32
  }
}

module attributes {stable_mosaic.version = 11 : i64} {
  func.func @_conv3x3_row_kernel(%arg0: i32, %arg1: i32, %arg2: memref<1x1x6x128xbf16, #tpu.memory_space<vmem>>, %arg3: memref<1x1x6x128xbf16, #tpu.memory_space<vmem>>, %arg4: memref<1x1x6x128xbf16, #tpu.memory_space<vmem>>, %arg5: memref<9x128x32xbf16, #tpu.memory_space<vmem>>, %arg6: memref<1x32xf32, #tpu.memory_space<vmem>>, %arg7: memref<32x32xf32, #tpu.memory_space<vmem>>, %arg8: memref<1x32xf32, #tpu.memory_space<vmem>>, %arg9: memref<1x1x4x32xbf16, #tpu.memory_space<vmem>>) attributes {dimension_semantics = [#tpu.dimension_semantics<parallel>, #tpu.dimension_semantics<parallel>], iteration_bounds = array<i64: 2, 4>, scalar_prefetch = 0 : i64, scratch_operands = 0 : i64, tpu.core_type = #tpu.core_type<tc>, window_params = [{transform_indices = @transform_0, window_bounds = array<i64: 1, 1, 6, 128>}, {transform_indices = @transform_1, window_bounds = array<i64: 1, 1, 6, 128>}, {transform_indices = @transform_2, window_bounds = array<i64: 1, 1, 6, 128>}, {pipeline_mode = #tpu.pipeline_mode<synchronous>, transform_indices = @transform_3, window_bounds = array<i64: 9, 128, 32>}, {pipeline_mode = #tpu.pipeline_mode<synchronous>, transform_indices = @transform_4, window_bounds = array<i64: 1, 32>}, {pipeline_mode = #tpu.pipeline_mode<synchronous>, transform_indices = @transform_5, window_bounds = array<i64: 32, 32>}, {pipeline_mode = #tpu.pipeline_mode<synchronous>, transform_indices = @transform_6, window_bounds = array<i64: 1, 32>}, {transform_indices = @transform_7, window_bounds = array<i64: 1, 1, 4, 32>}]} {
    %c0 = arith.constant 0 : index
    %c0_0 = arith.constant 0 : index
    %c0_1 = arith.constant 0 : index
    %c0_2 = arith.constant 0 : index
    %0 = vector.load %arg2[%c0, %c0_0, %c0_1, %c0_2] : memref<1x1x6x128xbf16, #tpu.memory_space<vmem>>, vector<1x1x6x128xbf16>
    %1 = vector.shape_cast %0 : vector<1x1x6x128xbf16> to vector<6x128xbf16>
    %2 = vector.extract_strided_slice %1 {offsets = [0, 0], sizes = [4, 128], strides = [1, 1]} : vector<6x128xbf16> to vector<4x128xbf16>
    %c0_3 = arith.constant 0 : index
    %c0_4 = arith.constant 0 : index
    %c0_5 = arith.constant 0 : index
    %3 = vector.load %arg5[%c0_3, %c0_4, %c0_5] : memref<9x128x32xbf16, #tpu.memory_space<vmem>>, vector<1x128x32xbf16>
    %4 = vector.shape_cast %3 : vector<1x128x32xbf16> to vector<128x32xbf16>
    %cst = arith.constant dense<0.000000e+00> : vector<4x32xf32>
    %5 = tpu.matmul %2, %4, %cst {dimension_numbers = #tpu.dot_dimension_numbers<[1], [0], [0], [1], [0, 0, 1, 1], [], []>} : vector<4x128xbf16>, vector<128x32xbf16>, vector<4x32xf32> -> vector<4x32xf32>
    %6 = vector.extract_strided_slice %1 {offsets = [1, 0], sizes = [4, 128], strides = [1, 1]} : vector<6x128xbf16> to vector<4x128xbf16>
    %c1 = arith.constant 1 : index
    %c0_6 = arith.constant 0 : index
    %c0_7 = arith.constant 0 : index
    %7 = vector.load %arg5[%c1, %c0_6, %c0_7] : memref<9x128x32xbf16, #tpu.memory_space<vmem>>, vector<1x128x32xbf16>
    %8 = vector.shape_cast %7 : vector<1x128x32xbf16> to vector<128x32xbf16>
    %cst_8 = arith.constant dense<0.000000e+00> : vector<4x32xf32>
    %9 = tpu.matmul %6, %8, %cst_8 {dimension_numbers = #tpu.dot_dimension_numbers<[1], [0], [0], [1], [0, 0, 1, 1], [], []>} : vector<4x128xbf16>, vector<128x32xbf16>, vector<4x32xf32> -> vector<4x32xf32>
    %10 = arith.addf %5, %9 : vector<4x32xf32>
    %11 = vector.extract_strided_slice %1 {offsets = [2, 0], sizes = [4, 128], strides = [1, 1]} : vector<6x128xbf16> to vector<4x128xbf16>
    %c2 = arith.constant 2 : index
    %c0_9 = arith.constant 0 : index
    %c0_10 = arith.constant 0 : index
    %12 = vector.load %arg5[%c2, %c0_9, %c0_10] : memref<9x128x32xbf16, #tpu.memory_space<vmem>>, vector<1x128x32xbf16>
    %13 = vector.shape_cast %12 : vector<1x128x32xbf16> to vector<128x32xbf16>
    %cst_11 = arith.constant dense<0.000000e+00> : vector<4x32xf32>
    %14 = tpu.matmul %11, %13, %cst_11 {dimension_numbers = #tpu.dot_dimension_numbers<[1], [0], [0], [1], [0, 0, 1, 1], [], []>} : vector<4x128xbf16>, vector<128x32xbf16>, vector<4x32xf32> -> vector<4x32xf32>
    %15 = arith.addf %10, %14 : vector<4x32xf32>
    %c0_12 = arith.constant 0 : index
    %c0_13 = arith.constant 0 : index
    %c0_14 = arith.constant 0 : index
    %c0_15 = arith.constant 0 : index
    %16 = vector.load %arg3[%c0_12, %c0_13, %c0_14, %c0_15] : memref<1x1x6x128xbf16, #tpu.memory_space<vmem>>, vector<1x1x6x128xbf16>
    %17 = vector.shape_cast %16 : vector<1x1x6x128xbf16> to vector<6x128xbf16>
    %18 = vector.extract_strided_slice %17 {offsets = [0, 0], sizes = [4, 128], strides = [1, 1]} : vector<6x128xbf16> to vector<4x128xbf16>
    %c3 = arith.constant 3 : index
    %c0_16 = arith.constant 0 : index
    %c0_17 = arith.constant 0 : index
    %19 = vector.load %arg5[%c3, %c0_16, %c0_17] : memref<9x128x32xbf16, #tpu.memory_space<vmem>>, vector<1x128x32xbf16>
    %20 = vector.shape_cast %19 : vector<1x128x32xbf16> to vector<128x32xbf16>
    %cst_18 = arith.constant dense<0.000000e+00> : vector<4x32xf32>
    %21 = tpu.matmul %18, %20, %cst_18 {dimension_numbers = #tpu.dot_dimension_numbers<[1], [0], [0], [1], [0, 0, 1, 1], [], []>} : vector<4x128xbf16>, vector<128x32xbf16>, vector<4x32xf32> -> vector<4x32xf32>
    %22 = arith.addf %15, %21 : vector<4x32xf32>
    %23 = vector.extract_strided_slice %17 {offsets = [1, 0], sizes = [4, 128], strides = [1, 1]} : vector<6x128xbf16> to vector<4x128xbf16>
    %c4 = arith.constant 4 : index
    %c0_19 = arith.constant 0 : index
    %c0_20 = arith.constant 0 : index
    %24 = vector.load %arg5[%c4, %c0_19, %c0_20] : memref<9x128x32xbf16, #tpu.memory_space<vmem>>, vector<1x128x32xbf16>
    %25 = vector.shape_cast %24 : vector<1x128x32xbf16> to vector<128x32xbf16>
    %cst_21 = arith.constant dense<0.000000e+00> : vector<4x32xf32>
    %26 = tpu.matmul %23, %25, %cst_21 {dimension_numbers = #tpu.dot_dimension_numbers<[1], [0], [0], [1], [0, 0, 1, 1], [], []>} : vector<4x128xbf16>, vector<128x32xbf16>, vector<4x32xf32> -> vector<4x32xf32>
    %27 = arith.addf %22, %26 : vector<4x32xf32>
    %28 = vector.extract_strided_slice %17 {offsets = [2, 0], sizes = [4, 128], strides = [1, 1]} : vector<6x128xbf16> to vector<4x128xbf16>
    %c5 = arith.constant 5 : index
    %c0_22 = arith.constant 0 : index
    %c0_23 = arith.constant 0 : index
    %29 = vector.load %arg5[%c5, %c0_22, %c0_23] : memref<9x128x32xbf16, #tpu.memory_space<vmem>>, vector<1x128x32xbf16>
    %30 = vector.shape_cast %29 : vector<1x128x32xbf16> to vector<128x32xbf16>
    %cst_24 = arith.constant dense<0.000000e+00> : vector<4x32xf32>
    %31 = tpu.matmul %28, %30, %cst_24 {dimension_numbers = #tpu.dot_dimension_numbers<[1], [0], [0], [1], [0, 0, 1, 1], [], []>} : vector<4x128xbf16>, vector<128x32xbf16>, vector<4x32xf32> -> vector<4x32xf32>
    %32 = arith.addf %27, %31 : vector<4x32xf32>
    %c0_25 = arith.constant 0 : index
    %c0_26 = arith.constant 0 : index
    %c0_27 = arith.constant 0 : index
    %c0_28 = arith.constant 0 : index
    %33 = vector.load %arg4[%c0_25, %c0_26, %c0_27, %c0_28] : memref<1x1x6x128xbf16, #tpu.memory_space<vmem>>, vector<1x1x6x128xbf16>
    %34 = vector.shape_cast %33 : vector<1x1x6x128xbf16> to vector<6x128xbf16>
    %35 = vector.extract_strided_slice %34 {offsets = [0, 0], sizes = [4, 128], strides = [1, 1]} : vector<6x128xbf16> to vector<4x128xbf16>
    %c6 = arith.constant 6 : index
    %c0_29 = arith.constant 0 : index
    %c0_30 = arith.constant 0 : index
    %36 = vector.load %arg5[%c6, %c0_29, %c0_30] : memref<9x128x32xbf16, #tpu.memory_space<vmem>>, vector<1x128x32xbf16>
    %37 = vector.shape_cast %36 : vector<1x128x32xbf16> to vector<128x32xbf16>
    %cst_31 = arith.constant dense<0.000000e+00> : vector<4x32xf32>
    %38 = tpu.matmul %35, %37, %cst_31 {dimension_numbers = #tpu.dot_dimension_numbers<[1], [0], [0], [1], [0, 0, 1, 1], [], []>} : vector<4x128xbf16>, vector<128x32xbf16>, vector<4x32xf32> -> vector<4x32xf32>
    %39 = arith.addf %32, %38 : vector<4x32xf32>
    %40 = vector.extract_strided_slice %34 {offsets = [1, 0], sizes = [4, 128], strides = [1, 1]} : vector<6x128xbf16> to vector<4x128xbf16>
    %c7 = arith.constant 7 : index
    %c0_32 = arith.constant 0 : index
    %c0_33 = arith.constant 0 : index
    %41 = vector.load %arg5[%c7, %c0_32, %c0_33] : memref<9x128x32xbf16, #tpu.memory_space<vmem>>, vector<1x128x32xbf16>
    %42 = vector.shape_cast %41 : vector<1x128x32xbf16> to vector<128x32xbf16>
    %cst_34 = arith.constant dense<0.000000e+00> : vector<4x32xf32>
    %43 = tpu.matmul %40, %42, %cst_34 {dimension_numbers = #tpu.dot_dimension_numbers<[1], [0], [0], [1], [0, 0, 1, 1], [], []>} : vector<4x128xbf16>, vector<128x32xbf16>, vector<4x32xf32> -> vector<4x32xf32>
    %44 = arith.addf %39, %43 : vector<4x32xf32>
    %45 = vector.extract_strided_slice %34 {offsets = [2, 0], sizes = [4, 128], strides = [1, 1]} : vector<6x128xbf16> to vector<4x128xbf16>
    %c8 = arith.constant 8 : index
    %c0_35 = arith.constant 0 : index
    %c0_36 = arith.constant 0 : index
    %46 = vector.load %arg5[%c8, %c0_35, %c0_36] : memref<9x128x32xbf16, #tpu.memory_space<vmem>>, vector<1x128x32xbf16>
    %47 = vector.shape_cast %46 : vector<1x128x32xbf16> to vector<128x32xbf16>
    %cst_37 = arith.constant dense<0.000000e+00> : vector<4x32xf32>
    %48 = tpu.matmul %45, %47, %cst_37 {dimension_numbers = #tpu.dot_dimension_numbers<[1], [0], [0], [1], [0, 0, 1, 1], [], []>} : vector<4x128xbf16>, vector<128x32xbf16>, vector<4x32xf32> -> vector<4x32xf32>
    %49 = arith.addf %44, %48 : vector<4x32xf32>
    %c0_38 = arith.constant 0 : index
    %c0_39 = arith.constant 0 : index
    %50 = vector.load %arg6[%c0_38, %c0_39] : memref<1x32xf32, #tpu.memory_space<vmem>>, vector<1x32xf32>
    %51 = vector.broadcast %50 : vector<1x32xf32> to vector<4x32xf32>
    %52 = arith.addf %49, %51 : vector<4x32xf32>
    %53 = arith.mulf %52, %52 : vector<4x32xf32>
    %c0_40 = arith.constant 0 : index
    %c0_41 = arith.constant 0 : index
    %54 = vector.load %arg7[%c0_40, %c0_41] : memref<32x32xf32, #tpu.memory_space<vmem>>, vector<32x32xf32>
    %cst_42 = arith.constant dense<0.000000e+00> : vector<4x32xf32>
    %55 = tpu.matmul %53, %54, %cst_42 {dimension_numbers = #tpu.dot_dimension_numbers<[1], [0], [0], [1], [0, 0, 1, 1], [], []>} : vector<4x32xf32>, vector<32x32xf32>, vector<4x32xf32> -> vector<4x32xf32>
    %c0_43 = arith.constant 0 : index
    %c0_44 = arith.constant 0 : index
    %56 = vector.load %arg8[%c0_43, %c0_44] : memref<1x32xf32, #tpu.memory_space<vmem>>, vector<1x32xf32>
    %57 = vector.broadcast %56 : vector<1x32xf32> to vector<4x32xf32>
    %58 = arith.addf %55, %57 : vector<4x32xf32>
    %59 = math.rsqrt %58 : vector<4x32xf32>
    %60 = arith.mulf %52, %59 : vector<4x32xf32>
    %61 = arith.truncf %60 : vector<4x32xf32> to vector<4x32xbf16>
    %c0_45 = arith.constant 0 : index
    %c0_46 = arith.constant 0 : index
    %c0_47 = arith.constant 0 : index
    %c0_48 = arith.constant 0 : index
    %62 = vector.load %arg9[%c0_45, %c0_46, %c0_47, %c0_48] : memref<1x1x4x32xbf16, #tpu.memory_space<vmem>>, vector<1x1x4x32xbf16>
    %63 = vector.shape_cast %62 : vector<1x1x4x32xbf16> to vector<4x32xbf16>
    %64 = vector.shape_cast %61 : vector<4x32xbf16> to vector<1x1x4x32xbf16>
    tpu.vector_store %arg9[%c0_45, %c0_46, %c0_47, %c0_48], %64 {strides = array<i32>} : memref<1x1x4x32xbf16, #tpu.memory_space<vmem>>, vector<1x1x4x32xbf16>,
    return
  }
  func.func @transform_0(%arg0: i32, %arg1: i32) -> (i32, i32, i32, i32) {
    %c0_i32 = arith.constant 0 : i32
    %0 = arith.addi %arg1, %c0_i32 : i32
    %c0_i32_0 = arith.constant 0 : i32
    %c0_i32_1 = arith.constant 0 : i32
    %c0_i32_2 = arith.constant 0 : i32
    return %arg0, %0, %c0_i32_0, %c0_i32_1 : i32, i32, i32, i32
  }
  func.func @transform_1(%arg0: i32, %arg1: i32) -> (i32, i32, i32, i32) {
    %c1_i32 = arith.constant 1 : i32
    %0 = arith.addi %arg1, %c1_i32 : i32
    %c0_i32 = arith.constant 0 : i32
    %c0_i32_0 = arith.constant 0 : i32
    %c0_i32_1 = arith.constant 0 : i32
    return %arg0, %0, %c0_i32, %c0_i32_0 : i32, i32, i32, i32
  }
  func.func @transform_2(%arg0: i32, %arg1: i32) -> (i32, i32, i32, i32) {
    %c2_i32 = arith.constant 2 : i32
    %0 = arith.addi %arg1, %c2_i32 : i32
    %c0_i32 = arith.constant 0 : i32
    %c0_i32_0 = arith.constant 0 : i32
    %c0_i32_1 = arith.constant 0 : i32
    return %arg0, %0, %c0_i32, %c0_i32_0 : i32, i32, i32, i32
  }
  func.func @transform_3(%arg0: i32, %arg1: i32) -> (i32, i32, i32) {
    %c0_i32 = arith.constant 0 : i32
    %c0_i32_0 = arith.constant 0 : i32
    %c0_i32_1 = arith.constant 0 : i32
    %c0_i32_2 = arith.constant 0 : i32
    return %c0_i32, %c0_i32_0, %c0_i32_1 : i32, i32, i32
  }
  func.func @transform_4(%arg0: i32, %arg1: i32) -> (i32, i32) {
    %c0_i32 = arith.constant 0 : i32
    %c0_i32_0 = arith.constant 0 : i32
    %c0_i32_1 = arith.constant 0 : i32
    return %c0_i32, %c0_i32_0 : i32, i32
  }
  func.func @transform_5(%arg0: i32, %arg1: i32) -> (i32, i32) {
    %c0_i32 = arith.constant 0 : i32
    %c0_i32_0 = arith.constant 0 : i32
    %c0_i32_1 = arith.constant 0 : i32
    return %c0_i32, %c0_i32_0 : i32, i32
  }
  func.func @transform_6(%arg0: i32, %arg1: i32) -> (i32, i32) {
    %c0_i32 = arith.constant 0 : i32
    %c0_i32_0 = arith.constant 0 : i32
    %c0_i32_1 = arith.constant 0 : i32
    return %c0_i32, %c0_i32_0 : i32, i32
  }
  func.func @transform_7(%arg0: i32, %arg1: i32) -> (i32, i32, i32, i32) {
    %c0_i32 = arith.constant 0 : i32
    %c0_i32_0 = arith.constant 0 : i32
    %c0_i32_1 = arith.constant 0 : i32
    return %arg0, %arg1, %c0_i32, %c0_i32_0 : i32, i32, i32, i32
  }
}

module attributes {stable_mosaic.version = 11 : i64} {
  func.func @_conv3x3_row_kernel(%arg0: i32, %arg1: i32, %arg2: memref<1x1x4x128xbf16, #tpu.memory_space<vmem>>, %arg3: memref<1x1x4x128xbf16, #tpu.memory_space<vmem>>, %arg4: memref<1x1x4x128xbf16, #tpu.memory_space<vmem>>, %arg5: memref<9x128x48xbf16, #tpu.memory_space<vmem>>, %arg6: memref<1x48xf32, #tpu.memory_space<vmem>>, %arg7: memref<1x1x2x48xf32, #tpu.memory_space<vmem>>) attributes {dimension_semantics = [#tpu.dimension_semantics<parallel>, #tpu.dimension_semantics<parallel>], iteration_bounds = array<i64: 2, 2>, scalar_prefetch = 0 : i64, scratch_operands = 0 : i64, tpu.core_type = #tpu.core_type<tc>, window_params = [{transform_indices = @transform_0, window_bounds = array<i64: 1, 1, 4, 128>}, {transform_indices = @transform_1, window_bounds = array<i64: 1, 1, 4, 128>}, {transform_indices = @transform_2, window_bounds = array<i64: 1, 1, 4, 128>}, {pipeline_mode = #tpu.pipeline_mode<synchronous>, transform_indices = @transform_3, window_bounds = array<i64: 9, 128, 48>}, {pipeline_mode = #tpu.pipeline_mode<synchronous>, transform_indices = @transform_4, window_bounds = array<i64: 1, 48>}, {transform_indices = @transform_5, window_bounds = array<i64: 1, 1, 2, 48>}]} {
    %c0 = arith.constant 0 : index
    %c0_0 = arith.constant 0 : index
    %c0_1 = arith.constant 0 : index
    %c0_2 = arith.constant 0 : index
    %0 = vector.load %arg2[%c0, %c0_0, %c0_1, %c0_2] : memref<1x1x4x128xbf16, #tpu.memory_space<vmem>>, vector<1x1x4x128xbf16>
    %1 = vector.shape_cast %0 : vector<1x1x4x128xbf16> to vector<4x128xbf16>
    %2 = vector.extract_strided_slice %1 {offsets = [0, 0], sizes = [2, 128], strides = [1, 1]} : vector<4x128xbf16> to vector<2x128xbf16>
    %c0_3 = arith.constant 0 : index
    %c0_4 = arith.constant 0 : index
    %c0_5 = arith.constant 0 : index
    %3 = vector.load %arg5[%c0_3, %c0_4, %c0_5] : memref<9x128x48xbf16, #tpu.memory_space<vmem>>, vector<1x128x48xbf16>
    %4 = vector.shape_cast %3 : vector<1x128x48xbf16> to vector<128x48xbf16>
    %cst = arith.constant dense<0.000000e+00> : vector<2x48xf32>
    %5 = tpu.matmul %2, %4, %cst {dimension_numbers = #tpu.dot_dimension_numbers<[1], [0], [0], [1], [0, 0, 1, 1], [], []>} : vector<2x128xbf16>, vector<128x48xbf16>, vector<2x48xf32> -> vector<2x48xf32>
    %6 = vector.extract_strided_slice %1 {offsets = [1, 0], sizes = [2, 128], strides = [1, 1]} : vector<4x128xbf16> to vector<2x128xbf16>
    %c1 = arith.constant 1 : index
    %c0_6 = arith.constant 0 : index
    %c0_7 = arith.constant 0 : index
    %7 = vector.load %arg5[%c1, %c0_6, %c0_7] : memref<9x128x48xbf16, #tpu.memory_space<vmem>>, vector<1x128x48xbf16>
    %8 = vector.shape_cast %7 : vector<1x128x48xbf16> to vector<128x48xbf16>
    %cst_8 = arith.constant dense<0.000000e+00> : vector<2x48xf32>
    %9 = tpu.matmul %6, %8, %cst_8 {dimension_numbers = #tpu.dot_dimension_numbers<[1], [0], [0], [1], [0, 0, 1, 1], [], []>} : vector<2x128xbf16>, vector<128x48xbf16>, vector<2x48xf32> -> vector<2x48xf32>
    %10 = arith.addf %5, %9 : vector<2x48xf32>
    %11 = vector.extract_strided_slice %1 {offsets = [2, 0], sizes = [2, 128], strides = [1, 1]} : vector<4x128xbf16> to vector<2x128xbf16>
    %c2 = arith.constant 2 : index
    %c0_9 = arith.constant 0 : index
    %c0_10 = arith.constant 0 : index
    %12 = vector.load %arg5[%c2, %c0_9, %c0_10] : memref<9x128x48xbf16, #tpu.memory_space<vmem>>, vector<1x128x48xbf16>
    %13 = vector.shape_cast %12 : vector<1x128x48xbf16> to vector<128x48xbf16>
    %cst_11 = arith.constant dense<0.000000e+00> : vector<2x48xf32>
    %14 = tpu.matmul %11, %13, %cst_11 {dimension_numbers = #tpu.dot_dimension_numbers<[1], [0], [0], [1], [0, 0, 1, 1], [], []>} : vector<2x128xbf16>, vector<128x48xbf16>, vector<2x48xf32> -> vector<2x48xf32>
    %15 = arith.addf %10, %14 : vector<2x48xf32>
    %c0_12 = arith.constant 0 : index
    %c0_13 = arith.constant 0 : index
    %c0_14 = arith.constant 0 : index
    %c0_15 = arith.constant 0 : index
    %16 = vector.load %arg3[%c0_12, %c0_13, %c0_14, %c0_15] : memref<1x1x4x128xbf16, #tpu.memory_space<vmem>>, vector<1x1x4x128xbf16>
    %17 = vector.shape_cast %16 : vector<1x1x4x128xbf16> to vector<4x128xbf16>
    %18 = vector.extract_strided_slice %17 {offsets = [0, 0], sizes = [2, 128], strides = [1, 1]} : vector<4x128xbf16> to vector<2x128xbf16>
    %c3 = arith.constant 3 : index
    %c0_16 = arith.constant 0 : index
    %c0_17 = arith.constant 0 : index
    %19 = vector.load %arg5[%c3, %c0_16, %c0_17] : memref<9x128x48xbf16, #tpu.memory_space<vmem>>, vector<1x128x48xbf16>
    %20 = vector.shape_cast %19 : vector<1x128x48xbf16> to vector<128x48xbf16>
    %cst_18 = arith.constant dense<0.000000e+00> : vector<2x48xf32>
    %21 = tpu.matmul %18, %20, %cst_18 {dimension_numbers = #tpu.dot_dimension_numbers<[1], [0], [0], [1], [0, 0, 1, 1], [], []>} : vector<2x128xbf16>, vector<128x48xbf16>, vector<2x48xf32> -> vector<2x48xf32>
    %22 = arith.addf %15, %21 : vector<2x48xf32>
    %23 = vector.extract_strided_slice %17 {offsets = [1, 0], sizes = [2, 128], strides = [1, 1]} : vector<4x128xbf16> to vector<2x128xbf16>
    %c4 = arith.constant 4 : index
    %c0_19 = arith.constant 0 : index
    %c0_20 = arith.constant 0 : index
    %24 = vector.load %arg5[%c4, %c0_19, %c0_20] : memref<9x128x48xbf16, #tpu.memory_space<vmem>>, vector<1x128x48xbf16>
    %25 = vector.shape_cast %24 : vector<1x128x48xbf16> to vector<128x48xbf16>
    %cst_21 = arith.constant dense<0.000000e+00> : vector<2x48xf32>
    %26 = tpu.matmul %23, %25, %cst_21 {dimension_numbers = #tpu.dot_dimension_numbers<[1], [0], [0], [1], [0, 0, 1, 1], [], []>} : vector<2x128xbf16>, vector<128x48xbf16>, vector<2x48xf32> -> vector<2x48xf32>
    %27 = arith.addf %22, %26 : vector<2x48xf32>
    %28 = vector.extract_strided_slice %17 {offsets = [2, 0], sizes = [2, 128], strides = [1, 1]} : vector<4x128xbf16> to vector<2x128xbf16>
    %c5 = arith.constant 5 : index
    %c0_22 = arith.constant 0 : index
    %c0_23 = arith.constant 0 : index
    %29 = vector.load %arg5[%c5, %c0_22, %c0_23] : memref<9x128x48xbf16, #tpu.memory_space<vmem>>, vector<1x128x48xbf16>
    %30 = vector.shape_cast %29 : vector<1x128x48xbf16> to vector<128x48xbf16>
    %cst_24 = arith.constant dense<0.000000e+00> : vector<2x48xf32>
    %31 = tpu.matmul %28, %30, %cst_24 {dimension_numbers = #tpu.dot_dimension_numbers<[1], [0], [0], [1], [0, 0, 1, 1], [], []>} : vector<2x128xbf16>, vector<128x48xbf16>, vector<2x48xf32> -> vector<2x48xf32>
    %32 = arith.addf %27, %31 : vector<2x48xf32>
    %c0_25 = arith.constant 0 : index
    %c0_26 = arith.constant 0 : index
    %c0_27 = arith.constant 0 : index
    %c0_28 = arith.constant 0 : index
    %33 = vector.load %arg4[%c0_25, %c0_26, %c0_27, %c0_28] : memref<1x1x4x128xbf16, #tpu.memory_space<vmem>>, vector<1x1x4x128xbf16>
    %34 = vector.shape_cast %33 : vector<1x1x4x128xbf16> to vector<4x128xbf16>
    %35 = vector.extract_strided_slice %34 {offsets = [0, 0], sizes = [2, 128], strides = [1, 1]} : vector<4x128xbf16> to vector<2x128xbf16>
    %c6 = arith.constant 6 : index
    %c0_29 = arith.constant 0 : index
    %c0_30 = arith.constant 0 : index
    %36 = vector.load %arg5[%c6, %c0_29, %c0_30] : memref<9x128x48xbf16, #tpu.memory_space<vmem>>, vector<1x128x48xbf16>
    %37 = vector.shape_cast %36 : vector<1x128x48xbf16> to vector<128x48xbf16>
    %cst_31 = arith.constant dense<0.000000e+00> : vector<2x48xf32>
    %38 = tpu.matmul %35, %37, %cst_31 {dimension_numbers = #tpu.dot_dimension_numbers<[1], [0], [0], [1], [0, 0, 1, 1], [], []>} : vector<2x128xbf16>, vector<128x48xbf16>, vector<2x48xf32> -> vector<2x48xf32>
    %39 = arith.addf %32, %38 : vector<2x48xf32>
    %40 = vector.extract_strided_slice %34 {offsets = [1, 0], sizes = [2, 128], strides = [1, 1]} : vector<4x128xbf16> to vector<2x128xbf16>
    %c7 = arith.constant 7 : index
    %c0_32 = arith.constant 0 : index
    %c0_33 = arith.constant 0 : index
    %41 = vector.load %arg5[%c7, %c0_32, %c0_33] : memref<9x128x48xbf16, #tpu.memory_space<vmem>>, vector<1x128x48xbf16>
    %42 = vector.shape_cast %41 : vector<1x128x48xbf16> to vector<128x48xbf16>
    %cst_34 = arith.constant dense<0.000000e+00> : vector<2x48xf32>
    %43 = tpu.matmul %40, %42, %cst_34 {dimension_numbers = #tpu.dot_dimension_numbers<[1], [0], [0], [1], [0, 0, 1, 1], [], []>} : vector<2x128xbf16>, vector<128x48xbf16>, vector<2x48xf32> -> vector<2x48xf32>
    %44 = arith.addf %39, %43 : vector<2x48xf32>
    %45 = vector.extract_strided_slice %34 {offsets = [2, 0], sizes = [2, 128], strides = [1, 1]} : vector<4x128xbf16> to vector<2x128xbf16>
    %c8 = arith.constant 8 : index
    %c0_35 = arith.constant 0 : index
    %c0_36 = arith.constant 0 : index
    %46 = vector.load %arg5[%c8, %c0_35, %c0_36] : memref<9x128x48xbf16, #tpu.memory_space<vmem>>, vector<1x128x48xbf16>
    %47 = vector.shape_cast %46 : vector<1x128x48xbf16> to vector<128x48xbf16>
    %cst_37 = arith.constant dense<0.000000e+00> : vector<2x48xf32>
    %48 = tpu.matmul %45, %47, %cst_37 {dimension_numbers = #tpu.dot_dimension_numbers<[1], [0], [0], [1], [0, 0, 1, 1], [], []>} : vector<2x128xbf16>, vector<128x48xbf16>, vector<2x48xf32> -> vector<2x48xf32>
    %49 = arith.addf %44, %48 : vector<2x48xf32>
    %c0_38 = arith.constant 0 : index
    %c0_39 = arith.constant 0 : index
    %50 = vector.load %arg6[%c0_38, %c0_39] : memref<1x48xf32, #tpu.memory_space<vmem>>, vector<1x48xf32>
    %51 = vector.broadcast %50 : vector<1x48xf32> to vector<2x48xf32>
    %52 = arith.addf %49, %51 : vector<2x48xf32>
    %53 = math.floor %52 : vector<2x48xf32>
    %c0_40 = arith.constant 0 : index
    %c0_41 = arith.constant 0 : index
    %c0_42 = arith.constant 0 : index
    %c0_43 = arith.constant 0 : index
    %54 = vector.load %arg7[%c0_40, %c0_41, %c0_42, %c0_43] : memref<1x1x2x48xf32, #tpu.memory_space<vmem>>, vector<1x1x2x48xf32>
    %55 = vector.shape_cast %54 : vector<1x1x2x48xf32> to vector<2x48xf32>
    %56 = vector.shape_cast %53 : vector<2x48xf32> to vector<1x1x2x48xf32>
    tpu.vector_store %arg7[%c0_40, %c0_41, %c0_42, %c0_43], %56 {strides = array<i32>} : memref<1x1x2x48xf32, #tpu.memory_space<vmem>>, vector<1x1x2x48xf32>,
    return
  }
  func.func @transform_0(%arg0: i32, %arg1: i32) -> (i32, i32, i32, i32) {
    %c0_i32 = arith.constant 0 : i32
    %0 = arith.addi %arg1, %c0_i32 : i32
    %c0_i32_0 = arith.constant 0 : i32
    %c0_i32_1 = arith.constant 0 : i32
    %c0_i32_2 = arith.constant 0 : i32
    return %arg0, %0, %c0_i32_0, %c0_i32_1 : i32, i32, i32, i32
  }
  func.func @transform_1(%arg0: i32, %arg1: i32) -> (i32, i32, i32, i32) {
    %c1_i32 = arith.constant 1 : i32
    %0 = arith.addi %arg1, %c1_i32 : i32
    %c0_i32 = arith.constant 0 : i32
    %c0_i32_0 = arith.constant 0 : i32
    %c0_i32_1 = arith.constant 0 : i32
    return %arg0, %0, %c0_i32, %c0_i32_0 : i32, i32, i32, i32
  }
  func.func @transform_2(%arg0: i32, %arg1: i32) -> (i32, i32, i32, i32) {
    %c2_i32 = arith.constant 2 : i32
    %0 = arith.addi %arg1, %c2_i32 : i32
    %c0_i32 = arith.constant 0 : i32
    %c0_i32_0 = arith.constant 0 : i32
    %c0_i32_1 = arith.constant 0 : i32
    return %arg0, %0, %c0_i32, %c0_i32_0 : i32, i32, i32, i32
  }
  func.func @transform_3(%arg0: i32, %arg1: i32) -> (i32, i32, i32) {
    %c0_i32 = arith.constant 0 : i32
    %c0_i32_0 = arith.constant 0 : i32
    %c0_i32_1 = arith.constant 0 : i32
    %c0_i32_2 = arith.constant 0 : i32
    return %c0_i32, %c0_i32_0, %c0_i32_1 : i32, i32, i32
  }
  func.func @transform_4(%arg0: i32, %arg1: i32) -> (i32, i32) {
    %c0_i32 = arith.constant 0 : i32
    %c0_i32_0 = arith.constant 0 : i32
    %c0_i32_1 = arith.constant 0 : i32
    return %c0_i32, %c0_i32_0 : i32, i32
  }
  func.func @transform_5(%arg0: i32, %arg1: i32) -> (i32, i32, i32, i32) {
    %c0_i32 = arith.constant 0 : i32
    %c0_i32_0 = arith.constant 0 : i32
    %c0_i32_1 = arith.constant 0 : i32
    return %arg0, %arg1, %c0_i32, %c0_i32_0 : i32, i32, i32, i32
  }
}

module attributes {stable_mosaic.version = 11 : i64} {
  func.func @_conv3x3_row_kernel(%arg0: i32, %arg1: i32, %arg2: memref<1x1x4x48xf32, #tpu.memory_space<vmem>>, %arg3: memref<1x1x4x48xf32, #tpu.memory_space<vmem>>, %arg4: memref<1x1x4x48xf32, #tpu.memory_space<vmem>>, %arg5: memref<9x48x128xbf16, #tpu.memory_space<vmem>>, %arg6: memref<1x128xf32, #tpu.memory_space<vmem>>, %arg7: memref<128x128xf32, #tpu.memory_space<vmem>>, %arg8: memref<1x128xf32, #tpu.memory_space<vmem>>, %arg9: memref<1x1x2x128xbf16, #tpu.memory_space<vmem>>) attributes {dimension_semantics = [#tpu.dimension_semantics<parallel>, #tpu.dimension_semantics<parallel>], iteration_bounds = array<i64: 2, 2>, scalar_prefetch = 0 : i64, scratch_operands = 0 : i64, tpu.core_type = #tpu.core_type<tc>, window_params = [{transform_indices = @transform_0, window_bounds = array<i64: 1, 1, 4, 48>}, {transform_indices = @transform_1, window_bounds = array<i64: 1, 1, 4, 48>}, {transform_indices = @transform_2, window_bounds = array<i64: 1, 1, 4, 48>}, {pipeline_mode = #tpu.pipeline_mode<synchronous>, transform_indices = @transform_3, window_bounds = array<i64: 9, 48, 128>}, {pipeline_mode = #tpu.pipeline_mode<synchronous>, transform_indices = @transform_4, window_bounds = array<i64: 1, 128>}, {pipeline_mode = #tpu.pipeline_mode<synchronous>, transform_indices = @transform_5, window_bounds = array<i64: 128, 128>}, {pipeline_mode = #tpu.pipeline_mode<synchronous>, transform_indices = @transform_6, window_bounds = array<i64: 1, 128>}, {transform_indices = @transform_7, window_bounds = array<i64: 1, 1, 2, 128>}]} {
    %c0 = arith.constant 0 : index
    %c0_0 = arith.constant 0 : index
    %c0_1 = arith.constant 0 : index
    %c0_2 = arith.constant 0 : index
    %0 = vector.load %arg2[%c0, %c0_0, %c0_1, %c0_2] : memref<1x1x4x48xf32, #tpu.memory_space<vmem>>, vector<1x1x4x48xf32>
    %1 = vector.shape_cast %0 : vector<1x1x4x48xf32> to vector<4x48xf32>
    %2 = vector.extract_strided_slice %1 {offsets = [0, 0], sizes = [2, 48], strides = [1, 1]} : vector<4x48xf32> to vector<2x48xf32>
    %3 = arith.truncf %2 : vector<2x48xf32> to vector<2x48xbf16>
    %c0_3 = arith.constant 0 : index
    %c0_4 = arith.constant 0 : index
    %c0_5 = arith.constant 0 : index
    %4 = vector.load %arg5[%c0_3, %c0_4, %c0_5] : memref<9x48x128xbf16, #tpu.memory_space<vmem>>, vector<1x48x128xbf16>
    %5 = vector.shape_cast %4 : vector<1x48x128xbf16> to vector<48x128xbf16>
    %cst = arith.constant dense<0.000000e+00> : vector<2x128xf32>
    %6 = tpu.matmul %3, %5, %cst {dimension_numbers = #tpu.dot_dimension_numbers<[1], [0], [0], [1], [0, 0, 1, 1], [], []>} : vector<2x48xbf16>, vector<48x128xbf16>, vector<2x128xf32> -> vector<2x128xf32>
    %7 = vector.extract_strided_slice %1 {offsets = [1, 0], sizes = [2, 48], strides = [1, 1]} : vector<4x48xf32> to vector<2x48xf32>
    %8 = arith.truncf %7 : vector<2x48xf32> to vector<2x48xbf16>
    %c1 = arith.constant 1 : index
    %c0_6 = arith.constant 0 : index
    %c0_7 = arith.constant 0 : index
    %9 = vector.load %arg5[%c1, %c0_6, %c0_7] : memref<9x48x128xbf16, #tpu.memory_space<vmem>>, vector<1x48x128xbf16>
    %10 = vector.shape_cast %9 : vector<1x48x128xbf16> to vector<48x128xbf16>
    %cst_8 = arith.constant dense<0.000000e+00> : vector<2x128xf32>
    %11 = tpu.matmul %8, %10, %cst_8 {dimension_numbers = #tpu.dot_dimension_numbers<[1], [0], [0], [1], [0, 0, 1, 1], [], []>} : vector<2x48xbf16>, vector<48x128xbf16>, vector<2x128xf32> -> vector<2x128xf32>
    %12 = arith.addf %6, %11 : vector<2x128xf32>
    %13 = vector.extract_strided_slice %1 {offsets = [2, 0], sizes = [2, 48], strides = [1, 1]} : vector<4x48xf32> to vector<2x48xf32>
    %14 = arith.truncf %13 : vector<2x48xf32> to vector<2x48xbf16>
    %c2 = arith.constant 2 : index
    %c0_9 = arith.constant 0 : index
    %c0_10 = arith.constant 0 : index
    %15 = vector.load %arg5[%c2, %c0_9, %c0_10] : memref<9x48x128xbf16, #tpu.memory_space<vmem>>, vector<1x48x128xbf16>
    %16 = vector.shape_cast %15 : vector<1x48x128xbf16> to vector<48x128xbf16>
    %cst_11 = arith.constant dense<0.000000e+00> : vector<2x128xf32>
    %17 = tpu.matmul %14, %16, %cst_11 {dimension_numbers = #tpu.dot_dimension_numbers<[1], [0], [0], [1], [0, 0, 1, 1], [], []>} : vector<2x48xbf16>, vector<48x128xbf16>, vector<2x128xf32> -> vector<2x128xf32>
    %18 = arith.addf %12, %17 : vector<2x128xf32>
    %c0_12 = arith.constant 0 : index
    %c0_13 = arith.constant 0 : index
    %c0_14 = arith.constant 0 : index
    %c0_15 = arith.constant 0 : index
    %19 = vector.load %arg3[%c0_12, %c0_13, %c0_14, %c0_15] : memref<1x1x4x48xf32, #tpu.memory_space<vmem>>, vector<1x1x4x48xf32>
    %20 = vector.shape_cast %19 : vector<1x1x4x48xf32> to vector<4x48xf32>
    %21 = vector.extract_strided_slice %20 {offsets = [0, 0], sizes = [2, 48], strides = [1, 1]} : vector<4x48xf32> to vector<2x48xf32>
    %22 = arith.truncf %21 : vector<2x48xf32> to vector<2x48xbf16>
    %c3 = arith.constant 3 : index
    %c0_16 = arith.constant 0 : index
    %c0_17 = arith.constant 0 : index
    %23 = vector.load %arg5[%c3, %c0_16, %c0_17] : memref<9x48x128xbf16, #tpu.memory_space<vmem>>, vector<1x48x128xbf16>
    %24 = vector.shape_cast %23 : vector<1x48x128xbf16> to vector<48x128xbf16>
    %cst_18 = arith.constant dense<0.000000e+00> : vector<2x128xf32>
    %25 = tpu.matmul %22, %24, %cst_18 {dimension_numbers = #tpu.dot_dimension_numbers<[1], [0], [0], [1], [0, 0, 1, 1], [], []>} : vector<2x48xbf16>, vector<48x128xbf16>, vector<2x128xf32> -> vector<2x128xf32>
    %26 = arith.addf %18, %25 : vector<2x128xf32>
    %27 = vector.extract_strided_slice %20 {offsets = [1, 0], sizes = [2, 48], strides = [1, 1]} : vector<4x48xf32> to vector<2x48xf32>
    %28 = arith.truncf %27 : vector<2x48xf32> to vector<2x48xbf16>
    %c4 = arith.constant 4 : index
    %c0_19 = arith.constant 0 : index
    %c0_20 = arith.constant 0 : index
    %29 = vector.load %arg5[%c4, %c0_19, %c0_20] : memref<9x48x128xbf16, #tpu.memory_space<vmem>>, vector<1x48x128xbf16>
    %30 = vector.shape_cast %29 : vector<1x48x128xbf16> to vector<48x128xbf16>
    %cst_21 = arith.constant dense<0.000000e+00> : vector<2x128xf32>
    %31 = tpu.matmul %28, %30, %cst_21 {dimension_numbers = #tpu.dot_dimension_numbers<[1], [0], [0], [1], [0, 0, 1, 1], [], []>} : vector<2x48xbf16>, vector<48x128xbf16>, vector<2x128xf32> -> vector<2x128xf32>
    %32 = arith.addf %26, %31 : vector<2x128xf32>
    %33 = vector.extract_strided_slice %20 {offsets = [2, 0], sizes = [2, 48], strides = [1, 1]} : vector<4x48xf32> to vector<2x48xf32>
    %34 = arith.truncf %33 : vector<2x48xf32> to vector<2x48xbf16>
    %c5 = arith.constant 5 : index
    %c0_22 = arith.constant 0 : index
    %c0_23 = arith.constant 0 : index
    %35 = vector.load %arg5[%c5, %c0_22, %c0_23] : memref<9x48x128xbf16, #tpu.memory_space<vmem>>, vector<1x48x128xbf16>
    %36 = vector.shape_cast %35 : vector<1x48x128xbf16> to vector<48x128xbf16>
    %cst_24 = arith.constant dense<0.000000e+00> : vector<2x128xf32>
    %37 = tpu.matmul %34, %36, %cst_24 {dimension_numbers = #tpu.dot_dimension_numbers<[1], [0], [0], [1], [0, 0, 1, 1], [], []>} : vector<2x48xbf16>, vector<48x128xbf16>, vector<2x128xf32> -> vector<2x128xf32>
    %38 = arith.addf %32, %37 : vector<2x128xf32>
    %c0_25 = arith.constant 0 : index
    %c0_26 = arith.constant 0 : index
    %c0_27 = arith.constant 0 : index
    %c0_28 = arith.constant 0 : index
    %39 = vector.load %arg4[%c0_25, %c0_26, %c0_27, %c0_28] : memref<1x1x4x48xf32, #tpu.memory_space<vmem>>, vector<1x1x4x48xf32>
    %40 = vector.shape_cast %39 : vector<1x1x4x48xf32> to vector<4x48xf32>
    %41 = vector.extract_strided_slice %40 {offsets = [0, 0], sizes = [2, 48], strides = [1, 1]} : vector<4x48xf32> to vector<2x48xf32>
    %42 = arith.truncf %41 : vector<2x48xf32> to vector<2x48xbf16>
    %c6 = arith.constant 6 : index
    %c0_29 = arith.constant 0 : index
    %c0_30 = arith.constant 0 : index
    %43 = vector.load %arg5[%c6, %c0_29, %c0_30] : memref<9x48x128xbf16, #tpu.memory_space<vmem>>, vector<1x48x128xbf16>
    %44 = vector.shape_cast %43 : vector<1x48x128xbf16> to vector<48x128xbf16>
    %cst_31 = arith.constant dense<0.000000e+00> : vector<2x128xf32>
    %45 = tpu.matmul %42, %44, %cst_31 {dimension_numbers = #tpu.dot_dimension_numbers<[1], [0], [0], [1], [0, 0, 1, 1], [], []>} : vector<2x48xbf16>, vector<48x128xbf16>, vector<2x128xf32> -> vector<2x128xf32>
    %46 = arith.addf %38, %45 : vector<2x128xf32>
    %47 = vector.extract_strided_slice %40 {offsets = [1, 0], sizes = [2, 48], strides = [1, 1]} : vector<4x48xf32> to vector<2x48xf32>
    %48 = arith.truncf %47 : vector<2x48xf32> to vector<2x48xbf16>
    %c7 = arith.constant 7 : index
    %c0_32 = arith.constant 0 : index
    %c0_33 = arith.constant 0 : index
    %49 = vector.load %arg5[%c7, %c0_32, %c0_33] : memref<9x48x128xbf16, #tpu.memory_space<vmem>>, vector<1x48x128xbf16>
    %50 = vector.shape_cast %49 : vector<1x48x128xbf16> to vector<48x128xbf16>
    %cst_34 = arith.constant dense<0.000000e+00> : vector<2x128xf32>
    %51 = tpu.matmul %48, %50, %cst_34 {dimension_numbers = #tpu.dot_dimension_numbers<[1], [0], [0], [1], [0, 0, 1, 1], [], []>} : vector<2x48xbf16>, vector<48x128xbf16>, vector<2x128xf32> -> vector<2x128xf32>
    %52 = arith.addf %46, %51 : vector<2x128xf32>
    %53 = vector.extract_strided_slice %40 {offsets = [2, 0], sizes = [2, 48], strides = [1, 1]} : vector<4x48xf32> to vector<2x48xf32>
    %54 = arith.truncf %53 : vector<2x48xf32> to vector<2x48xbf16>
    %c8 = arith.constant 8 : index
    %c0_35 = arith.constant 0 : index
    %c0_36 = arith.constant 0 : index
    %55 = vector.load %arg5[%c8, %c0_35, %c0_36] : memref<9x48x128xbf16, #tpu.memory_space<vmem>>, vector<1x48x128xbf16>
    %56 = vector.shape_cast %55 : vector<1x48x128xbf16> to vector<48x128xbf16>
    %cst_37 = arith.constant dense<0.000000e+00> : vector<2x128xf32>
    %57 = tpu.matmul %54, %56, %cst_37 {dimension_numbers = #tpu.dot_dimension_numbers<[1], [0], [0], [1], [0, 0, 1, 1], [], []>} : vector<2x48xbf16>, vector<48x128xbf16>, vector<2x128xf32> -> vector<2x128xf32>
    %58 = arith.addf %52, %57 : vector<2x128xf32>
    %c0_38 = arith.constant 0 : index
    %c0_39 = arith.constant 0 : index
    %59 = vector.load %arg6[%c0_38, %c0_39] : memref<1x128xf32, #tpu.memory_space<vmem>>, vector<1x128xf32>
    %60 = vector.broadcast %59 : vector<1x128xf32> to vector<2x128xf32>
    %61 = arith.addf %58, %60 : vector<2x128xf32>
    %62 = arith.mulf %61, %61 : vector<2x128xf32>
    %c0_40 = arith.constant 0 : index
    %c0_41 = arith.constant 0 : index
    %63 = vector.load %arg7[%c0_40, %c0_41] : memref<128x128xf32, #tpu.memory_space<vmem>>, vector<128x128xf32>
    %cst_42 = arith.constant dense<0.000000e+00> : vector<2x128xf32>
    %64 = tpu.matmul %62, %63, %cst_42 {dimension_numbers = #tpu.dot_dimension_numbers<[1], [0], [0], [1], [0, 0, 1, 1], [], []>} : vector<2x128xf32>, vector<128x128xf32>, vector<2x128xf32> -> vector<2x128xf32>
    %c0_43 = arith.constant 0 : index
    %c0_44 = arith.constant 0 : index
    %65 = vector.load %arg8[%c0_43, %c0_44] : memref<1x128xf32, #tpu.memory_space<vmem>>, vector<1x128xf32>
    %66 = vector.broadcast %65 : vector<1x128xf32> to vector<2x128xf32>
    %67 = arith.addf %64, %66 : vector<2x128xf32>
    %68 = math.sqrt %67 : vector<2x128xf32>
    %69 = arith.mulf %61, %68 : vector<2x128xf32>
    %70 = arith.truncf %69 : vector<2x128xf32> to vector<2x128xbf16>
    %c0_45 = arith.constant 0 : index
    %c0_46 = arith.constant 0 : index
    %c0_47 = arith.constant 0 : index
    %c0_48 = arith.constant 0 : index
    %71 = vector.load %arg9[%c0_45, %c0_46, %c0_47, %c0_48] : memref<1x1x2x128xbf16, #tpu.memory_space<vmem>>, vector<1x1x2x128xbf16>
    %72 = vector.shape_cast %71 : vector<1x1x2x128xbf16> to vector<2x128xbf16>
    %73 = vector.shape_cast %70 : vector<2x128xbf16> to vector<1x1x2x128xbf16>
    tpu.vector_store %arg9[%c0_45, %c0_46, %c0_47, %c0_48], %73 {strides = array<i32>} : memref<1x1x2x128xbf16, #tpu.memory_space<vmem>>, vector<1x1x2x128xbf16>,
    return
  }
  func.func @transform_0(%arg0: i32, %arg1: i32) -> (i32, i32, i32, i32) {
    %c0_i32 = arith.constant 0 : i32
    %0 = arith.addi %arg1, %c0_i32 : i32
    %c0_i32_0 = arith.constant 0 : i32
    %c0_i32_1 = arith.constant 0 : i32
    %c0_i32_2 = arith.constant 0 : i32
    return %arg0, %0, %c0_i32_0, %c0_i32_1 : i32, i32, i32, i32
  }
  func.func @transform_1(%arg0: i32, %arg1: i32) -> (i32, i32, i32, i32) {
    %c1_i32 = arith.constant 1 : i32
    %0 = arith.addi %arg1, %c1_i32 : i32
    %c0_i32 = arith.constant 0 : i32
    %c0_i32_0 = arith.constant 0 : i32
    %c0_i32_1 = arith.constant 0 : i32
    return %arg0, %0, %c0_i32, %c0_i32_0 : i32, i32, i32, i32
  }
  func.func @transform_2(%arg0: i32, %arg1: i32) -> (i32, i32, i32, i32) {
    %c2_i32 = arith.constant 2 : i32
    %0 = arith.addi %arg1, %c2_i32 : i32
    %c0_i32 = arith.constant 0 : i32
    %c0_i32_0 = arith.constant 0 : i32
    %c0_i32_1 = arith.constant 0 : i32
    return %arg0, %0, %c0_i32, %c0_i32_0 : i32, i32, i32, i32
  }
  func.func @transform_3(%arg0: i32, %arg1: i32) -> (i32, i32, i32) {
    %c0_i32 = arith.constant 0 : i32
    %c0_i32_0 = arith.constant 0 : i32
    %c0_i32_1 = arith.constant 0 : i32
    %c0_i32_2 = arith.constant 0 : i32
    return %c0_i32, %c0_i32_0, %c0_i32_1 : i32, i32, i32
  }
  func.func @transform_4(%arg0: i32, %arg1: i32) -> (i32, i32) {
    %c0_i32 = arith.constant 0 : i32
    %c0_i32_0 = arith.constant 0 : i32
    %c0_i32_1 = arith.constant 0 : i32
    return %c0_i32, %c0_i32_0 : i32, i32
  }
  func.func @transform_5(%arg0: i32, %arg1: i32) -> (i32, i32) {
    %c0_i32 = arith.constant 0 : i32
    %c0_i32_0 = arith.constant 0 : i32
    %c0_i32_1 = arith.constant 0 : i32
    return %c0_i32, %c0_i32_0 : i32, i32
  }
  func.func @transform_6(%arg0: i32, %arg1: i32) -> (i32, i32) {
    %c0_i32 = arith.constant 0 : i32
    %c0_i32_0 = arith.constant 0 : i32
    %c0_i32_1 = arith.constant 0 : i32
    return %c0_i32, %c0_i32_0 : i32, i32
  }
  func.func @transform_7(%arg0: i32, %arg1: i32) -> (i32, i32, i32, i32) {
    %c0_i32 = arith.constant 0 : i32
    %c0_i32_0 = arith.constant 0 : i32
    %c0_i32_1 = arith.constant 0 : i32
    return %arg0, %arg1, %c0_i32, %c0_i32_0 : i32, i32, i32, i32
  }
}

module attributes {stable_mosaic.version = 11 : i64} {
  func.func @_conv3x3_row_kernel(%arg0: i32, %arg1: i32, %arg2: memref<1x1x6x32xbf16, #tpu.memory_space<vmem>>, %arg3: memref<1x1x6x32xbf16, #tpu.memory_space<vmem>>, %arg4: memref<1x1x6x32xbf16, #tpu.memory_space<vmem>>, %arg5: memref<9x32x128xbf16, #tpu.memory_space<vmem>>, %arg6: memref<1x128xf32, #tpu.memory_space<vmem>>, %arg7: memref<128x128xf32, #tpu.memory_space<vmem>>, %arg8: memref<1x128xf32, #tpu.memory_space<vmem>>, %arg9: memref<1x1x4x128xbf16, #tpu.memory_space<vmem>>) attributes {dimension_semantics = [#tpu.dimension_semantics<parallel>, #tpu.dimension_semantics<parallel>], iteration_bounds = array<i64: 2, 4>, scalar_prefetch = 0 : i64, scratch_operands = 0 : i64, tpu.core_type = #tpu.core_type<tc>, window_params = [{transform_indices = @transform_0, window_bounds = array<i64: 1, 1, 6, 32>}, {transform_indices = @transform_1, window_bounds = array<i64: 1, 1, 6, 32>}, {transform_indices = @transform_2, window_bounds = array<i64: 1, 1, 6, 32>}, {pipeline_mode = #tpu.pipeline_mode<synchronous>, transform_indices = @transform_3, window_bounds = array<i64: 9, 32, 128>}, {pipeline_mode = #tpu.pipeline_mode<synchronous>, transform_indices = @transform_4, window_bounds = array<i64: 1, 128>}, {pipeline_mode = #tpu.pipeline_mode<synchronous>, transform_indices = @transform_5, window_bounds = array<i64: 128, 128>}, {pipeline_mode = #tpu.pipeline_mode<synchronous>, transform_indices = @transform_6, window_bounds = array<i64: 1, 128>}, {transform_indices = @transform_7, window_bounds = array<i64: 1, 1, 4, 128>}]} {
    %c0 = arith.constant 0 : index
    %c0_0 = arith.constant 0 : index
    %c0_1 = arith.constant 0 : index
    %c0_2 = arith.constant 0 : index
    %0 = vector.load %arg2[%c0, %c0_0, %c0_1, %c0_2] : memref<1x1x6x32xbf16, #tpu.memory_space<vmem>>, vector<1x1x6x32xbf16>
    %1 = vector.shape_cast %0 : vector<1x1x6x32xbf16> to vector<6x32xbf16>
    %2 = vector.extract_strided_slice %1 {offsets = [0, 0], sizes = [4, 32], strides = [1, 1]} : vector<6x32xbf16> to vector<4x32xbf16>
    %c0_3 = arith.constant 0 : index
    %c0_4 = arith.constant 0 : index
    %c0_5 = arith.constant 0 : index
    %3 = vector.load %arg5[%c0_3, %c0_4, %c0_5] : memref<9x32x128xbf16, #tpu.memory_space<vmem>>, vector<1x32x128xbf16>
    %4 = vector.shape_cast %3 : vector<1x32x128xbf16> to vector<32x128xbf16>
    %cst = arith.constant dense<0.000000e+00> : vector<4x128xf32>
    %5 = tpu.matmul %2, %4, %cst {dimension_numbers = #tpu.dot_dimension_numbers<[1], [0], [0], [1], [0, 0, 1, 1], [], []>} : vector<4x32xbf16>, vector<32x128xbf16>, vector<4x128xf32> -> vector<4x128xf32>
    %6 = vector.extract_strided_slice %1 {offsets = [1, 0], sizes = [4, 32], strides = [1, 1]} : vector<6x32xbf16> to vector<4x32xbf16>
    %c1 = arith.constant 1 : index
    %c0_6 = arith.constant 0 : index
    %c0_7 = arith.constant 0 : index
    %7 = vector.load %arg5[%c1, %c0_6, %c0_7] : memref<9x32x128xbf16, #tpu.memory_space<vmem>>, vector<1x32x128xbf16>
    %8 = vector.shape_cast %7 : vector<1x32x128xbf16> to vector<32x128xbf16>
    %cst_8 = arith.constant dense<0.000000e+00> : vector<4x128xf32>
    %9 = tpu.matmul %6, %8, %cst_8 {dimension_numbers = #tpu.dot_dimension_numbers<[1], [0], [0], [1], [0, 0, 1, 1], [], []>} : vector<4x32xbf16>, vector<32x128xbf16>, vector<4x128xf32> -> vector<4x128xf32>
    %10 = arith.addf %5, %9 : vector<4x128xf32>
    %11 = vector.extract_strided_slice %1 {offsets = [2, 0], sizes = [4, 32], strides = [1, 1]} : vector<6x32xbf16> to vector<4x32xbf16>
    %c2 = arith.constant 2 : index
    %c0_9 = arith.constant 0 : index
    %c0_10 = arith.constant 0 : index
    %12 = vector.load %arg5[%c2, %c0_9, %c0_10] : memref<9x32x128xbf16, #tpu.memory_space<vmem>>, vector<1x32x128xbf16>
    %13 = vector.shape_cast %12 : vector<1x32x128xbf16> to vector<32x128xbf16>
    %cst_11 = arith.constant dense<0.000000e+00> : vector<4x128xf32>
    %14 = tpu.matmul %11, %13, %cst_11 {dimension_numbers = #tpu.dot_dimension_numbers<[1], [0], [0], [1], [0, 0, 1, 1], [], []>} : vector<4x32xbf16>, vector<32x128xbf16>, vector<4x128xf32> -> vector<4x128xf32>
    %15 = arith.addf %10, %14 : vector<4x128xf32>
    %c0_12 = arith.constant 0 : index
    %c0_13 = arith.constant 0 : index
    %c0_14 = arith.constant 0 : index
    %c0_15 = arith.constant 0 : index
    %16 = vector.load %arg3[%c0_12, %c0_13, %c0_14, %c0_15] : memref<1x1x6x32xbf16, #tpu.memory_space<vmem>>, vector<1x1x6x32xbf16>
    %17 = vector.shape_cast %16 : vector<1x1x6x32xbf16> to vector<6x32xbf16>
    %18 = vector.extract_strided_slice %17 {offsets = [0, 0], sizes = [4, 32], strides = [1, 1]} : vector<6x32xbf16> to vector<4x32xbf16>
    %c3 = arith.constant 3 : index
    %c0_16 = arith.constant 0 : index
    %c0_17 = arith.constant 0 : index
    %19 = vector.load %arg5[%c3, %c0_16, %c0_17] : memref<9x32x128xbf16, #tpu.memory_space<vmem>>, vector<1x32x128xbf16>
    %20 = vector.shape_cast %19 : vector<1x32x128xbf16> to vector<32x128xbf16>
    %cst_18 = arith.constant dense<0.000000e+00> : vector<4x128xf32>
    %21 = tpu.matmul %18, %20, %cst_18 {dimension_numbers = #tpu.dot_dimension_numbers<[1], [0], [0], [1], [0, 0, 1, 1], [], []>} : vector<4x32xbf16>, vector<32x128xbf16>, vector<4x128xf32> -> vector<4x128xf32>
    %22 = arith.addf %15, %21 : vector<4x128xf32>
    %23 = vector.extract_strided_slice %17 {offsets = [1, 0], sizes = [4, 32], strides = [1, 1]} : vector<6x32xbf16> to vector<4x32xbf16>
    %c4 = arith.constant 4 : index
    %c0_19 = arith.constant 0 : index
    %c0_20 = arith.constant 0 : index
    %24 = vector.load %arg5[%c4, %c0_19, %c0_20] : memref<9x32x128xbf16, #tpu.memory_space<vmem>>, vector<1x32x128xbf16>
    %25 = vector.shape_cast %24 : vector<1x32x128xbf16> to vector<32x128xbf16>
    %cst_21 = arith.constant dense<0.000000e+00> : vector<4x128xf32>
    %26 = tpu.matmul %23, %25, %cst_21 {dimension_numbers = #tpu.dot_dimension_numbers<[1], [0], [0], [1], [0, 0, 1, 1], [], []>} : vector<4x32xbf16>, vector<32x128xbf16>, vector<4x128xf32> -> vector<4x128xf32>
    %27 = arith.addf %22, %26 : vector<4x128xf32>
    %28 = vector.extract_strided_slice %17 {offsets = [2, 0], sizes = [4, 32], strides = [1, 1]} : vector<6x32xbf16> to vector<4x32xbf16>
    %c5 = arith.constant 5 : index
    %c0_22 = arith.constant 0 : index
    %c0_23 = arith.constant 0 : index
    %29 = vector.load %arg5[%c5, %c0_22, %c0_23] : memref<9x32x128xbf16, #tpu.memory_space<vmem>>, vector<1x32x128xbf16>
    %30 = vector.shape_cast %29 : vector<1x32x128xbf16> to vector<32x128xbf16>
    %cst_24 = arith.constant dense<0.000000e+00> : vector<4x128xf32>
    %31 = tpu.matmul %28, %30, %cst_24 {dimension_numbers = #tpu.dot_dimension_numbers<[1], [0], [0], [1], [0, 0, 1, 1], [], []>} : vector<4x32xbf16>, vector<32x128xbf16>, vector<4x128xf32> -> vector<4x128xf32>
    %32 = arith.addf %27, %31 : vector<4x128xf32>
    %c0_25 = arith.constant 0 : index
    %c0_26 = arith.constant 0 : index
    %c0_27 = arith.constant 0 : index
    %c0_28 = arith.constant 0 : index
    %33 = vector.load %arg4[%c0_25, %c0_26, %c0_27, %c0_28] : memref<1x1x6x32xbf16, #tpu.memory_space<vmem>>, vector<1x1x6x32xbf16>
    %34 = vector.shape_cast %33 : vector<1x1x6x32xbf16> to vector<6x32xbf16>
    %35 = vector.extract_strided_slice %34 {offsets = [0, 0], sizes = [4, 32], strides = [1, 1]} : vector<6x32xbf16> to vector<4x32xbf16>
    %c6 = arith.constant 6 : index
    %c0_29 = arith.constant 0 : index
    %c0_30 = arith.constant 0 : index
    %36 = vector.load %arg5[%c6, %c0_29, %c0_30] : memref<9x32x128xbf16, #tpu.memory_space<vmem>>, vector<1x32x128xbf16>
    %37 = vector.shape_cast %36 : vector<1x32x128xbf16> to vector<32x128xbf16>
    %cst_31 = arith.constant dense<0.000000e+00> : vector<4x128xf32>
    %38 = tpu.matmul %35, %37, %cst_31 {dimension_numbers = #tpu.dot_dimension_numbers<[1], [0], [0], [1], [0, 0, 1, 1], [], []>} : vector<4x32xbf16>, vector<32x128xbf16>, vector<4x128xf32> -> vector<4x128xf32>
    %39 = arith.addf %32, %38 : vector<4x128xf32>
    %40 = vector.extract_strided_slice %34 {offsets = [1, 0], sizes = [4, 32], strides = [1, 1]} : vector<6x32xbf16> to vector<4x32xbf16>
    %c7 = arith.constant 7 : index
    %c0_32 = arith.constant 0 : index
    %c0_33 = arith.constant 0 : index
    %41 = vector.load %arg5[%c7, %c0_32, %c0_33] : memref<9x32x128xbf16, #tpu.memory_space<vmem>>, vector<1x32x128xbf16>
    %42 = vector.shape_cast %41 : vector<1x32x128xbf16> to vector<32x128xbf16>
    %cst_34 = arith.constant dense<0.000000e+00> : vector<4x128xf32>
    %43 = tpu.matmul %40, %42, %cst_34 {dimension_numbers = #tpu.dot_dimension_numbers<[1], [0], [0], [1], [0, 0, 1, 1], [], []>} : vector<4x32xbf16>, vector<32x128xbf16>, vector<4x128xf32> -> vector<4x128xf32>
    %44 = arith.addf %39, %43 : vector<4x128xf32>
    %45 = vector.extract_strided_slice %34 {offsets = [2, 0], sizes = [4, 32], strides = [1, 1]} : vector<6x32xbf16> to vector<4x32xbf16>
    %c8 = arith.constant 8 : index
    %c0_35 = arith.constant 0 : index
    %c0_36 = arith.constant 0 : index
    %46 = vector.load %arg5[%c8, %c0_35, %c0_36] : memref<9x32x128xbf16, #tpu.memory_space<vmem>>, vector<1x32x128xbf16>
    %47 = vector.shape_cast %46 : vector<1x32x128xbf16> to vector<32x128xbf16>
    %cst_37 = arith.constant dense<0.000000e+00> : vector<4x128xf32>
    %48 = tpu.matmul %45, %47, %cst_37 {dimension_numbers = #tpu.dot_dimension_numbers<[1], [0], [0], [1], [0, 0, 1, 1], [], []>} : vector<4x32xbf16>, vector<32x128xbf16>, vector<4x128xf32> -> vector<4x128xf32>
    %49 = arith.addf %44, %48 : vector<4x128xf32>
    %c0_38 = arith.constant 0 : index
    %c0_39 = arith.constant 0 : index
    %50 = vector.load %arg6[%c0_38, %c0_39] : memref<1x128xf32, #tpu.memory_space<vmem>>, vector<1x128xf32>
    %51 = vector.broadcast %50 : vector<1x128xf32> to vector<4x128xf32>
    %52 = arith.addf %49, %51 : vector<4x128xf32>
    %53 = arith.mulf %52, %52 : vector<4x128xf32>
    %c0_40 = arith.constant 0 : index
    %c0_41 = arith.constant 0 : index
    %54 = vector.load %arg7[%c0_40, %c0_41] : memref<128x128xf32, #tpu.memory_space<vmem>>, vector<128x128xf32>
    %cst_42 = arith.constant dense<0.000000e+00> : vector<4x128xf32>
    %55 = tpu.matmul %53, %54, %cst_42 {dimension_numbers = #tpu.dot_dimension_numbers<[1], [0], [0], [1], [0, 0, 1, 1], [], []>} : vector<4x128xf32>, vector<128x128xf32>, vector<4x128xf32> -> vector<4x128xf32>
    %c0_43 = arith.constant 0 : index
    %c0_44 = arith.constant 0 : index
    %56 = vector.load %arg8[%c0_43, %c0_44] : memref<1x128xf32, #tpu.memory_space<vmem>>, vector<1x128xf32>
    %57 = vector.broadcast %56 : vector<1x128xf32> to vector<4x128xf32>
    %58 = arith.addf %55, %57 : vector<4x128xf32>
    %59 = math.sqrt %58 : vector<4x128xf32>
    %60 = arith.mulf %52, %59 : vector<4x128xf32>
    %61 = arith.truncf %60 : vector<4x128xf32> to vector<4x128xbf16>
    %c0_45 = arith.constant 0 : index
    %c0_46 = arith.constant 0 : index
    %c0_47 = arith.constant 0 : index
    %c0_48 = arith.constant 0 : index
    %62 = vector.load %arg9[%c0_45, %c0_46, %c0_47, %c0_48] : memref<1x1x4x128xbf16, #tpu.memory_space<vmem>>, vector<1x1x4x128xbf16>
    %63 = vector.shape_cast %62 : vector<1x1x4x128xbf16> to vector<4x128xbf16>
    %64 = vector.shape_cast %61 : vector<4x128xbf16> to vector<1x1x4x128xbf16>
    tpu.vector_store %arg9[%c0_45, %c0_46, %c0_47, %c0_48], %64 {strides = array<i32>} : memref<1x1x4x128xbf16, #tpu.memory_space<vmem>>, vector<1x1x4x128xbf16>,
    return
  }
  func.func @transform_0(%arg0: i32, %arg1: i32) -> (i32, i32, i32, i32) {
    %c0_i32 = arith.constant 0 : i32
    %0 = arith.addi %arg1, %c0_i32 : i32
    %c0_i32_0 = arith.constant 0 : i32
    %c0_i32_1 = arith.constant 0 : i32
    %c0_i32_2 = arith.constant 0 : i32
    return %arg0, %0, %c0_i32_0, %c0_i32_1 : i32, i32, i32, i32
  }
  func.func @transform_1(%arg0: i32, %arg1: i32) -> (i32, i32, i32, i32) {
    %c1_i32 = arith.constant 1 : i32
    %0 = arith.addi %arg1, %c1_i32 : i32
    %c0_i32 = arith.constant 0 : i32
    %c0_i32_0 = arith.constant 0 : i32
    %c0_i32_1 = arith.constant 0 : i32
    return %arg0, %0, %c0_i32, %c0_i32_0 : i32, i32, i32, i32
  }
  func.func @transform_2(%arg0: i32, %arg1: i32) -> (i32, i32, i32, i32) {
    %c2_i32 = arith.constant 2 : i32
    %0 = arith.addi %arg1, %c2_i32 : i32
    %c0_i32 = arith.constant 0 : i32
    %c0_i32_0 = arith.constant 0 : i32
    %c0_i32_1 = arith.constant 0 : i32
    return %arg0, %0, %c0_i32, %c0_i32_0 : i32, i32, i32, i32
  }
  func.func @transform_3(%arg0: i32, %arg1: i32) -> (i32, i32, i32) {
    %c0_i32 = arith.constant 0 : i32
    %c0_i32_0 = arith.constant 0 : i32
    %c0_i32_1 = arith.constant 0 : i32
    %c0_i32_2 = arith.constant 0 : i32
    return %c0_i32, %c0_i32_0, %c0_i32_1 : i32, i32, i32
  }
  func.func @transform_4(%arg0: i32, %arg1: i32) -> (i32, i32) {
    %c0_i32 = arith.constant 0 : i32
    %c0_i32_0 = arith.constant 0 : i32
    %c0_i32_1 = arith.constant 0 : i32
    return %c0_i32, %c0_i32_0 : i32, i32
  }
  func.func @transform_5(%arg0: i32, %arg1: i32) -> (i32, i32) {
    %c0_i32 = arith.constant 0 : i32
    %c0_i32_0 = arith.constant 0 : i32
    %c0_i32_1 = arith.constant 0 : i32
    return %c0_i32, %c0_i32_0 : i32, i32
  }
  func.func @transform_6(%arg0: i32, %arg1: i32) -> (i32, i32) {
    %c0_i32 = arith.constant 0 : i32
    %c0_i32_0 = arith.constant 0 : i32
    %c0_i32_1 = arith.constant 0 : i32
    return %c0_i32, %c0_i32_0 : i32, i32
  }
  func.func @transform_7(%arg0: i32, %arg1: i32) -> (i32, i32, i32, i32) {
    %c0_i32 = arith.constant 0 : i32
    %c0_i32_0 = arith.constant 0 : i32
    %c0_i32_1 = arith.constant 0 : i32
    return %arg0, %arg1, %c0_i32, %c0_i32_0 : i32, i32, i32, i32
  }
}

module attributes {stable_mosaic.version = 11 : i64} {
  func.func @_conv3x3_row_kernel(%arg0: i32, %arg1: i32, %arg2: memref<1x1x10x32xbf16, #tpu.memory_space<vmem>>, %arg3: memref<1x1x10x32xbf16, #tpu.memory_space<vmem>>, %arg4: memref<1x1x10x32xbf16, #tpu.memory_space<vmem>>, %arg5: memref<9x32x128xbf16, #tpu.memory_space<vmem>>, %arg6: memref<1x128xf32, #tpu.memory_space<vmem>>, %arg7: memref<128x128xf32, #tpu.memory_space<vmem>>, %arg8: memref<1x128xf32, #tpu.memory_space<vmem>>, %arg9: memref<1x1x8x128xbf16, #tpu.memory_space<vmem>>) attributes {dimension_semantics = [#tpu.dimension_semantics<parallel>, #tpu.dimension_semantics<parallel>], iteration_bounds = array<i64: 2, 8>, scalar_prefetch = 0 : i64, scratch_operands = 0 : i64, tpu.core_type = #tpu.core_type<tc>, window_params = [{transform_indices = @transform_0, window_bounds = array<i64: 1, 1, 10, 32>}, {transform_indices = @transform_1, window_bounds = array<i64: 1, 1, 10, 32>}, {transform_indices = @transform_2, window_bounds = array<i64: 1, 1, 10, 32>}, {pipeline_mode = #tpu.pipeline_mode<synchronous>, transform_indices = @transform_3, window_bounds = array<i64: 9, 32, 128>}, {pipeline_mode = #tpu.pipeline_mode<synchronous>, transform_indices = @transform_4, window_bounds = array<i64: 1, 128>}, {pipeline_mode = #tpu.pipeline_mode<synchronous>, transform_indices = @transform_5, window_bounds = array<i64: 128, 128>}, {pipeline_mode = #tpu.pipeline_mode<synchronous>, transform_indices = @transform_6, window_bounds = array<i64: 1, 128>}, {transform_indices = @transform_7, window_bounds = array<i64: 1, 1, 8, 128>}]} {
    %c0 = arith.constant 0 : index
    %c0_0 = arith.constant 0 : index
    %c0_1 = arith.constant 0 : index
    %c0_2 = arith.constant 0 : index
    %0 = vector.load %arg2[%c0, %c0_0, %c0_1, %c0_2] : memref<1x1x10x32xbf16, #tpu.memory_space<vmem>>, vector<1x1x10x32xbf16>
    %1 = vector.shape_cast %0 : vector<1x1x10x32xbf16> to vector<10x32xbf16>
    %2 = vector.extract_strided_slice %1 {offsets = [0, 0], sizes = [8, 32], strides = [1, 1]} : vector<10x32xbf16> to vector<8x32xbf16>
    %c0_3 = arith.constant 0 : index
    %c0_4 = arith.constant 0 : index
    %c0_5 = arith.constant 0 : index
    %3 = vector.load %arg5[%c0_3, %c0_4, %c0_5] : memref<9x32x128xbf16, #tpu.memory_space<vmem>>, vector<1x32x128xbf16>
    %4 = vector.shape_cast %3 : vector<1x32x128xbf16> to vector<32x128xbf16>
    %cst = arith.constant dense<0.000000e+00> : vector<8x128xf32>
    %5 = tpu.matmul %2, %4, %cst {dimension_numbers = #tpu.dot_dimension_numbers<[1], [0], [0], [1], [0, 0, 1, 1], [], []>} : vector<8x32xbf16>, vector<32x128xbf16>, vector<8x128xf32> -> vector<8x128xf32>
    %6 = vector.extract_strided_slice %1 {offsets = [1, 0], sizes = [8, 32], strides = [1, 1]} : vector<10x32xbf16> to vector<8x32xbf16>
    %c1 = arith.constant 1 : index
    %c0_6 = arith.constant 0 : index
    %c0_7 = arith.constant 0 : index
    %7 = vector.load %arg5[%c1, %c0_6, %c0_7] : memref<9x32x128xbf16, #tpu.memory_space<vmem>>, vector<1x32x128xbf16>
    %8 = vector.shape_cast %7 : vector<1x32x128xbf16> to vector<32x128xbf16>
    %cst_8 = arith.constant dense<0.000000e+00> : vector<8x128xf32>
    %9 = tpu.matmul %6, %8, %cst_8 {dimension_numbers = #tpu.dot_dimension_numbers<[1], [0], [0], [1], [0, 0, 1, 1], [], []>} : vector<8x32xbf16>, vector<32x128xbf16>, vector<8x128xf32> -> vector<8x128xf32>
    %10 = arith.addf %5, %9 : vector<8x128xf32>
    %11 = vector.extract_strided_slice %1 {offsets = [2, 0], sizes = [8, 32], strides = [1, 1]} : vector<10x32xbf16> to vector<8x32xbf16>
    %c2 = arith.constant 2 : index
    %c0_9 = arith.constant 0 : index
    %c0_10 = arith.constant 0 : index
    %12 = vector.load %arg5[%c2, %c0_9, %c0_10] : memref<9x32x128xbf16, #tpu.memory_space<vmem>>, vector<1x32x128xbf16>
    %13 = vector.shape_cast %12 : vector<1x32x128xbf16> to vector<32x128xbf16>
    %cst_11 = arith.constant dense<0.000000e+00> : vector<8x128xf32>
    %14 = tpu.matmul %11, %13, %cst_11 {dimension_numbers = #tpu.dot_dimension_numbers<[1], [0], [0], [1], [0, 0, 1, 1], [], []>} : vector<8x32xbf16>, vector<32x128xbf16>, vector<8x128xf32> -> vector<8x128xf32>
    %15 = arith.addf %10, %14 : vector<8x128xf32>
    %c0_12 = arith.constant 0 : index
    %c0_13 = arith.constant 0 : index
    %c0_14 = arith.constant 0 : index
    %c0_15 = arith.constant 0 : index
    %16 = vector.load %arg3[%c0_12, %c0_13, %c0_14, %c0_15] : memref<1x1x10x32xbf16, #tpu.memory_space<vmem>>, vector<1x1x10x32xbf16>
    %17 = vector.shape_cast %16 : vector<1x1x10x32xbf16> to vector<10x32xbf16>
    %18 = vector.extract_strided_slice %17 {offsets = [0, 0], sizes = [8, 32], strides = [1, 1]} : vector<10x32xbf16> to vector<8x32xbf16>
    %c3 = arith.constant 3 : index
    %c0_16 = arith.constant 0 : index
    %c0_17 = arith.constant 0 : index
    %19 = vector.load %arg5[%c3, %c0_16, %c0_17] : memref<9x32x128xbf16, #tpu.memory_space<vmem>>, vector<1x32x128xbf16>
    %20 = vector.shape_cast %19 : vector<1x32x128xbf16> to vector<32x128xbf16>
    %cst_18 = arith.constant dense<0.000000e+00> : vector<8x128xf32>
    %21 = tpu.matmul %18, %20, %cst_18 {dimension_numbers = #tpu.dot_dimension_numbers<[1], [0], [0], [1], [0, 0, 1, 1], [], []>} : vector<8x32xbf16>, vector<32x128xbf16>, vector<8x128xf32> -> vector<8x128xf32>
    %22 = arith.addf %15, %21 : vector<8x128xf32>
    %23 = vector.extract_strided_slice %17 {offsets = [1, 0], sizes = [8, 32], strides = [1, 1]} : vector<10x32xbf16> to vector<8x32xbf16>
    %c4 = arith.constant 4 : index
    %c0_19 = arith.constant 0 : index
    %c0_20 = arith.constant 0 : index
    %24 = vector.load %arg5[%c4, %c0_19, %c0_20] : memref<9x32x128xbf16, #tpu.memory_space<vmem>>, vector<1x32x128xbf16>
    %25 = vector.shape_cast %24 : vector<1x32x128xbf16> to vector<32x128xbf16>
    %cst_21 = arith.constant dense<0.000000e+00> : vector<8x128xf32>
    %26 = tpu.matmul %23, %25, %cst_21 {dimension_numbers = #tpu.dot_dimension_numbers<[1], [0], [0], [1], [0, 0, 1, 1], [], []>} : vector<8x32xbf16>, vector<32x128xbf16>, vector<8x128xf32> -> vector<8x128xf32>
    %27 = arith.addf %22, %26 : vector<8x128xf32>
    %28 = vector.extract_strided_slice %17 {offsets = [2, 0], sizes = [8, 32], strides = [1, 1]} : vector<10x32xbf16> to vector<8x32xbf16>
    %c5 = arith.constant 5 : index
    %c0_22 = arith.constant 0 : index
    %c0_23 = arith.constant 0 : index
    %29 = vector.load %arg5[%c5, %c0_22, %c0_23] : memref<9x32x128xbf16, #tpu.memory_space<vmem>>, vector<1x32x128xbf16>
    %30 = vector.shape_cast %29 : vector<1x32x128xbf16> to vector<32x128xbf16>
    %cst_24 = arith.constant dense<0.000000e+00> : vector<8x128xf32>
    %31 = tpu.matmul %28, %30, %cst_24 {dimension_numbers = #tpu.dot_dimension_numbers<[1], [0], [0], [1], [0, 0, 1, 1], [], []>} : vector<8x32xbf16>, vector<32x128xbf16>, vector<8x128xf32> -> vector<8x128xf32>
    %32 = arith.addf %27, %31 : vector<8x128xf32>
    %c0_25 = arith.constant 0 : index
    %c0_26 = arith.constant 0 : index
    %c0_27 = arith.constant 0 : index
    %c0_28 = arith.constant 0 : index
    %33 = vector.load %arg4[%c0_25, %c0_26, %c0_27, %c0_28] : memref<1x1x10x32xbf16, #tpu.memory_space<vmem>>, vector<1x1x10x32xbf16>
    %34 = vector.shape_cast %33 : vector<1x1x10x32xbf16> to vector<10x32xbf16>
    %35 = vector.extract_strided_slice %34 {offsets = [0, 0], sizes = [8, 32], strides = [1, 1]} : vector<10x32xbf16> to vector<8x32xbf16>
    %c6 = arith.constant 6 : index
    %c0_29 = arith.constant 0 : index
    %c0_30 = arith.constant 0 : index
    %36 = vector.load %arg5[%c6, %c0_29, %c0_30] : memref<9x32x128xbf16, #tpu.memory_space<vmem>>, vector<1x32x128xbf16>
    %37 = vector.shape_cast %36 : vector<1x32x128xbf16> to vector<32x128xbf16>
    %cst_31 = arith.constant dense<0.000000e+00> : vector<8x128xf32>
    %38 = tpu.matmul %35, %37, %cst_31 {dimension_numbers = #tpu.dot_dimension_numbers<[1], [0], [0], [1], [0, 0, 1, 1], [], []>} : vector<8x32xbf16>, vector<32x128xbf16>, vector<8x128xf32> -> vector<8x128xf32>
    %39 = arith.addf %32, %38 : vector<8x128xf32>
    %40 = vector.extract_strided_slice %34 {offsets = [1, 0], sizes = [8, 32], strides = [1, 1]} : vector<10x32xbf16> to vector<8x32xbf16>
    %c7 = arith.constant 7 : index
    %c0_32 = arith.constant 0 : index
    %c0_33 = arith.constant 0 : index
    %41 = vector.load %arg5[%c7, %c0_32, %c0_33] : memref<9x32x128xbf16, #tpu.memory_space<vmem>>, vector<1x32x128xbf16>
    %42 = vector.shape_cast %41 : vector<1x32x128xbf16> to vector<32x128xbf16>
    %cst_34 = arith.constant dense<0.000000e+00> : vector<8x128xf32>
    %43 = tpu.matmul %40, %42, %cst_34 {dimension_numbers = #tpu.dot_dimension_numbers<[1], [0], [0], [1], [0, 0, 1, 1], [], []>} : vector<8x32xbf16>, vector<32x128xbf16>, vector<8x128xf32> -> vector<8x128xf32>
    %44 = arith.addf %39, %43 : vector<8x128xf32>
    %45 = vector.extract_strided_slice %34 {offsets = [2, 0], sizes = [8, 32], strides = [1, 1]} : vector<10x32xbf16> to vector<8x32xbf16>
    %c8 = arith.constant 8 : index
    %c0_35 = arith.constant 0 : index
    %c0_36 = arith.constant 0 : index
    %46 = vector.load %arg5[%c8, %c0_35, %c0_36] : memref<9x32x128xbf16, #tpu.memory_space<vmem>>, vector<1x32x128xbf16>
    %47 = vector.shape_cast %46 : vector<1x32x128xbf16> to vector<32x128xbf16>
    %cst_37 = arith.constant dense<0.000000e+00> : vector<8x128xf32>
    %48 = tpu.matmul %45, %47, %cst_37 {dimension_numbers = #tpu.dot_dimension_numbers<[1], [0], [0], [1], [0, 0, 1, 1], [], []>} : vector<8x32xbf16>, vector<32x128xbf16>, vector<8x128xf32> -> vector<8x128xf32>
    %49 = arith.addf %44, %48 : vector<8x128xf32>
    %c0_38 = arith.constant 0 : index
    %c0_39 = arith.constant 0 : index
    %50 = vector.load %arg6[%c0_38, %c0_39] : memref<1x128xf32, #tpu.memory_space<vmem>>, vector<1x128xf32>
    %51 = vector.broadcast %50 : vector<1x128xf32> to vector<8x128xf32>
    %52 = arith.addf %49, %51 : vector<8x128xf32>
    %53 = arith.mulf %52, %52 : vector<8x128xf32>
    %c0_40 = arith.constant 0 : index
    %c0_41 = arith.constant 0 : index
    %54 = vector.load %arg7[%c0_40, %c0_41] : memref<128x128xf32, #tpu.memory_space<vmem>>, vector<128x128xf32>
    %cst_42 = arith.constant dense<0.000000e+00> : vector<8x128xf32>
    %55 = tpu.matmul %53, %54, %cst_42 {dimension_numbers = #tpu.dot_dimension_numbers<[1], [0], [0], [1], [0, 0, 1, 1], [], []>} : vector<8x128xf32>, vector<128x128xf32>, vector<8x128xf32> -> vector<8x128xf32>
    %c0_43 = arith.constant 0 : index
    %c0_44 = arith.constant 0 : index
    %56 = vector.load %arg8[%c0_43, %c0_44] : memref<1x128xf32, #tpu.memory_space<vmem>>, vector<1x128xf32>
    %57 = vector.broadcast %56 : vector<1x128xf32> to vector<8x128xf32>
    %58 = arith.addf %55, %57 : vector<8x128xf32>
    %59 = math.sqrt %58 : vector<8x128xf32>
    %60 = arith.mulf %52, %59 : vector<8x128xf32>
    %61 = arith.truncf %60 : vector<8x128xf32> to vector<8x128xbf16>
    %c0_45 = arith.constant 0 : index
    %c0_46 = arith.constant 0 : index
    %c0_47 = arith.constant 0 : index
    %c0_48 = arith.constant 0 : index
    %62 = vector.load %arg9[%c0_45, %c0_46, %c0_47, %c0_48] : memref<1x1x8x128xbf16, #tpu.memory_space<vmem>>, vector<1x1x8x128xbf16>
    %63 = vector.shape_cast %62 : vector<1x1x8x128xbf16> to vector<8x128xbf16>
    %64 = vector.shape_cast %61 : vector<8x128xbf16> to vector<1x1x8x128xbf16>
    tpu.vector_store %arg9[%c0_45, %c0_46, %c0_47, %c0_48], %64 {strides = array<i32>} : memref<1x1x8x128xbf16, #tpu.memory_space<vmem>>, vector<1x1x8x128xbf16>,
    return
  }
  func.func @transform_0(%arg0: i32, %arg1: i32) -> (i32, i32, i32, i32) {
    %c0_i32 = arith.constant 0 : i32
    %0 = arith.addi %arg1, %c0_i32 : i32
    %c0_i32_0 = arith.constant 0 : i32
    %c0_i32_1 = arith.constant 0 : i32
    %c0_i32_2 = arith.constant 0 : i32
    return %arg0, %0, %c0_i32_0, %c0_i32_1 : i32, i32, i32, i32
  }
  func.func @transform_1(%arg0: i32, %arg1: i32) -> (i32, i32, i32, i32) {
    %c1_i32 = arith.constant 1 : i32
    %0 = arith.addi %arg1, %c1_i32 : i32
    %c0_i32 = arith.constant 0 : i32
    %c0_i32_0 = arith.constant 0 : i32
    %c0_i32_1 = arith.constant 0 : i32
    return %arg0, %0, %c0_i32, %c0_i32_0 : i32, i32, i32, i32
  }
  func.func @transform_2(%arg0: i32, %arg1: i32) -> (i32, i32, i32, i32) {
    %c2_i32 = arith.constant 2 : i32
    %0 = arith.addi %arg1, %c2_i32 : i32
    %c0_i32 = arith.constant 0 : i32
    %c0_i32_0 = arith.constant 0 : i32
    %c0_i32_1 = arith.constant 0 : i32
    return %arg0, %0, %c0_i32, %c0_i32_0 : i32, i32, i32, i32
  }
  func.func @transform_3(%arg0: i32, %arg1: i32) -> (i32, i32, i32) {
    %c0_i32 = arith.constant 0 : i32
    %c0_i32_0 = arith.constant 0 : i32
    %c0_i32_1 = arith.constant 0 : i32
    %c0_i32_2 = arith.constant 0 : i32
    return %c0_i32, %c0_i32_0, %c0_i32_1 : i32, i32, i32
  }
  func.func @transform_4(%arg0: i32, %arg1: i32) -> (i32, i32) {
    %c0_i32 = arith.constant 0 : i32
    %c0_i32_0 = arith.constant 0 : i32
    %c0_i32_1 = arith.constant 0 : i32
    return %c0_i32, %c0_i32_0 : i32, i32
  }
  func.func @transform_5(%arg0: i32, %arg1: i32) -> (i32, i32) {
    %c0_i32 = arith.constant 0 : i32
    %c0_i32_0 = arith.constant 0 : i32
    %c0_i32_1 = arith.constant 0 : i32
    return %c0_i32, %c0_i32_0 : i32, i32
  }
  func.func @transform_6(%arg0: i32, %arg1: i32) -> (i32, i32) {
    %c0_i32 = arith.constant 0 : i32
    %c0_i32_0 = arith.constant 0 : i32
    %c0_i32_1 = arith.constant 0 : i32
    return %c0_i32, %c0_i32_0 : i32, i32
  }
  func.func @transform_7(%arg0: i32, %arg1: i32) -> (i32, i32, i32, i32) {
    %c0_i32 = arith.constant 0 : i32
    %c0_i32_0 = arith.constant 0 : i32
    %c0_i32_1 = arith.constant 0 : i32
    return %arg0, %arg1, %c0_i32, %c0_i32_0 : i32, i32, i32, i32
  }
}

module attributes {stable_mosaic.version = 11 : i64} {
  func.func @_conv3x3_row_kernel(%arg0: i32, %arg1: i32, %arg2: memref<1x1x18x32xbf16, #tpu.memory_space<vmem>>, %arg3: memref<1x1x18x32xbf16, #tpu.memory_space<vmem>>, %arg4: memref<1x1x18x32xbf16, #tpu.memory_space<vmem>>, %arg5: memref<9x32x12xbf16, #tpu.memory_space<vmem>>, %arg6: memref<1x12xf32, #tpu.memory_space<vmem>>, %arg7: memref<1x1x16x12xf32, #tpu.memory_space<vmem>>) attributes {dimension_semantics = [#tpu.dimension_semantics<parallel>, #tpu.dimension_semantics<parallel>], iteration_bounds = array<i64: 2, 16>, scalar_prefetch = 0 : i64, scratch_operands = 0 : i64, tpu.core_type = #tpu.core_type<tc>, window_params = [{transform_indices = @transform_0, window_bounds = array<i64: 1, 1, 18, 32>}, {transform_indices = @transform_1, window_bounds = array<i64: 1, 1, 18, 32>}, {transform_indices = @transform_2, window_bounds = array<i64: 1, 1, 18, 32>}, {pipeline_mode = #tpu.pipeline_mode<synchronous>, transform_indices = @transform_3, window_bounds = array<i64: 9, 32, 12>}, {pipeline_mode = #tpu.pipeline_mode<synchronous>, transform_indices = @transform_4, window_bounds = array<i64: 1, 12>}, {transform_indices = @transform_5, window_bounds = array<i64: 1, 1, 16, 12>}]} {
    %c0 = arith.constant 0 : index
    %c0_0 = arith.constant 0 : index
    %c0_1 = arith.constant 0 : index
    %c0_2 = arith.constant 0 : index
    %0 = vector.load %arg2[%c0, %c0_0, %c0_1, %c0_2] : memref<1x1x18x32xbf16, #tpu.memory_space<vmem>>, vector<1x1x18x32xbf16>
    %1 = vector.shape_cast %0 : vector<1x1x18x32xbf16> to vector<18x32xbf16>
    %2 = vector.extract_strided_slice %1 {offsets = [0, 0], sizes = [16, 32], strides = [1, 1]} : vector<18x32xbf16> to vector<16x32xbf16>
    %c0_3 = arith.constant 0 : index
    %c0_4 = arith.constant 0 : index
    %c0_5 = arith.constant 0 : index
    %3 = vector.load %arg5[%c0_3, %c0_4, %c0_5] : memref<9x32x12xbf16, #tpu.memory_space<vmem>>, vector<1x32x12xbf16>
    %4 = vector.shape_cast %3 : vector<1x32x12xbf16> to vector<32x12xbf16>
    %cst = arith.constant dense<0.000000e+00> : vector<16x12xf32>
    %5 = tpu.matmul %2, %4, %cst {dimension_numbers = #tpu.dot_dimension_numbers<[1], [0], [0], [1], [0, 0, 1, 1], [], []>} : vector<16x32xbf16>, vector<32x12xbf16>, vector<16x12xf32> -> vector<16x12xf32>
    %6 = vector.extract_strided_slice %1 {offsets = [1, 0], sizes = [16, 32], strides = [1, 1]} : vector<18x32xbf16> to vector<16x32xbf16>
    %c1 = arith.constant 1 : index
    %c0_6 = arith.constant 0 : index
    %c0_7 = arith.constant 0 : index
    %7 = vector.load %arg5[%c1, %c0_6, %c0_7] : memref<9x32x12xbf16, #tpu.memory_space<vmem>>, vector<1x32x12xbf16>
    %8 = vector.shape_cast %7 : vector<1x32x12xbf16> to vector<32x12xbf16>
    %cst_8 = arith.constant dense<0.000000e+00> : vector<16x12xf32>
    %9 = tpu.matmul %6, %8, %cst_8 {dimension_numbers = #tpu.dot_dimension_numbers<[1], [0], [0], [1], [0, 0, 1, 1], [], []>} : vector<16x32xbf16>, vector<32x12xbf16>, vector<16x12xf32> -> vector<16x12xf32>
    %10 = arith.addf %5, %9 : vector<16x12xf32>
    %11 = vector.extract_strided_slice %1 {offsets = [2, 0], sizes = [16, 32], strides = [1, 1]} : vector<18x32xbf16> to vector<16x32xbf16>
    %c2 = arith.constant 2 : index
    %c0_9 = arith.constant 0 : index
    %c0_10 = arith.constant 0 : index
    %12 = vector.load %arg5[%c2, %c0_9, %c0_10] : memref<9x32x12xbf16, #tpu.memory_space<vmem>>, vector<1x32x12xbf16>
    %13 = vector.shape_cast %12 : vector<1x32x12xbf16> to vector<32x12xbf16>
    %cst_11 = arith.constant dense<0.000000e+00> : vector<16x12xf32>
    %14 = tpu.matmul %11, %13, %cst_11 {dimension_numbers = #tpu.dot_dimension_numbers<[1], [0], [0], [1], [0, 0, 1, 1], [], []>} : vector<16x32xbf16>, vector<32x12xbf16>, vector<16x12xf32> -> vector<16x12xf32>
    %15 = arith.addf %10, %14 : vector<16x12xf32>
    %c0_12 = arith.constant 0 : index
    %c0_13 = arith.constant 0 : index
    %c0_14 = arith.constant 0 : index
    %c0_15 = arith.constant 0 : index
    %16 = vector.load %arg3[%c0_12, %c0_13, %c0_14, %c0_15] : memref<1x1x18x32xbf16, #tpu.memory_space<vmem>>, vector<1x1x18x32xbf16>
    %17 = vector.shape_cast %16 : vector<1x1x18x32xbf16> to vector<18x32xbf16>
    %18 = vector.extract_strided_slice %17 {offsets = [0, 0], sizes = [16, 32], strides = [1, 1]} : vector<18x32xbf16> to vector<16x32xbf16>
    %c3 = arith.constant 3 : index
    %c0_16 = arith.constant 0 : index
    %c0_17 = arith.constant 0 : index
    %19 = vector.load %arg5[%c3, %c0_16, %c0_17] : memref<9x32x12xbf16, #tpu.memory_space<vmem>>, vector<1x32x12xbf16>
    %20 = vector.shape_cast %19 : vector<1x32x12xbf16> to vector<32x12xbf16>
    %cst_18 = arith.constant dense<0.000000e+00> : vector<16x12xf32>
    %21 = tpu.matmul %18, %20, %cst_18 {dimension_numbers = #tpu.dot_dimension_numbers<[1], [0], [0], [1], [0, 0, 1, 1], [], []>} : vector<16x32xbf16>, vector<32x12xbf16>, vector<16x12xf32> -> vector<16x12xf32>
    %22 = arith.addf %15, %21 : vector<16x12xf32>
    %23 = vector.extract_strided_slice %17 {offsets = [1, 0], sizes = [16, 32], strides = [1, 1]} : vector<18x32xbf16> to vector<16x32xbf16>
    %c4 = arith.constant 4 : index
    %c0_19 = arith.constant 0 : index
    %c0_20 = arith.constant 0 : index
    %24 = vector.load %arg5[%c4, %c0_19, %c0_20] : memref<9x32x12xbf16, #tpu.memory_space<vmem>>, vector<1x32x12xbf16>
    %25 = vector.shape_cast %24 : vector<1x32x12xbf16> to vector<32x12xbf16>
    %cst_21 = arith.constant dense<0.000000e+00> : vector<16x12xf32>
    %26 = tpu.matmul %23, %25, %cst_21 {dimension_numbers = #tpu.dot_dimension_numbers<[1], [0], [0], [1], [0, 0, 1, 1], [], []>} : vector<16x32xbf16>, vector<32x12xbf16>, vector<16x12xf32> -> vector<16x12xf32>
    %27 = arith.addf %22, %26 : vector<16x12xf32>
    %28 = vector.extract_strided_slice %17 {offsets = [2, 0], sizes = [16, 32], strides = [1, 1]} : vector<18x32xbf16> to vector<16x32xbf16>
    %c5 = arith.constant 5 : index
    %c0_22 = arith.constant 0 : index
    %c0_23 = arith.constant 0 : index
    %29 = vector.load %arg5[%c5, %c0_22, %c0_23] : memref<9x32x12xbf16, #tpu.memory_space<vmem>>, vector<1x32x12xbf16>
    %30 = vector.shape_cast %29 : vector<1x32x12xbf16> to vector<32x12xbf16>
    %cst_24 = arith.constant dense<0.000000e+00> : vector<16x12xf32>
    %31 = tpu.matmul %28, %30, %cst_24 {dimension_numbers = #tpu.dot_dimension_numbers<[1], [0], [0], [1], [0, 0, 1, 1], [], []>} : vector<16x32xbf16>, vector<32x12xbf16>, vector<16x12xf32> -> vector<16x12xf32>
    %32 = arith.addf %27, %31 : vector<16x12xf32>
    %c0_25 = arith.constant 0 : index
    %c0_26 = arith.constant 0 : index
    %c0_27 = arith.constant 0 : index
    %c0_28 = arith.constant 0 : index
    %33 = vector.load %arg4[%c0_25, %c0_26, %c0_27, %c0_28] : memref<1x1x18x32xbf16, #tpu.memory_space<vmem>>, vector<1x1x18x32xbf16>
    %34 = vector.shape_cast %33 : vector<1x1x18x32xbf16> to vector<18x32xbf16>
    %35 = vector.extract_strided_slice %34 {offsets = [0, 0], sizes = [16, 32], strides = [1, 1]} : vector<18x32xbf16> to vector<16x32xbf16>
    %c6 = arith.constant 6 : index
    %c0_29 = arith.constant 0 : index
    %c0_30 = arith.constant 0 : index
    %36 = vector.load %arg5[%c6, %c0_29, %c0_30] : memref<9x32x12xbf16, #tpu.memory_space<vmem>>, vector<1x32x12xbf16>
    %37 = vector.shape_cast %36 : vector<1x32x12xbf16> to vector<32x12xbf16>
    %cst_31 = arith.constant dense<0.000000e+00> : vector<16x12xf32>
    %38 = tpu.matmul %35, %37, %cst_31 {dimension_numbers = #tpu.dot_dimension_numbers<[1], [0], [0], [1], [0, 0, 1, 1], [], []>} : vector<16x32xbf16>, vector<32x12xbf16>, vector<16x12xf32> -> vector<16x12xf32>
    %39 = arith.addf %32, %38 : vector<16x12xf32>
    %40 = vector.extract_strided_slice %34 {offsets = [1, 0], sizes = [16, 32], strides = [1, 1]} : vector<18x32xbf16> to vector<16x32xbf16>
    %c7 = arith.constant 7 : index
    %c0_32 = arith.constant 0 : index
    %c0_33 = arith.constant 0 : index
    %41 = vector.load %arg5[%c7, %c0_32, %c0_33] : memref<9x32x12xbf16, #tpu.memory_space<vmem>>, vector<1x32x12xbf16>
    %42 = vector.shape_cast %41 : vector<1x32x12xbf16> to vector<32x12xbf16>
    %cst_34 = arith.constant dense<0.000000e+00> : vector<16x12xf32>
    %43 = tpu.matmul %40, %42, %cst_34 {dimension_numbers = #tpu.dot_dimension_numbers<[1], [0], [0], [1], [0, 0, 1, 1], [], []>} : vector<16x32xbf16>, vector<32x12xbf16>, vector<16x12xf32> -> vector<16x12xf32>
    %44 = arith.addf %39, %43 : vector<16x12xf32>
    %45 = vector.extract_strided_slice %34 {offsets = [2, 0], sizes = [16, 32], strides = [1, 1]} : vector<18x32xbf16> to vector<16x32xbf16>
    %c8 = arith.constant 8 : index
    %c0_35 = arith.constant 0 : index
    %c0_36 = arith.constant 0 : index
    %46 = vector.load %arg5[%c8, %c0_35, %c0_36] : memref<9x32x12xbf16, #tpu.memory_space<vmem>>, vector<1x32x12xbf16>
    %47 = vector.shape_cast %46 : vector<1x32x12xbf16> to vector<32x12xbf16>
    %cst_37 = arith.constant dense<0.000000e+00> : vector<16x12xf32>
    %48 = tpu.matmul %45, %47, %cst_37 {dimension_numbers = #tpu.dot_dimension_numbers<[1], [0], [0], [1], [0, 0, 1, 1], [], []>} : vector<16x32xbf16>, vector<32x12xbf16>, vector<16x12xf32> -> vector<16x12xf32>
    %49 = arith.addf %44, %48 : vector<16x12xf32>
    %c0_38 = arith.constant 0 : index
    %c0_39 = arith.constant 0 : index
    %50 = vector.load %arg6[%c0_38, %c0_39] : memref<1x12xf32, #tpu.memory_space<vmem>>, vector<1x12xf32>
    %51 = vector.broadcast %50 : vector<1x12xf32> to vector<16x12xf32>
    %52 = arith.addf %49, %51 : vector<16x12xf32>
    %cst_40 = arith.constant 0.000000e+00 : f32
    %cst_41 = arith.constant 1.000000e+00 : f32
    %53 = vector.broadcast %cst_40 : f32 to vector<16x12xf32>
    %54 = arith.maximumf %53, %52 : vector<16x12xf32>
    %55 = vector.broadcast %cst_41 : f32 to vector<16x12xf32>
    %56 = arith.minimumf %55, %54 : vector<16x12xf32>
    %c0_42 = arith.constant 0 : index
    %c0_43 = arith.constant 0 : index
    %c0_44 = arith.constant 0 : index
    %c0_45 = arith.constant 0 : index
    %57 = vector.load %arg7[%c0_42, %c0_43, %c0_44, %c0_45] : memref<1x1x16x12xf32, #tpu.memory_space<vmem>>, vector<1x1x16x12xf32>
    %58 = vector.shape_cast %57 : vector<1x1x16x12xf32> to vector<16x12xf32>
    %59 = vector.shape_cast %56 : vector<16x12xf32> to vector<1x1x16x12xf32>
    tpu.vector_store %arg7[%c0_42, %c0_43, %c0_44, %c0_45], %59 {strides = array<i32>} : memref<1x1x16x12xf32, #tpu.memory_space<vmem>>, vector<1x1x16x12xf32>,
    return
  }
  func.func @transform_0(%arg0: i32, %arg1: i32) -> (i32, i32, i32, i32) {
    %c0_i32 = arith.constant 0 : i32
    %0 = arith.addi %arg1, %c0_i32 : i32
    %c0_i32_0 = arith.constant 0 : i32
    %c0_i32_1 = arith.constant 0 : i32
    %c0_i32_2 = arith.constant 0 : i32
    return %arg0, %0, %c0_i32_0, %c0_i32_1 : i32, i32, i32, i32
  }
  func.func @transform_1(%arg0: i32, %arg1: i32) -> (i32, i32, i32, i32) {
    %c1_i32 = arith.constant 1 : i32
    %0 = arith.addi %arg1, %c1_i32 : i32
    %c0_i32 = arith.constant 0 : i32
    %c0_i32_0 = arith.constant 0 : i32
    %c0_i32_1 = arith.constant 0 : i32
    return %arg0, %0, %c0_i32, %c0_i32_0 : i32, i32, i32, i32
  }
  func.func @transform_2(%arg0: i32, %arg1: i32) -> (i32, i32, i32, i32) {
    %c2_i32 = arith.constant 2 : i32
    %0 = arith.addi %arg1, %c2_i32 : i32
    %c0_i32 = arith.constant 0 : i32
    %c0_i32_0 = arith.constant 0 : i32
    %c0_i32_1 = arith.constant 0 : i32
    return %arg0, %0, %c0_i32, %c0_i32_0 : i32, i32, i32, i32
  }
  func.func @transform_3(%arg0: i32, %arg1: i32) -> (i32, i32, i32) {
    %c0_i32 = arith.constant 0 : i32
    %c0_i32_0 = arith.constant 0 : i32
    %c0_i32_1 = arith.constant 0 : i32
    %c0_i32_2 = arith.constant 0 : i32
    return %c0_i32, %c0_i32_0, %c0_i32_1 : i32, i32, i32
  }
  func.func @transform_4(%arg0: i32, %arg1: i32) -> (i32, i32) {
    %c0_i32 = arith.constant 0 : i32
    %c0_i32_0 = arith.constant 0 : i32
    %c0_i32_1 = arith.constant 0 : i32
    return %c0_i32, %c0_i32_0 : i32, i32
  }
  func.func @transform_5(%arg0: i32, %arg1: i32) -> (i32, i32, i32, i32) {
    %c0_i32 = arith.constant 0 : i32
    %c0_i32_0 = arith.constant 0 : i32
    %c0_i32_1 = arith.constant 0 : i32
    return %arg0, %arg1, %c0_i32, %c0_i32_0 : i32, i32, i32, i32
  }
}

</mosaic_0001>

<bundles_post_ra>
// kernel: comp_decompressor_forward.8
= control target key start
LH: loop header
LB: loop body
LE: loop exit
PB: predicated region body
PF: predicated region fallthrough
CT: control target
= control target key end

     0   :  { %s1155_s24 = smov 0   ;;  %s1157_s25 = smov 0   ;;  %s1341_s0 = inlined_call_operand.vmem [shape: f32[2,18,18,12], index: 0, kind: input, shape index: {}, may-alias: {0,1,2}]   ;;  %s1342_s1 = inlined_call_operand.vmem [shape: f32[2,18,18,12], index: 1, kind: input, shape index: {}, may-alias: {0,1,2}]   ;;  %s1343_s2 = inlined_call_operand.vmem [shape: f32[2,18,18,12], index: 2, kind: input, shape index: {}, may-alias: {0,1,2}]   ;;  %s1344_s3 = inlined_call_operand.vmem [shape: bf16[9,12,32], index: 3, kind: input, shape index: {}]   ;;  %s1345_s4 = inlined_call_operand.vmem [shape: f32[1,32], index: 4, kind: input, shape index: {}]   ;;  %s1346_s5 = inlined_call_operand.vmem [shape: f32[32,32], index: 5, kind: input, shape index: {}]   ;;  %s1347_s6 = inlined_call_operand.vmem [shape: f32[1,32], index: 6, kind: input, shape index: {}]   ;;  %s1348_s7 = inlined_call_operand.vmem [shape: bf16[2,16,16,32], index: 7, kind: output, shape index: {}]  }
   0x1   :  { %s1159_s26 = smov 0   ;;  %s1161_s27 = smov 0  }
   0x2   :  { %s1163_s28 = smov 0  }
   0x3 LB: > { %s26_s29 = sadd.s32 1, %s1105_s26  ;;  %s29_s30 = sadd.s32 1, %s1109_s27  ;;  %s1113_s28 = sphi %s1163_s28, %s17_s28   ;;  %s1109_s27 = sphi %s1161_s27, %s1354_s27   ;;  %s1105_s26 = sphi %s1159_s26, %s1353_s26   ;;  %s1101_s25 = sphi %s1157_s25, %s1352_s25   ;;  %s1097_s24 = sphi %s1155_s24, %s1351_s24  }
   0x4   : > { %p27_p0 = scmp.ge.s32.totalorder %s26_s29, 16  ;;  %p944_p1 = scmp.ge.s32.totalorder %s1113_s28, 1 }
   0x5   : > { %p297_p2 = scmp.lt.s32.totalorder %s1113_s28, 33 }
   0x6   : > { %s1356_s29 = smov (%p27_p0, %s26_s29), 0  ;;  %s1358_s30 = smov (!%p27_p0, %s29_s30), %s1109_s27 }
   0x7   : > { %p298_p3 = pnand %p944_p1, %p297_p2  ;;  %p31_p4 = scmp.ge.s32.totalorder %s1358_s30, 2 }
   0x8   : > { %p357_p5 = scmp.lt.s32.totalorder (!%p298_p3), %s1101_s25, 1  ;;  %p359_p6 = scmp.lt.s32.totalorder (!%p298_p3), %s1097_s24, 17 }
   0x9   : > { %s1360_s30 = smov (%p31_p4, %s1358_s30), 0  ;;  %301 = sbr.rel (%p298_p3) target bundleno = 356 (0x164), region = 48 }
   0xa   : > { %s366_s10 = sadd.s32 (!%p298_p3), 1, %s1097_s24  ;;  %s377_s19 = sadd.s32 (!%p298_p3), 2, %s1097_s24 }
   0xb   : > { %p1224_p7 = scmp.lt.s32.totalorder (!%p298_p3), %s366_s10, 17  ;;  %p1255_p8 = scmp.lt.s32.totalorder (!%p298_p3), %s377_s19, 17 }
   0xc   : > { %p390_p9 = scmp.lt.s32.totalorder (!%p298_p3), %s1097_s24, 15 }
   0xe   : > { %vm430_vm0 = vcmask 1045504   ;;  %v967_v0 = vld [vmem:[%s1344_s3 + $0x10] sm:$0xf]  ;;  %v1018_v1 = vld [vmem:[%s1344_s3 + $0x10] sm:$0x30]  ;;  %s1362_s25 = smov (!%p357_p5, %s1101_s25), 1 }
   0xf   : > { %v968_v2 = vor.u32 %v1018_v1, %v967_v0  ;;  %v974_v3 = vld [vmem:[%s1344_s3 + $0x18] sm:$0xf]  ;;  %v1019_v4 = vld [vmem:[%s1344_s3 + $0x18] sm:$0x30]  ;;  %v955_v6 = vld [vmem:[%s1344_s3 + $0x8] sm:$0xf] }
  0x10   : > { %v975_v5 = vor.u32 %v1019_v4, %v974_v3  ;;  %v1017_v7 = vld [vmem:[%s1344_s3 + $0x8] sm:$0x30]  ;;  %s360_s20 = scalar_select %p359_p6, %s1097_s24, 17  ;;  %v960_v10 = vld [vmem:[%s1344_s3] sm:$0xf]  ;;  %vm426_vm1 = vcmask 97280  }
  0x11   : > { %v490_v8 = vsel %vm430_vm0, %v968_v2, 0  ;;  %v956_v9 = vor.u32 %v1017_v7, %v955_v6  ;;  %v1016_v11 = vld [vmem:[%s1344_s3] sm:$0x30]  ;;  %s1218_s9 = smul.u32 54, %s1362_s25  ;;  %v981_v15 = vld [vmem:[%s1344_s3 + $0x20] sm:$0xf] }
  0x12   : > { %499 = vmatpush.bf16.msra.mxu2 %v490_v8  ;;  %v524_v12 = vsel %vm430_vm0, %v975_v5, 0  ;;  %v961_v13 = vor.u32 %v1016_v11, %v960_v10  ;;  %s1025_s11 = smul.u32 3, %s360_s20  ;;  %v1020_v17 = vld [vmem:[%s1344_s3 + $0x20] sm:$0x30]  ;;  %v995_v18 = vld [vmem:[%s1344_s3 + $0x30] sm:$0xf] }
  0x13   : > { %533 = vmatpush.bf16.msra.mxu3 %v524_v12  ;;  %v432_v14 = vsel %vm430_vm0, %v956_v9, 0  ;;  %v982_v19 = vor.u32 %v1020_v17, %v981_v15  ;;  %v1022_v20 = vld [vmem:[%s1344_s3 + $0x30] sm:$0x30]  ;;  %v1002_v21 = vld [vmem:[%s1344_s3 + $0x38] sm:$0xf]  ;;  %s1364_s10 = smov (!%p1224_p7, %s366_s10), 17 }
  0x14   : > { %441 = vmatpush.bf16.msra.mxu0 %v432_v14  ;;  %v456_v16 = vsel %vm430_vm0, %v961_v13, 0  ;;  %s363_s20 = sadd.s32 %s1218_s9, %s1025_s11  ;;  %v1023_v22 = vld [vmem:[%s1344_s3 + $0x38] sm:$0x30]  ;;  %v996_v23 = vor.u32 %v1022_v20, %v995_v18  ;;  %v988_v25 = vld [vmem:[%s1344_s3 + $0x28] sm:$0xf]  ;;  %s1366_s19 = smov (!%p1255_p8, %s377_s19), 17 }
  0x15   : > { %465 = vmatpush.bf16.msra.mxu1 %v456_v16  ;;  %s945_s15 = sshll.u32 %s363_s20, 3  ;;  %v1003_v24 = vor.u32 %v1023_v22, %v1002_v21  ;;  %v1021_v26 = vld [vmem:[%s1344_s3 + $0x28] sm:$0x30]  ;;  %v566_v27 = vsel %vm430_vm0, %v982_v19, 0  ;;  %v1009_v29 = vld [vmem:[%s1344_s3 + $0x40] sm:$0xf] }
  0x16   : > { %s365_s8 = scalar_lea.vmem %s1341_s0, %s945_s15  ;;  %v989_v28 = vor.u32 %v1021_v26, %v988_v25  ;;  %v1024_v30 = vld [vmem:[%s1344_s3 + $0x40] sm:$0x30]  ;;  %v635_v34 = vsel %vm430_vm0, %v996_v23, 0  ;;  %vm477_vm2 = vcmask 1046528   ;;  %s1027_s15 = smul.u32 3, %s1364_s10  ;;  %v741_v17 = vld [vmem:[%s1346_s5 + $0x18] sm:$0xff] }
  0x17   : > { %v398_v31 = vld [vmem:[%s365_s8] sm:$0xff]  ;;  %v399_v32 = vld [vmem:[%s365_s8 + $0x8] sm:$0xff]  ;;  %v400_v33 = vld [vmem:[%s365_s8 + $0x10] sm:$0x3]  ;;  %644 = vmatpush.bf16.msrb.mxu2 %v635_v34  ;;  %v677_v37 = vsel %vm430_vm0, %v1003_v24, 0  ;;  %s1028_s12 = smul.u32 3, %s1366_s19  ;;  %v1010_v44 = vor.u32 %v1024_v30, %v1009_v29 }
  0x18   : > { %575 = vmatpush.bf16.msrb.mxu0 %v566_v27  ;;  %v401_v35 = vpack.c.bf16 %v399_v32, %v398_v31  ;;  %v404_v36 = vpack.c.bf16 %v400_v33, %v400_v33  ;;  %v601_v38 = vsel %vm430_vm0, %v989_v28, 0  ;;  %686 = vmatpush.bf16.msrb.mxu3 %v677_v37  ;;  %s373_s16 = sadd.s32 %s1027_s15, %s1218_s9  ;;  %vm408_vm3 = vsmask.f32 7424  ;;  %v740_v18 = vld [vmem:[%s1346_s5 + $0x10] sm:$0xff]  ;;  %v739_v19 = vld [vmem:[%s1346_s5 + $0x8] sm:$0xff]  ;;  %v738_v23 = vld [vmem:[%s1346_s5] sm:$0xff] }
  0x19   : > { %610 = vmatpush.bf16.msrb.mxu1 %v601_v38  ;;  %s946_s17 = sshll.u32 %s373_s16, 3  ;;  %s384_s18 = sadd.s32 %s1028_s12, %s1218_s9  ;;  %v712_v56 = vsel %vm430_vm0, %v1010_v44, 0  ;;  %vm746_vm4 = vcmask 261120   ;;  %vm800_vm8 = vcmask 257024  }
  0x1a   : > { %v478_v39 = vrot.slane %v401_v35, 1  ;;  %v479_v40 = vrot.slane %v404_v36, 1  ;;  %v410_v41 = vshrl.u32 %v401_v35, 16  ;;  %v412_v42 = vshll.u32 %v401_v35, 16  ;;  %962 = vmatmul.msk.bf16.vlgmr.msra.gmra.mxu1 %vm426_vm1, %v401_v35  ;;  %s375_s22 = scalar_lea.vmem %s1342_s1, %s946_s17  ;;  %s947_s23 = sshll.u32 %s384_s18, 3 }
  0x1b   : > { %v417_v43 = vshll.u32 %v404_v36, 16  ;;  %v508_v48 = vld [vmem:[%s375_s22] sm:$0xff]  ;;  %v509_v49 = vld [vmem:[%s375_s22 + $0x8] sm:$0xff]  ;;  %s386_s20 = scalar_lea.vmem %s1343_s2, %s947_s23  ;;  %v510_v51 = vld [vmem:[%s375_s22 + $0x10] sm:$0x3]  ;;  %s1368_s24 = smov (!%p390_p9, %s1097_s24), 15 }
  0x1c   : > { %v480_v45 = vsel %vm477_vm2, %v478_v39, %v479_v40  ;;  %v414_v46 = vrot.slane %v412_v42, 1  ;;  %v511_v52 = vpack.c.bf16 %v509_v49, %v508_v48  ;;  %v619_v53 = vld [vmem:[%s386_s20] sm:$0xff]  ;;  %v620_v54 = vld [vmem:[%s386_s20 + $0x8] sm:$0xff]  ;;  %v621_v55 = vld [vmem:[%s386_s20 + $0x10] sm:$0x3]  ;;  %v542_v59 = vpack.c.bf16 %v510_v51, %v510_v51  ;;  %s948_s23 = sshll.u32 %s1368_s24, 1 }
  0x1d   : > { %969 = vmatmul.msk.bf16.vlgmr.msra.gmra.mxu2 %vm426_vm1, %v480_v45  ;;  %v419_v47 = vrot.slane %v417_v43, 1  ;;  %v622_v58 = vpack.c.bf16 %v620_v54, %v619_v53  ;;  %v653_v61 = vpack.c.bf16 %v621_v55, %v621_v55  ;;  %765 = vmatpush.msra.mxu1 %v741_v17  ;;  %s949_s19 = sshll.u32 %s1362_s25, 5 }
  0x1e   : > { %v415_v50 = vor.u32 %v414_v46, %v410_v41  ;;  %976 = vmatmul.msk.bf16.vlgmr.msra.gmra.mxu3 %vm426_vm1, %v511_v52  ;;  %v548_v60 = vshll.u32 %v511_v52, 16  ;;  %v589_v63 = vrot.slane %v511_v52, 1  ;;  %v590_v0 = vrot.slane %v542_v59, 1  ;;  %s394_s8 = sadd.s32 %s949_s19, %s948_s23 }
  0x1f   : > { %v659_v62 = vshll.u32 %v622_v58, 16  ;;  %v546_v1 = vshrl.u32 %v511_v52, 16  ;;  %v553_v2 = vshll.u32 %v542_v59, 16  ;;  %v657_v4 = vshrl.u32 %v622_v58, 16  ;;  %766 = vmatpush.msra.mxu1 %v740_v18  ;;  %s950_s20 = sshll.u32 %s394_s8, 2 }
  0x20   : > { %v420_v57 = vsel %vm408_vm3, %v415_v50, %v419_v47  ;;  %v550_v3 = vrot.slane %v548_v60, 1  ;;  %v664_v6 = vshll.u32 %v653_v61, 16  ;;  %v591_v7 = vsel %vm477_vm2, %v589_v63, %v590_v0  ;;  %v1069_v47 = vld [vmem:[%s1345_s4] ss:$0 sm:$0xff]  ;;  %s396_s14 = scalar_lea.vmem %s1348_s7, %s950_s20 }
  0x21   : > { %957 = vmatmul.msk.bf16.vlgmr.msra.gmra.mxu0 %vm426_vm1, %v420_v57  ;;  %v661_v5 = vrot.slane %v659_v62, 1  ;;  %v555_v9 = vrot.slane %v553_v2, 1  ;;  %v700_v14 = vrot.slane %v622_v58, 1  ;;  %v701_v15 = vrot.slane %v653_v61, 1  ;;  %767 = vmatpush.msra.mxu1 %v739_v19  ;;  %v1070_v60 = vld [vmem:[%s1347_s6] ss:$0 sm:$0xff] }
  0x22   : > { %721 = vmatpush.bf16.msra.mxu0 %v712_v56  ;;  %v551_v8 = vor.u32 %v550_v3, %v546_v1  ;;  %v666_v11 = vrot.slane %v664_v6, 1 }
  0x23   : > { %v662_v10 = vor.u32 %v661_v5, %v657_v4  ;;  %v702_v16 = vsel %vm477_vm2, %v700_v14, %v701_v15  ;;  %768 = vmatpush.msra.mxu1 %v738_v23 }
  0x24   : > { %v556_v12 = vsel %vm408_vm3, %v551_v8, %v555_v9 }
  0x25   : > { %v667_v13 = vsel %vm408_vm3, %v662_v10, %v666_v11 }
  0x2a   : > { %990 = vmatmul.msk.bf16.vlgmr.msrb.gmra.mxu1 %vm426_vm1, %v591_v7 }
  0x2d   : > { %997 = vmatmul.msk.bf16.vlgmr.msrb.gmra.mxu2 %vm426_vm1, %v622_v58 }
  0x2e   : > { %1004 = vmatmul.msk.bf16.vlgmr.msrb.gmra.mxu3 %vm426_vm1, %v667_v13 }
  0x31   : > { %983 = vmatmul.msk.bf16.vlgmr.msrb.gmra.mxu0 %vm426_vm1, %v556_v12 }
  0x41   : > { %1011 = vmatmul.msk.bf16.vlgmr.msra.gmra.mxu0 %vm426_vm1, %v702_v16 }
  0x97   : > { %v467_v21 = vpop.f32.mrf.mxu1 }
  0x9e   : > { %v443_v20 = vpop.f32.mrf.mxu0 }
  0x9f   : > { %v468_v26 = vadd.f32 %v467_v21, %v443_v20  ;;  %v469_v27 = vpop.f32.mrf.mxu1 }
  0xa0   : > { %v501_v22 = vpop.f32.mrf.mxu2 }
  0xa1   : > { %v535_v24 = vpop.f32.mrf.mxu3  ;;  %v506_v28 = vadd.f32 %v501_v22, %v468_v26 }
  0xa3   : > { %v540_v31 = vadd.f32 %v535_v24, %v506_v28 }
  0xa6   : > { %v445_v25 = vpop.f32.mrf.mxu0 }
  0xa7   : > { %v470_v32 = vadd.f32 %v469_v27, %v445_v25  ;;  %v612_v34 = vpop.f32.mrf.mxu1 }
  0xa8   : > { %v503_v29 = vpop.f32.mrf.mxu2 }
  0xa9   : > { %v537_v33 = vpop.f32.mrf.mxu3  ;;  %v507_v36 = vadd.f32 %v503_v29, %v470_v32 }
  0xab   : > { %v541_v40 = vadd.f32 %v537_v33, %v507_v36 }
  0xae   : > { %v577_v30 = vpop.f32.mrf.mxu0 }
  0xaf   : > { %v582_v35 = vadd.f32 %v577_v30, %v540_v31  ;;  %v614_v44 = vpop.f32.mrf.mxu1 }
  0xb0   : > { %v646_v37 = vpop.f32.mrf.mxu2 }
  0xb1   : > { %v617_v38 = vadd.f32 %v612_v34, %v582_v35  ;;  %v688_v41 = vpop.f32.mrf.mxu3 }
  0xb3   : > { %v651_v42 = vadd.f32 %v646_v37, %v617_v38 }
  0xb5   : > { %v693_v45 = vadd.f32 %v688_v41, %v651_v42 }
  0xb6   : > { %v579_v39 = vpop.f32.mrf.mxu0 }
  0xb7   : > { %v583_v43 = vadd.f32 %v579_v39, %v541_v40 }
  0xb8   : > { %v648_v48 = vpop.f32.mrf.mxu2 }
  0xb9   : > { %v618_v46 = vadd.f32 %v614_v44, %v583_v43  ;;  %v690_v53 = vpop.f32.mrf.mxu3 }
  0xbb   : > { %v652_v51 = vadd.f32 %v648_v48, %v618_v46 }
  0xbd   : > { %v694_v55 = vadd.f32 %v690_v53, %v652_v51 }
  0xbe   : > { %v723_v49 = vpop.f32.mrf.mxu0 }
  0xbf   : > { %v728_v50 = vadd.f32 %v723_v49, %v693_v45 }
  0xc1   : > { %v734_v52 = vadd.f32 %v1069_v47, %v728_v50 }
  0xc3   : > { %v736_v54 = vmul.f32 %v734_v52, %v734_v52 }
  0xc5   : > { %1012 = vmatmul.msk.f32.vlgmr.msra.gmra.mxu1 %vm746_vm4, %v736_v54 }
  0xc6   : > { %v725_v56 = vpop.f32.mrf.mxu0 }
  0xc7   : > { %v729_v57 = vadd.f32 %v725_v56, %v694_v55 }
  0xc9   : > { %v735_v58 = vadd.f32 %v1069_v47, %v729_v57 }
  0xcb   : > { %v737_v59 = vmul.f32 %v735_v58, %v735_v58 }
  0xcd   : > { %1013 = vmatmul.msk.f32.gmra.mxu1 %vm746_vm4, %v737_v59 }
 0x142   : > { %v770_v61 = vpop.f32.mrf.mxu1 }
 0x143   : > { %v771_v62 = vadd.f32 %v1070_v60, %v770_v61 }
 0x145   : > { %1071 = vrsqrt.f32 %v771_v62  ;;  %vm782_vm6 = vweird.f32 %v771_v62 }
 0x14a   : > { %v773_v63 = vpop.f32.mrf.mxu1 }
 0x14b   : > { %v1072_v0 = vpop.eup %1071  ;;  %v774_v1 = vadd.f32 %v1070_v60, %v773_v63 }
 0x14c   : > { %v777_v2 = vmul.f32 %v1072_v0, %v771_v62  ;;  %vm783_vm5 = vweird.f32 %v1072_v0 }
 0x14d   : > { %1073 = vrsqrt.f32 %v774_v1  ;;  %vm784_vm7 = vmor %vm782_vm6, %vm783_vm5  ;;  %vm792_vm10 = vweird.f32 %v774_v1 }
 0x14e   : > { %v778_v3 = vmul.f32 %v1072_v0, %v777_v2 }
 0x150   : > { %v779_v4 = vmul.f32 0.5, %v778_v3 }
 0x152   : > { %v780_v5 = vsub.f32 1.5, %v779_v4 }
 0x153   : > { %v1074_v6 = vpop.eup %1073 }
 0x154   : > { %v781_v7 = vmul.f32 %v1072_v0, %v780_v5  ;;  %v787_v8 = vmul.f32 %v1074_v6, %v774_v1  ;;  %vm793_vm9 = vweird.f32 %v1074_v6 }
 0x155   : > { %vm794_vm11 = vmor %vm792_vm10, %vm793_vm9 }
 0x156   : > { %v785_v9 = vsel %vm784_vm7, %v1072_v0, %v781_v7  ;;  %v788_v10 = vmul.f32 %v1074_v6, %v787_v8 }
 0x157   : > { %v796_v11 = vmul.f32 %v785_v9, %v734_v52 }
 0x158   : > { %v789_v12 = vmul.f32 0.5, %v788_v10 }
 0x159   : > { %v798_v13 = vpack.c.bf16 %v796_v11, %v796_v11 }
 0x15a   : > { %v790_v14 = vsub.f32 1.5, %v789_v12 }
 0x15b   : > { %801 = vst.msk [vmem:[%s396_s14] sm:$0xf] %vm800_vm8, %v798_v13 }
 0x15c   : > { %v791_v15 = vmul.f32 %v1074_v6, %v790_v14 }
 0x15e   : > { %v795_v16 = vsel %vm794_vm11, %v1074_v6, %v791_v15 }
 0x15f   : > { %v797_v17 = vmul.f32 %v795_v16, %v735_v58 }
 0x161   : > { %v799_v18 = vpack.c.bf16 %v797_v17, %v797_v17 }
 0x163   : > { %802 = vst.msk [vmem:[%s396_s14 + $0x4] sm:$0xf] %vm800_vm8, %v799_v18 }
 0x164 PF: > { %s17_s28 = sadd.s32 1, %s1113_s28   ;;  %s1351_s24 = smov %s1105_s26 }
 0x165   : > { %p14_p10 = scmp.ge.s32.totalorder %s17_s28, 34   ;;  %s1352_s25 = smov %s1109_s27 }
 0x166   : > { %s1353_s26 = smov %s1356_s29  ;;  %s1354_s27 = smov %s1360_s30 }
 0x167   :  { %16 = sbr.rel (!%p14_p10) target bundleno = 3 (0x3), region = 92 }

// kernel: comp_decompressor_forward.9
= control target key start
LH: loop header
LB: loop body
LE: loop exit
PB: predicated region body
PF: predicated region fallthrough
CT: control target
= control target key end

     0   :  { %s1981_s24 = smov 0   ;;  %s1983_s25 = smov 0   ;;  %s2310_s0 = inlined_call_operand.vmem [shape: bf16[2,10,10,128], index: 0, kind: input, shape index: {}, may-alias: {0,1,2}]   ;;  %s2311_s1 = inlined_call_operand.vmem [shape: bf16[2,10,10,128], index: 1, kind: input, shape index: {}, may-alias: {0,1,2}]   ;;  %s2312_s2 = inlined_call_operand.vmem [shape: bf16[2,10,10,128], index: 2, kind: input, shape index: {}, may-alias: {0,1,2}]   ;;  %s2313_s3 = inlined_call_operand.vmem [shape: bf16[9,128,32], index: 3, kind: input, shape index: {}]   ;;  %s2314_s4 = inlined_call_operand.vmem [shape: f32[1,32], index: 4, kind: input, shape index: {}]   ;;  %s2315_s5 = inlined_call_operand.vmem [shape: f32[32,32], index: 5, kind: input, shape index: {}]   ;;  %s2316_s6 = inlined_call_operand.vmem [shape: f32[1,32], index: 6, kind: input, shape index: {}]   ;;  %s2317_s7 = inlined_call_operand.vmem [shape: bf16[2,8,8,32], index: 7, kind: output, shape index: {}]  }
   0x1   :  { %2318 = sst [smem:[#allocation2_spill]] %s2310_s0  ;;  %s1985_s26 = smov 0  }
   0x2   :  { %s1987_s27 = smov 0   ;;  %s1989_s28 = smov 0  }
   0x3 LB: > { %s26_s29 = sadd.s32 1, %s1931_s26  ;;  %s29_s30 = sadd.s32 1, %s1935_s27  ;;  %s1939_s28 = sphi %s1989_s28, %s17_s28   ;;  %s1935_s27 = sphi %s1987_s27, %s2324_s27   ;;  %s1931_s26 = sphi %s1985_s26, %s2323_s26   ;;  %s1927_s25 = sphi %s1983_s25, %s2322_s25   ;;  %s1923_s24 = sphi %s1981_s24, %s2321_s24  }
   0x4   : > { %p27_p0 = scmp.ge.s32.totalorder %s26_s29, 8  ;;  %p1341_p1 = scmp.ge.s32.totalorder %s1939_s28, 1 }
   0x5   : > { %p297_p2 = scmp.lt.s32.totalorder %s1939_s28, 17 }
   0x6   : > { %s2326_s29 = smov (%p27_p0, %s26_s29), 0  ;;  %s2328_s30 = smov (!%p27_p0, %s29_s30), %s1935_s27 }
   0x7   : > { %p298_p3 = pnand %p1341_p1, %p297_p2  ;;  %p31_p4 = scmp.ge.s32.totalorder %s2328_s30, 2 }
   0x8   : > { %p356_p5 = scmp.lt.s32.totalorder (!%p298_p3), %s1927_s25, 1  ;;  %p358_p6 = scmp.lt.s32.totalorder (!%p298_p3), %s1923_s24, 9 }
   0x9   : > { %s2330_s30 = smov (%p31_p4, %s2328_s30), 0  ;;  %301 = sbr.rel (%p298_p3) target bundleno = 393 (0x189), region = 48 }
   0xa   : > { %s2319_s0 = sld [smem:[#allocation2_spill]] (!%p298_p3)  ;;  %s376_s12 = sadd.s32 (!%p298_p3), 2, %s1923_s24 }
   0xb   : > { %p2115_p8 = scmp.lt.s32.totalorder (!%p298_p3), %s376_s12, 9  ;;  %p389_p9 = scmp.lt.s32.totalorder (!%p298_p3), %s1923_s24, 7 }
   0xe   : > { %v1797_v0 = vld [vmem:[%s2313_s3 + $0x78] sm:$0xff]  ;;  %v1796_v4 = vld [vmem:[%s2313_s3 + $0x70] sm:$0xff]  ;;  %s2332_s25 = smov (!%p356_p5, %s1927_s25), 1  ;;  %v1795_v8 = vld [vmem:[%s2313_s3 + $0x68] sm:$0xff]  ;;  %s2336_s12 = smov (!%p2115_p8, %s376_s12), 9  ;;  %vm1168_vm0 = vcmask 261120  }
   0xf   : > { %v1805_v1 = vld [vmem:[%s2313_s3 + $0xb8] sm:$0xff]  ;;  %491 = vmatpush.bf16.msra.mxu0 %v1797_v0  ;;  %v1804_v5 = vld [vmem:[%s2313_s3 + $0xb0] sm:$0xff]  ;;  %s359_s8 = scalar_select %p358_p6, %s1923_s24, 9  ;;  %v1803_v9 = vld [vmem:[%s2313_s3 + $0xa8] sm:$0xff]  ;;  %vm1204_vm4 = vcmask 257024  }
  0x10   : > { %v1814_v2 = vld [vmem:[%s2313_s3 + $0xf8] sm:$0xff]  ;;  %632 = vmatpush.bf16.msra.mxu2 %v1805_v1  ;;  %v1813_v6 = vld [vmem:[%s2313_s3 + $0xf0] sm:$0xff]  ;;  %s2042_s9 = smul.u32 20, %s2332_s25  ;;  %v1812_v10 = vld [vmem:[%s2313_s3 + $0xe8] sm:$0xff]  ;;  %s1346_s23 = sshll.u32 %s2336_s12, 1 }
  0x11   : > { %v1789_v3 = vld [vmem:[%s2313_s3 + $0x38] sm:$0xff]  ;;  %713 = vmatpush.bf16.msra.mxu3 %v1814_v2  ;;  %v1788_v7 = vld [vmem:[%s2313_s3 + $0x30] sm:$0xff]  ;;  %s1342_s10 = sshll.u32 %s359_s8, 1  ;;  %v1787_v11 = vld [vmem:[%s2313_s3 + $0x28] sm:$0xff] }
  0x12   : > { %552 = vmatpush.bf16.msra.mxu1 %v1789_v3  ;;  %s362_s15 = sadd.s32 %s2042_s9, %s1342_s10  ;;  %v1794_v12 = vld [vmem:[%s2313_s3 + $0x60] sm:$0xff]  ;;  %s365_s10 = sadd.s32 1, %s1923_s24  ;;  %v1793_v16 = vld [vmem:[%s2313_s3 + $0x58] sm:$0xff]  ;;  %v1792_v22 = vld [vmem:[%s2313_s3 + $0x50] sm:$0xff] }
  0x13   : > { %492 = vmatpush.bf16.msra.mxu0 %v1796_v4  ;;  %s1343_s20 = sshll.u32 %s362_s15, 2  ;;  %v1802_v13 = vld [vmem:[%s2313_s3 + $0xa0] sm:$0xff]  ;;  %p368_p7 = scmp.lt.s32.totalorder %s365_s10, 9  ;;  %v1801_v17 = vld [vmem:[%s2313_s3 + $0x98] sm:$0xff]  ;;  %v1800_v23 = vld [vmem:[%s2313_s3 + $0x90] sm:$0xff] }
  0x14   : > { %633 = vmatpush.bf16.msra.mxu2 %v1804_v5  ;;  %v1811_v14 = vld [vmem:[%s2313_s3 + $0xe0] sm:$0xff]  ;;  %s2073_s17 = scalar_lea.vmem %s2319_s0, %s1343_s20  ;;  %v1810_v18 = vld [vmem:[%s2313_s3 + $0xd8] sm:$0xff]  ;;  %v1809_v25 = vld [vmem:[%s2313_s3 + $0xd0] sm:$0xff]  ;;  %s383_s13 = sadd.s32 %s2042_s9, %s1346_s23 }
  0x15   : > { %714 = vmatpush.bf16.msra.mxu3 %v1813_v6  ;;  %v1786_v15 = vld [vmem:[%s2313_s3 + $0x20] sm:$0xff]  ;;  %v1785_v19 = vld [vmem:[%s2313_s3 + $0x18] sm:$0xff]  ;;  %s2334_s10 = smov (!%p368_p7, %s365_s10), 9  ;;  %v1784_v26 = vld [vmem:[%s2313_s3 + $0x10] sm:$0xff]  ;;  %s2338_s24 = smov (!%p389_p9, %s1923_s24), 7 }
  0x16   : > { %553 = vmatpush.bf16.msra.mxu1 %v1788_v7  ;;  %v1368_v20 = vld [vmem:[%s2073_s17] sm:$0xf]  ;;  %v1781_v21 = vld [vmem:[%s2073_s17] sm:$0x10]  ;;  %s1344_s22 = sshll.u32 %s2334_s10, 1  ;;  %v1791_v27 = vld [vmem:[%s2313_s3 + $0x48] sm:$0xff] }
  0x17   : > { %493 = vmatpush.bf16.msra.mxu0 %v1795_v8  ;;  %v1369_v24 = vor.u32 %v1781_v21, %v1368_v20  ;;  %v1799_v28 = vld [vmem:[%s2313_s3 + $0x88] sm:$0xff]  ;;  %s372_s16 = sadd.s32 %s2042_s9, %s1344_s22  ;;  %v1790_v32 = vld [vmem:[%s2313_s3 + $0x40] sm:$0xff]  ;;  %v1822_v36 = vld [vmem:[%s2313_s3 + $0x138] sm:$0xff] }
  0x18   : > { %634 = vmatpush.bf16.msra.mxu2 %v1803_v9  ;;  %v1808_v30 = vld [vmem:[%s2313_s3 + $0xc8] sm:$0xff]  ;;  %v1798_v33 = vld [vmem:[%s2313_s3 + $0x80] sm:$0xff]  ;;  %v1839_v37 = vld [vmem:[%s2313_s3 + $0x1b8] sm:$0xff]  ;;  %s1345_s14 = sshll.u32 %s372_s16, 2 }
  0x19   : > { %715 = vmatpush.bf16.msra.mxu3 %v1812_v10  ;;  %v438_v29 = vshll.u32 %v1369_v24, 16  ;;  %v1783_v31 = vld [vmem:[%s2313_s3 + $0x8] sm:$0xff]  ;;  %v436_v34 = vshrl.u32 %v1369_v24, 16  ;;  %v1807_v38 = vld [vmem:[%s2313_s3 + $0xc0] sm:$0xff]  ;;  %v1847_v40 = vld [vmem:[%s2313_s3 + $0x1f8] sm:$0xff]  ;;  %v582_v42 = vrot.slane %v1369_v24, 1  ;;  %s2148_s11 = scalar_lea.vmem %s2311_s1, %s1345_s14 }
  0x1a   : > { %554 = vmatpush.bf16.msra.mxu1 %v1787_v11  ;;  %v1782_v39 = vld [vmem:[%s2313_s3] sm:$0xff]  ;;  %v1830_v41 = vld [vmem:[%s2313_s3 + $0x178] sm:$0xff]  ;;  %v1821_v44 = vld [vmem:[%s2313_s3 + $0x130] sm:$0xff]  ;;  %s1347_s14 = sshll.u32 %s383_s13, 2 }
  0x1b   : > { %494 = vmatpush.bf16.msra.mxu0 %v1794_v12  ;;  %v440_v35 = vrot.slane %v438_v29, 1  ;;  %v1838_v45 = vld [vmem:[%s2313_s3 + $0x1b0] sm:$0xff]  ;;  %v646_v48 = vld [vmem:[%s2148_s11] sm:$0xf]  ;;  %v1820_v50 = vld [vmem:[%s2313_s3 + $0x128] sm:$0xff]  ;;  %s2195_s12 = scalar_lea.vmem %s2312_s2, %s1347_s14 }
  0x1c   : > { %635 = vmatpush.bf16.msra.mxu2 %v1802_v13  ;;  %v1846_v46 = vld [vmem:[%s2313_s3 + $0x1f0] sm:$0xff]  ;;  %v395_v49 = vld [vmem:[%s2073_s17] sm:$0xf]  ;;  %v1837_v51 = vld [vmem:[%s2313_s3 + $0x1a8] sm:$0xff] }
  0x1d   : > { %716 = vmatpush.bf16.msra.mxu3 %v1811_v14  ;;  %v441_v43 = vor.u32 %v440_v35, %v436_v34  ;;  %v1829_v47 = vld [vmem:[%s2313_s3 + $0x170] sm:$0xff]  ;;  %v1845_v52 = vld [vmem:[%s2313_s3 + $0x1e8] sm:$0xff]  ;;  %v1819_v54 = vld [vmem:[%s2313_s3 + $0x120] sm:$0xff] }
  0x1e   : > { %555 = vmatpush.bf16.msra.mxu1 %v1786_v15  ;;  %v1828_v53 = vld [vmem:[%s2313_s3 + $0x168] sm:$0xff]  ;;  %v1836_v55 = vld [vmem:[%s2313_s3 + $0x1a0] sm:$0xff]  ;;  %v1818_v58 = vld [vmem:[%s2313_s3 + $0x118] sm:$0xff] }
  0x1f   : > { %495 = vmatpush.bf16.msra.mxu0 %v1793_v16  ;;  %v1844_v56 = vld [vmem:[%s2313_s3 + $0x1e0] sm:$0xff]  ;;  %v1835_v59 = vld [vmem:[%s2313_s3 + $0x198] sm:$0xff]  ;;  %v1817_v3 = vld [vmem:[%s2313_s3 + $0x110] sm:$0xff] }
  0x20   : > { %636 = vmatpush.bf16.msra.mxu2 %v1801_v17  ;;  %v1827_v57 = vld [vmem:[%s2313_s3 + $0x160] sm:$0xff]  ;;  %v1843_v62 = vld [vmem:[%s2313_s3 + $0x1d8] sm:$0xff]  ;;  %v1834_v4 = vld [vmem:[%s2313_s3 + $0x190] sm:$0xff] }
  0x21   : > { %717 = vmatpush.bf16.msra.mxu3 %v1810_v18  ;;  %v1548_v60 = vld [vmem:[%s2148_s11] sm:$0xf]  ;;  %v1806_v61 = vld [vmem:[%s2148_s11] sm:$0x10]  ;;  %v1826_v63 = vld [vmem:[%s2313_s3 + $0x158] sm:$0xff]  ;;  %s1348_s11 = sshll.u32 %s2332_s25, 3 }
  0x22   : > { %556 = vmatpush.bf16.msra.mxu1 %v1785_v19  ;;  %v1696_v0 = vld [vmem:[%s2195_s12] sm:$0xf]  ;;  %v1831_v1 = vld [vmem:[%s2195_s12] sm:$0x10]  ;;  %v1549_v2 = vor.u32 %v1806_v61, %v1548_v60  ;;  %v1842_v6 = vld [vmem:[%s2313_s3 + $0x1d0] sm:$0xff]  ;;  %s392_s23 = sadd.s32 %s1348_s11, %s2338_s24 }
  0x23   : > { %496 = vmatpush.bf16.msra.mxu0 %v1792_v22  ;;  %v1697_v5 = vor.u32 %v1831_v1, %v1696_v0  ;;  %v1825_v7 = vld [vmem:[%s2313_s3 + $0x150] sm:$0xff]  ;;  %v1816_v9 = vld [vmem:[%s2313_s3 + $0x108] sm:$0xff]  ;;  %v1815_v16 = vld [vmem:[%s2313_s3 + $0x100] sm:$0xff]  ;;  %s1349_s8 = sshll.u32 %s392_s23, 2 }
  0x24   : > { %637 = vmatpush.bf16.msra.mxu2 %v1800_v23  ;;  %v752_v8 = vshll.u32 %v1549_v2, 16  ;;  %v1833_v10 = vld [vmem:[%s2313_s3 + $0x188] sm:$0xff]  ;;  %v750_v14 = vshrl.u32 %v1549_v2, 16  ;;  %v1832_v17 = vld [vmem:[%s2313_s3 + $0x180] sm:$0xff]  ;;  %v1855_v18 = vld [vmem:[%s2313_s3 + $0x238] sm:$0xff]  ;;  %s394_s20 = scalar_lea.vmem %s2317_s7, %s1349_s8 }
  0x25   : > { %718 = vmatpush.bf16.msra.mxu3 %v1809_v25  ;;  %v1006_v11 = vshll.u32 %v1697_v5, 16  ;;  %v1841_v12 = vld [vmem:[%s2313_s3 + $0x1c8] sm:$0xff]  ;;  %v1004_v19 = vshrl.u32 %v1697_v5, 16  ;;  %v1840_v21 = vld [vmem:[%s2313_s3 + $0x1c0] sm:$0xff]  ;;  %v1854_v25 = vld [vmem:[%s2313_s3 + $0x230] sm:$0xff]  ;;  %v1090_v34 = vrot.slane %v1697_v5, 1 }
  0x26   : > { %557 = vmatpush.bf16.msra.mxu1 %v1784_v26  ;;  %v1824_v13 = vld [vmem:[%s2313_s3 + $0x148] sm:$0xff]  ;;  %v754_v15 = vrot.slane %v752_v8, 1  ;;  %v1823_v22 = vld [vmem:[%s2313_s3 + $0x140] sm:$0xff] }
  0x27   : > { %497 = vmatpush.bf16.msra.mxu0 %v1791_v27  ;;  %v1008_v20 = vrot.slane %v1006_v11, 1  ;;  %v900_v24 = vld [vmem:[%s2195_s12] sm:$0xf]  ;;  %v836_v27 = vrot.slane %v1549_v2, 1 }
  0x28   : > { %638 = vmatpush.bf16.msra.mxu2 %v1799_v28  ;;  %v755_v23 = vor.u32 %v754_v15, %v750_v14  ;;  %v1853_v28 = vld [vmem:[%s2313_s3 + $0x228] sm:$0xff]  ;;  %v1852_v29 = vld [vmem:[%s2313_s3 + $0x220] sm:$0xff] }
  0x29   : > { %719 = vmatpush.bf16.msra.mxu3 %v1808_v30  ;;  %v1009_v26 = vor.u32 %v1008_v20, %v1004_v19  ;;  %v1851_v30 = vld [vmem:[%s2313_s3 + $0x218] sm:$0xff] }
  0x2a   : > { %558 = vmatpush.bf16.msra.mxu1 %v1783_v31  ;;  %v1850_v31 = vld [vmem:[%s2313_s3 + $0x210] sm:$0xff] }
  0x2b   : > { %498 = vmatpush.bf16.msra.mxu0 %v1790_v32  ;;  %v1849_v32 = vld [vmem:[%s2313_s3 + $0x208] sm:$0xff] }
  0x2c   : > { %639 = vmatpush.bf16.msra.mxu2 %v1798_v33  ;;  %v1848_v33 = vld [vmem:[%s2313_s3 + $0x200] sm:$0xff] }
  0x2d   : > { %720 = vmatpush.bf16.msra.mxu3 %v1807_v38 }
  0x2e   : > { %559 = vmatpush.bf16.msra.mxu1 %v1782_v39  ;;  %499 = vmatmul.bf16.vlgmr.msra.gmra.mxu0 %v441_v43  ;;  %v1162_v39 = vld [vmem:[%s2315_s5 + $0x10] sm:$0xff]  ;;  %v1161_v43 = vld [vmem:[%s2315_s5 + $0x8] sm:$0xff] }
  0x2f   : > { %805 = vmatpush.bf16.msrb.mxu0 %v1822_v36  ;;  %640 = vmatmul.bf16.vlgmr.msra.gmra.mxu2 %v582_v42 }
  0x30   : > { %967 = vmatpush.bf16.msrb.mxu2 %v1839_v37  ;;  %721 = vmatmul.bf16.vlgmr.msra.gmra.mxu3 %v646_v48  ;;  %v1163_v37 = vld [vmem:[%s2315_s5 + $0x18] sm:$0xff] }
  0x31   : > { %1059 = vmatpush.bf16.msrb.mxu3 %v1847_v40  ;;  %560 = vmatmul.bf16.vlgmr.msra.gmra.mxu1 %v395_v49 }
  0x32   : > { %886 = vmatpush.bf16.msrb.mxu1 %v1830_v41 }
  0x33   : > { %806 = vmatpush.bf16.msrb.mxu0 %v1821_v44 }
  0x34   : > { %968 = vmatpush.bf16.msrb.mxu2 %v1838_v45 }
  0x35   : > { %1060 = vmatpush.bf16.msrb.mxu3 %v1846_v46 }
  0x36   : > { %887 = vmatpush.bf16.msrb.mxu1 %v1829_v47  ;;  %v1160_v47 = vld [vmem:[%s2315_s5] sm:$0xff] }
  0x37   : > { %807 = vmatpush.bf16.msrb.mxu0 %v1820_v50 }
  0x38   : > { %969 = vmatpush.bf16.msrb.mxu2 %v1837_v51 }
  0x39   : > { %1061 = vmatpush.bf16.msrb.mxu3 %v1845_v52 }
  0x3a   : > { %888 = vmatpush.bf16.msrb.mxu1 %v1828_v53 }
  0x3b   : > { %808 = vmatpush.bf16.msrb.mxu0 %v1819_v54 }
  0x3c   : > { %970 = vmatpush.bf16.msrb.mxu2 %v1836_v55 }
  0x3d   : > { %1062 = vmatpush.bf16.msrb.mxu3 %v1844_v56 }
  0x3e   : > { %889 = vmatpush.bf16.msrb.mxu1 %v1827_v57 }
  0x3f   : > { %809 = vmatpush.bf16.msrb.mxu0 %v1818_v58 }
  0x40   : > { %971 = vmatpush.bf16.msrb.mxu2 %v1835_v59 }
  0x41   : > { %1063 = vmatpush.bf16.msrb.mxu3 %v1843_v62  ;;  %v1897_v62 = vld [vmem:[%s2314_s4] ss:$0 sm:$0xff] }
  0x42   : > { %890 = vmatpush.bf16.msrb.mxu1 %v1826_v63 }
  0x43   : > { %810 = vmatpush.bf16.msrb.mxu0 %v1817_v3 }
  0x44   : > { %972 = vmatpush.bf16.msrb.mxu2 %v1834_v4  ;;  %v1898_v4 = vld [vmem:[%s2316_s6] ss:$0 sm:$0xff] }
  0x45   : > { %1064 = vmatpush.bf16.msrb.mxu3 %v1842_v6 }
  0x46   : > { %891 = vmatpush.bf16.msrb.mxu1 %v1825_v7 }
  0x47   : > { %811 = vmatpush.bf16.msrb.mxu0 %v1816_v9 }
  0x48   : > { %973 = vmatpush.bf16.msrb.mxu2 %v1833_v10 }
  0x49   : > { %1065 = vmatpush.bf16.msrb.mxu3 %v1841_v12 }
  0x4a   : > { %892 = vmatpush.bf16.msrb.mxu1 %v1824_v13 }
  0x4b   : > { %812 = vmatpush.bf16.msrb.mxu0 %v1815_v16 }
  0x4c   : > { %974 = vmatpush.bf16.msrb.mxu2 %v1832_v17 }
  0x4d   : > { %1066 = vmatpush.bf16.msrb.mxu3 %v1840_v21 }
  0x4e   : > { %893 = vmatpush.bf16.msrb.mxu1 %v1823_v22  ;;  %813 = vmatmul.bf16.vlgmr.msrb.gmra.mxu0 %v755_v23 }
  0x4f   : > { %1140 = vmatpush.bf16.msra.mxu0 %v1855_v18  ;;  %975 = vmatmul.bf16.vlgmr.msrb.gmra.mxu2 %v900_v24 }
  0x50   : > { %1067 = vmatmul.bf16.vlgmr.msrb.gmra.mxu3 %v1009_v26 }
  0x51   : > { %894 = vmatmul.bf16.vlgmr.msrb.gmra.mxu1 %v836_v27 }
  0x52   : > { %1184 = vmatpush.msra.mxu1 %v1163_v37 }
  0x53   : > { %1141 = vmatpush.bf16.msra.mxu0 %v1854_v25 }
  0x54   : > { %1185 = vmatpush.msra.mxu1 %v1162_v39 }
  0x56   : > { %1186 = vmatpush.msra.mxu1 %v1161_v43 }
  0x57   : > { %1142 = vmatpush.bf16.msra.mxu0 %v1853_v28 }
  0x58   : > { %1187 = vmatpush.msra.mxu1 %v1160_v47 }
  0x5b   : > { %1143 = vmatpush.bf16.msra.mxu0 %v1852_v29 }
  0x5f   : > { %1144 = vmatpush.bf16.msra.mxu0 %v1851_v30 }
  0x63   : > { %1145 = vmatpush.bf16.msra.mxu0 %v1850_v31 }
  0x67   : > { %1146 = vmatpush.bf16.msra.mxu0 %v1849_v32 }
  0x6b   : > { %1147 = vmatpush.bf16.msra.mxu0 %v1848_v33 }
  0x6e   : > { %1148 = vmatmul.bf16.vlgmr.msra.gmra.mxu0 %v1090_v34 }
  0xab   : > { %v500_v35 = vpop.f32.mrf.mxu0 }
  0xae   : > { %v561_v36 = vpop.f32.mrf.mxu1 }
  0xaf   : > { %v562_v49 = vadd.f32 %v561_v36, %v500_v35 }
  0xb2   : > { %v641_v38 = vpop.f32.mrf.mxu2 }
  0xb3   : > { %v722_v40 = vpop.f32.mrf.mxu3  ;;  %v502_v41 = vpop.f32.mrf.mxu0  ;;  %v645_v51 = vadd.f32 %v641_v38, %v562_v49 }
  0xb5   : > { %v726_v55 = vadd.f32 %v722_v40, %v645_v51 }
  0xb6   : > { %v563_v42 = vpop.f32.mrf.mxu1 }
  0xba   : > { %v643_v44 = vpop.f32.mrf.mxu2 }
  0xbb   : > { %v724_v45 = vpop.f32.mrf.mxu3 }
  0xcb   : > { %v814_v46 = vpop.f32.mrf.mxu0 }
  0xcc   : > { %v818_v57 = vadd.f32 %v814_v46, %v726_v55 }
  0xce   : > { %v895_v48 = vpop.f32.mrf.mxu1 }
  0xcf   : > { %v899_v59 = vadd.f32 %v895_v48, %v818_v57 }
  0xd2   : > { %v976_v50 = vpop.f32.mrf.mxu2 }
  0xd3   : > { %v1068_v52 = vpop.f32.mrf.mxu3  ;;  %v816_v53 = vpop.f32.mrf.mxu0  ;;  %v980_v60 = vadd.f32 %v976_v50, %v899_v59 }
  0xd5   : > { %v1072_v61 = vadd.f32 %v1068_v52, %v980_v60 }
  0xd6   : > { %v897_v54 = vpop.f32.mrf.mxu1 }
  0xda   : > { %v978_v56 = vpop.f32.mrf.mxu2 }
  0xdb   : > { %v1070_v58 = vpop.f32.mrf.mxu3 }
  0xeb   : > { %v1149_v63 = vpop.f32.mrf.mxu0 }
  0xec   : > { %v1153_v0 = vadd.f32 %v1149_v63, %v1072_v61 }
  0xee   : > { %v1158_v1 = vadd.f32 %v1897_v62, %v1153_v0 }
  0xf0   : > { %v1159_v2 = vmul.f32 %v1158_v1, %v1158_v1 }
  0xf2   : > { %1778 = vmatmul.msk.f32.vlgmr.msra.gmra.mxu1 %vm1168_vm0, %v1159_v2 }
  0xf3   : > { %v1151_v3 = vpop.f32.mrf.mxu0 }
 0x16f   : > { %v1189_v5 = vpop.f32.mrf.mxu1 }
 0x170   : > { %v1190_v6 = vadd.f32 %v1898_v4, %v1189_v5 }
 0x172   : > { %1899 = vrsqrt.f32 %v1190_v6  ;;  %vm1198_vm2 = vweird.f32 %v1190_v6 }
 0x178   : > { %v1900_v7 = vpop.eup %1899 }
 0x179   : > { %v1193_v8 = vmul.f32 %v1900_v7, %v1190_v6  ;;  %vm1199_vm1 = vweird.f32 %v1900_v7 }
 0x17a   : > { %vm1200_vm3 = vmor %vm1198_vm2, %vm1199_vm1 }
 0x17b   : > { %v1194_v9 = vmul.f32 %v1900_v7, %v1193_v8 }
 0x17d   : > { %v1195_v10 = vmul.f32 0.5, %v1194_v9 }
 0x17f   : > { %v1196_v11 = vsub.f32 1.5, %v1195_v10 }
 0x181   : > { %v1197_v12 = vmul.f32 %v1900_v7, %v1196_v11 }
 0x183   : > { %v1201_v13 = vsel %vm1200_vm3, %v1900_v7, %v1197_v12 }
 0x184   : > { %v1202_v14 = vmul.f32 %v1201_v13, %v1158_v1 }
 0x186   : > { %v1203_v15 = vpack.c.bf16 %v1202_v14, %v1202_v14 }
 0x188   : > { %1205 = vst.msk [vmem:[%s394_s20] sm:$0xf] %vm1204_vm4, %v1203_v15 }
 0x189 PF: > { %s17_s28 = sadd.s32 1, %s1939_s28   ;;  %s2321_s24 = smov %s1931_s26 }
 0x18a   : > { %p14_p10 = scmp.ge.s32.totalorder %s17_s28, 18   ;;  %s2322_s25 = smov %s1935_s27 }
 0x18b   : > { %s2323_s26 = smov %s2326_s29  ;;  %s2324_s27 = smov %s2330_s30 }
 0x18c   :  { %16 = sbr.rel (!%p14_p10) target bundleno = 3 (0x3), region = 92 }

// kernel: comp_decompressor_forward.10
= control target key start
LH: loop header
LB: loop body
LE: loop exit
PB: predicated region body
PF: predicated region fallthrough
CT: control target
= control target key end

     0   :  { %s1936_s24 = smov 0   ;;  %s1938_s25 = smov 0   ;;  %s2254_s0 = inlined_call_operand.vmem [shape: bf16[2,6,6,128], index: 0, kind: input, shape index: {}, may-alias: {0,1,2}]   ;;  %s2255_s1 = inlined_call_operand.vmem [shape: bf16[2,6,6,128], index: 1, kind: input, shape index: {}, may-alias: {0,1,2}]   ;;  %s2256_s2 = inlined_call_operand.vmem [shape: bf16[2,6,6,128], index: 2, kind: input, shape index: {}, may-alias: {0,1,2}]   ;;  %s2257_s3 = inlined_call_operand.vmem [shape: bf16[9,128,32], index: 3, kind: input, shape index: {}]   ;;  %s2258_s4 = inlined_call_operand.vmem [shape: f32[1,32], index: 4, kind: input, shape index: {}]   ;;  %s2259_s5 = inlined_call_operand.vmem [shape: f32[32,32], index: 5, kind: input, shape index: {}]   ;;  %s2260_s6 = inlined_call_operand.vmem [shape: f32[1,32], index: 6, kind: input, shape index: {}]   ;;  %s2261_s7 = inlined_call_operand.vmem [shape: bf16[2,4,4,32], index: 7, kind: output, shape index: {}]  }
   0x1   :  { %s1940_s26 = smov 0   ;;  %s1942_s27 = smov 0  }
   0x2   :  { %s1944_s28 = smov 0  }
   0x3 LB: > { %s26_s29 = sadd.s32 1, %s1886_s26  ;;  %s29_s30 = sadd.s32 1, %s1890_s27  ;;  %s1894_s28 = sphi %s1944_s28, %s17_s28   ;;  %s1890_s27 = sphi %s1942_s27, %s2266_s27   ;;  %s1886_s26 = sphi %s1940_s26, %s2265_s26   ;;  %s1882_s25 = sphi %s1938_s25, %s2264_s25   ;;  %s1878_s24 = sphi %s1936_s24, %s2263_s24  }
   0x4   : > { %p27_p0 = scmp.ge.s32.totalorder %s26_s29, 4  ;;  %p1314_p1 = scmp.ge.s32.totalorder %s1894_s28, 1 }
   0x5   : > { %p294_p2 = scmp.lt.s32.totalorder %s1894_s28, 9 }
   0x6   : > { %s2268_s29 = smov (%p27_p0, %s26_s29), 0  ;;  %s2270_s30 = smov (!%p27_p0, %s29_s30), %s1890_s27 }
   0x7   : > { %p295_p3 = pnand %p1314_p1, %p294_p2  ;;  %p31_p4 = scmp.ge.s32.totalorder %s2270_s30, 2 }
   0x8   : > { %p350_p5 = scmp.lt.s32.totalorder (!%p295_p3), %s1882_s25, 1  ;;  %p352_p6 = scmp.lt.s32.totalorder (!%p295_p3), %s1878_s24, 5 }
   0x9   : > { %s2272_s30 = smov (%p31_p4, %s2270_s30), 0  ;;  %298 = sbr.rel (%p295_p3) target bundleno = 393 (0x189), region = 48 }
   0xa   : > { %s358_s16 = sadd.s32 (!%p295_p3), 1, %s1878_s24  ;;  %s368_s20 = sadd.s32 (!%p295_p3), 2, %s1878_s24 }
   0xb   : > { %p361_p7 = scmp.lt.s32.totalorder (!%p295_p3), %s358_s16, 5  ;;  %p2069_p8 = scmp.lt.s32.totalorder (!%p295_p3), %s368_s20, 5 }
   0xc   : > { %p380_p9 = scmp.lt.s32.totalorder (!%p295_p3), %s1878_s24, 3 }
   0xe   : > { %v1754_v0 = vld [vmem:[%s2257_s3 + $0x78] sm:$0xff]  ;;  %v1753_v4 = vld [vmem:[%s2257_s3 + $0x70] sm:$0xff]  ;;  %s2274_s25 = smov (!%p350_p5, %s1882_s25), 1  ;;  %v1752_v8 = vld [vmem:[%s2257_s3 + $0x68] sm:$0xff]  ;;  %s2276_s16 = smov (!%p361_p7, %s358_s16), 5  ;;  %vm1150_vm0 = vcmask 261120  }
   0xf   : > { %v1762_v1 = vld [vmem:[%s2257_s3 + $0xb8] sm:$0xff]  ;;  %479 = vmatpush.bf16.msra.mxu0 %v1754_v0  ;;  %v1761_v5 = vld [vmem:[%s2257_s3 + $0xb0] sm:$0xff]  ;;  %s353_s8 = scalar_select %p352_p6, %s1878_s24, 5  ;;  %v1760_v9 = vld [vmem:[%s2257_s3 + $0xa8] sm:$0xff]  ;;  %vm1186_vm4 = vcmask 254976  }
  0x10   : > { %v1770_v2 = vld [vmem:[%s2257_s3 + $0xf8] sm:$0xff]  ;;  %620 = vmatpush.bf16.msra.mxu2 %v1762_v1  ;;  %v1769_v6 = vld [vmem:[%s2257_s3 + $0xf0] sm:$0xff]  ;;  %s1997_s9 = smul.u32 6, %s2274_s25  ;;  %v1768_v10 = vld [vmem:[%s2257_s3 + $0xe8] sm:$0xff]  ;;  %s2278_s20 = smov (!%p2069_p8, %s368_s20), 5 }
  0x11   : > { %v1746_v3 = vld [vmem:[%s2257_s3 + $0x38] sm:$0xff]  ;;  %700 = vmatpush.bf16.msra.mxu3 %v1770_v2  ;;  %v1745_v7 = vld [vmem:[%s2257_s3 + $0x30] sm:$0xff]  ;;  %v1744_v11 = vld [vmem:[%s2257_s3 + $0x28] sm:$0xff]  ;;  %s2280_s24 = smov (!%p380_p9, %s1878_s24), 3  ;;  %s1318_s21 = sshll.u32 %s2274_s25, 2 }
  0x12   : > { %540 = vmatpush.bf16.msra.mxu1 %v1746_v3  ;;  %s355_s14 = sadd.s32 %s1997_s9, %s353_s8  ;;  %v1751_v12 = vld [vmem:[%s2257_s3 + $0x60] sm:$0xff]  ;;  %v1750_v16 = vld [vmem:[%s2257_s3 + $0x58] sm:$0xff]  ;;  %v1749_v22 = vld [vmem:[%s2257_s3 + $0x50] sm:$0xff]  ;;  %s364_s13 = sadd.s32 %s1997_s9, %s2276_s16 }
  0x13   : > { %480 = vmatpush.bf16.msra.mxu0 %v1753_v4  ;;  %s1315_s19 = sshll.u32 %s355_s14, 2  ;;  %v1759_v13 = vld [vmem:[%s2257_s3 + $0xa0] sm:$0xff]  ;;  %v1758_v17 = vld [vmem:[%s2257_s3 + $0x98] sm:$0xff]  ;;  %v1757_v23 = vld [vmem:[%s2257_s3 + $0x90] sm:$0xff]  ;;  %s374_s12 = sadd.s32 %s1997_s9, %s2278_s20 }
  0x14   : > { %621 = vmatpush.bf16.msra.mxu2 %v1761_v5  ;;  %v1767_v14 = vld [vmem:[%s2257_s3 + $0xe0] sm:$0xff]  ;;  %s357_s15 = scalar_lea.vmem %s2254_s0, %s1315_s19  ;;  %v1766_v18 = vld [vmem:[%s2257_s3 + $0xd8] sm:$0xff]  ;;  %v1765_v25 = vld [vmem:[%s2257_s3 + $0xd0] sm:$0xff]  ;;  %s1316_s19 = sshll.u32 %s364_s13, 2 }
  0x15   : > { %701 = vmatpush.bf16.msra.mxu3 %v1769_v6  ;;  %v1743_v15 = vld [vmem:[%s2257_s3 + $0x20] sm:$0xff]  ;;  %v1742_v19 = vld [vmem:[%s2257_s3 + $0x18] sm:$0xff]  ;;  %v1741_v26 = vld [vmem:[%s2257_s3 + $0x10] sm:$0xff]  ;;  %s366_s23 = scalar_lea.vmem %s2255_s1, %s1316_s19  ;;  %s1317_s13 = sshll.u32 %s374_s12, 2 }
  0x16   : > { %541 = vmatpush.bf16.msra.mxu1 %v1745_v7  ;;  %v2040_v20 = vld [vmem:[%s357_s15] sm:$0x7]  ;;  %v1748_v27 = vld [vmem:[%s2257_s3 + $0x48] sm:$0xff]  ;;  %v1778_v36 = vld [vmem:[%s2257_s3 + $0x138] sm:$0xff]  ;;  %s376_s15 = scalar_lea.vmem %s2256_s2, %s1317_s13  ;;  %s383_s16 = sadd.s32 %s1318_s21, %s2280_s24 }
  0x17   : > { %481 = vmatpush.bf16.msra.mxu0 %v1752_v8  ;;  %v421_v21 = vunpack.c.l.b16 %v2040_v20  ;;  %v1756_v28 = vld [vmem:[%s2257_s3 + $0x88] sm:$0xff]  ;;  %v1747_v32 = vld [vmem:[%s2257_s3 + $0x40] sm:$0xff]  ;;  %v1794_v37 = vld [vmem:[%s2257_s3 + $0x1b8] sm:$0xff]  ;;  %s1319_s9 = sshll.u32 %s383_s16, 1 }
  0x18   : > { %622 = vmatpush.bf16.msra.mxu2 %v1760_v9  ;;  %v1764_v30 = vld [vmem:[%s2257_s3 + $0xc8] sm:$0xff]  ;;  %v1755_v33 = vld [vmem:[%s2257_s3 + $0x80] sm:$0xff]  ;;  %v1802_v40 = vld [vmem:[%s2257_s3 + $0x1f8] sm:$0xff]  ;;  %s385_s22 = scalar_lea.vmem %s2261_s7, %s1319_s9 }
  0x19   : > { %702 = vmatpush.bf16.msra.mxu3 %v1768_v10  ;;  %v422_v24 = vpack.c.b16 %v421_v21, %v421_v21  ;;  %v1740_v31 = vld [vmem:[%s2257_s3 + $0x8] sm:$0xff]  ;;  %v1763_v38 = vld [vmem:[%s2257_s3 + $0xc0] sm:$0xff]  ;;  %v1786_v41 = vld [vmem:[%s2257_s3 + $0x178] sm:$0xff] }
  0x1a   : > { %542 = vmatpush.bf16.msra.mxu1 %v1744_v11  ;;  %v1739_v39 = vld [vmem:[%s2257_s3] sm:$0xff]  ;;  %v1777_v44 = vld [vmem:[%s2257_s3 + $0x130] sm:$0xff]  ;;  %v1776_v49 = vld [vmem:[%s2257_s3 + $0x128] sm:$0xff] }
  0x1b   : > { %482 = vmatpush.bf16.msra.mxu0 %v1751_v12  ;;  %v426_v29 = vshll.u32 %v422_v24, 16  ;;  %v424_v34 = vshrl.u32 %v422_v24, 16  ;;  %v570_v42 = vrot.slane %v422_v24, 1  ;;  %v1793_v45 = vld [vmem:[%s2257_s3 + $0x1b0] sm:$0xff]  ;;  %v634_v48 = vld [vmem:[%s366_s23] sm:$0x7] }
  0x1c   : > { %623 = vmatpush.bf16.msra.mxu2 %v1759_v13  ;;  %v1801_v46 = vld [vmem:[%s2257_s3 + $0x1f0] sm:$0xff]  ;;  %v1792_v50 = vld [vmem:[%s2257_s3 + $0x1a8] sm:$0xff]  ;;  %v1775_v53 = vld [vmem:[%s2257_s3 + $0x120] sm:$0xff]  ;;  %v732_v58 = vunpack.c.l.b16 %v634_v48 }
  0x1d   : > { %703 = vmatpush.bf16.msra.mxu3 %v1767_v14  ;;  %v428_v35 = vrot.slane %v426_v29, 1  ;;  %v1785_v47 = vld [vmem:[%s2257_s3 + $0x170] sm:$0xff]  ;;  %v1800_v51 = vld [vmem:[%s2257_s3 + $0x1e8] sm:$0xff]  ;;  %v1791_v54 = vld [vmem:[%s2257_s3 + $0x1a0] sm:$0xff] }
  0x1e   : > { %543 = vmatpush.bf16.msra.mxu1 %v1743_v15  ;;  %v1784_v52 = vld [vmem:[%s2257_s3 + $0x168] sm:$0xff]  ;;  %v1799_v55 = vld [vmem:[%s2257_s3 + $0x1e0] sm:$0xff]  ;;  %v1774_v59 = vld [vmem:[%s2257_s3 + $0x118] sm:$0xff]  ;;  %v733_v0 = vpack.c.b16 %v732_v58, %v732_v58 }
  0x1f   : > { %483 = vmatpush.bf16.msra.mxu0 %v1750_v16  ;;  %v429_v43 = vor.u32 %v428_v35, %v424_v34  ;;  %v1783_v56 = vld [vmem:[%s2257_s3 + $0x160] sm:$0xff]  ;;  %v1790_v60 = vld [vmem:[%s2257_s3 + $0x198] sm:$0xff]  ;;  %v1773_v1 = vld [vmem:[%s2257_s3 + $0x110] sm:$0xff] }
  0x20   : > { %624 = vmatpush.bf16.msra.mxu2 %v1758_v17  ;;  %v885_v57 = vld [vmem:[%s376_s15] sm:$0x7]  ;;  %v1798_v62 = vld [vmem:[%s2257_s3 + $0x1d8] sm:$0xff]  ;;  %v1789_v2 = vld [vmem:[%s2257_s3 + $0x190] sm:$0xff]  ;;  %v737_v6 = vshll.u32 %v733_v0, 16  ;;  %v735_v12 = vshrl.u32 %v733_v0, 16 }
  0x21   : > { %704 = vmatpush.bf16.msra.mxu3 %v1766_v18  ;;  %v983_v61 = vunpack.c.l.b16 %v885_v57  ;;  %v1782_v63 = vld [vmem:[%s2257_s3 + $0x158] sm:$0xff]  ;;  %v1797_v4 = vld [vmem:[%s2257_s3 + $0x1d0] sm:$0xff]  ;;  %v1772_v7 = vld [vmem:[%s2257_s3 + $0x108] sm:$0xff]  ;;  %v821_v24 = vrot.slane %v733_v0, 1 }
  0x22   : > { %544 = vmatpush.bf16.msra.mxu1 %v1742_v19  ;;  %v1781_v5 = vld [vmem:[%s2257_s3 + $0x150] sm:$0xff]  ;;  %v1788_v8 = vld [vmem:[%s2257_s3 + $0x188] sm:$0xff]  ;;  %v739_v13 = vrot.slane %v737_v6, 1  ;;  %v1771_v14 = vld [vmem:[%s2257_s3 + $0x100] sm:$0xff] }
  0x23   : > { %484 = vmatpush.bf16.msra.mxu0 %v1749_v22  ;;  %v984_v3 = vpack.c.b16 %v983_v61, %v983_v61  ;;  %v1796_v10 = vld [vmem:[%s2257_s3 + $0x1c8] sm:$0xff]  ;;  %v1787_v15 = vld [vmem:[%s2257_s3 + $0x180] sm:$0xff]  ;;  %v1810_v16 = vld [vmem:[%s2257_s3 + $0x238] sm:$0xff] }
  0x24   : > { %625 = vmatpush.bf16.msra.mxu2 %v1757_v23  ;;  %v1780_v11 = vld [vmem:[%s2257_s3 + $0x148] sm:$0xff]  ;;  %v1795_v19 = vld [vmem:[%s2257_s3 + $0x1c0] sm:$0xff]  ;;  %v740_v21 = vor.u32 %v739_v13, %v735_v12  ;;  %v1809_v22 = vld [vmem:[%s2257_s3 + $0x230] sm:$0xff] }
  0x25   : > { %705 = vmatpush.bf16.msra.mxu3 %v1765_v25  ;;  %v988_v9 = vshll.u32 %v984_v3, 16  ;;  %v986_v17 = vshrl.u32 %v984_v3, 16  ;;  %v1808_v25 = vld [vmem:[%s2257_s3 + $0x228] sm:$0xff]  ;;  %v1145_v34 = vld [vmem:[%s2259_s5 + $0x18] sm:$0xff] }
  0x26   : > { %545 = vmatpush.bf16.msra.mxu1 %v1741_v26  ;;  %v1807_v26 = vld [vmem:[%s2257_s3 + $0x220] sm:$0xff]  ;;  %v1804_v29 = vld [vmem:[%s2257_s3 + $0x208] sm:$0xff] }
  0x27   : > { %485 = vmatpush.bf16.msra.mxu0 %v1748_v27  ;;  %v990_v18 = vrot.slane %v988_v9, 1  ;;  %v1806_v27 = vld [vmem:[%s2257_s3 + $0x218] sm:$0xff] }
  0x28   : > { %626 = vmatpush.bf16.msra.mxu2 %v1756_v28  ;;  %v1805_v28 = vld [vmem:[%s2257_s3 + $0x210] sm:$0xff] }
  0x29   : > { %706 = vmatpush.bf16.msra.mxu3 %v1764_v30  ;;  %v991_v23 = vor.u32 %v990_v18, %v986_v17  ;;  %v1803_v30 = vld [vmem:[%s2257_s3 + $0x200] sm:$0xff] }
  0x2a   : > { %546 = vmatpush.bf16.msra.mxu1 %v1740_v31  ;;  %v1072_v31 = vrot.slane %v984_v3, 1 }
  0x2b   : > { %486 = vmatpush.bf16.msra.mxu0 %v1747_v32 }
  0x2c   : > { %627 = vmatpush.bf16.msra.mxu2 %v1755_v33 }
  0x2d   : > { %707 = vmatpush.bf16.msra.mxu3 %v1763_v38 }
  0x2e   : > { %547 = vmatpush.bf16.msra.mxu1 %v1739_v39  ;;  %487 = vmatmul.bf16.vlgmr.msra.gmra.mxu0 %v429_v43 }
  0x2f   : > { %790 = vmatpush.bf16.msrb.mxu0 %v1778_v36  ;;  %628 = vmatmul.bf16.vlgmr.msra.gmra.mxu2 %v570_v42  ;;  %v1144_v36 = vld [vmem:[%s2259_s5 + $0x10] sm:$0xff] }
  0x30   : > { %951 = vmatpush.bf16.msrb.mxu2 %v1794_v37  ;;  %708 = vmatmul.bf16.vlgmr.msra.gmra.mxu3 %v634_v48 }
  0x31   : > { %1041 = vmatpush.bf16.msrb.mxu3 %v1802_v40  ;;  %548 = vmatmul.bf16.vlgmr.msra.gmra.mxu1 %v2040_v20  ;;  %v1779_v20 = vld [vmem:[%s2257_s3 + $0x140] sm:$0xff]  ;;  %v1143_v40 = vld [vmem:[%s2259_s5 + $0x8] sm:$0xff] }
  0x32   : > { %871 = vmatpush.bf16.msrb.mxu1 %v1786_v41 }
  0x33   : > { %791 = vmatpush.bf16.msrb.mxu0 %v1777_v44  ;;  %v1142_v44 = vld [vmem:[%s2259_s5] sm:$0xff] }
  0x34   : > { %952 = vmatpush.bf16.msrb.mxu2 %v1793_v45 }
  0x35   : > { %1042 = vmatpush.bf16.msrb.mxu3 %v1801_v46 }
  0x36   : > { %872 = vmatpush.bf16.msrb.mxu1 %v1785_v47 }
  0x37   : > { %792 = vmatpush.bf16.msrb.mxu0 %v1776_v49 }
  0x38   : > { %953 = vmatpush.bf16.msrb.mxu2 %v1792_v50 }
  0x39   : > { %1043 = vmatpush.bf16.msrb.mxu3 %v1800_v51 }
  0x3a   : > { %873 = vmatpush.bf16.msrb.mxu1 %v1784_v52 }
  0x3b   : > { %793 = vmatpush.bf16.msrb.mxu0 %v1775_v53 }
  0x3c   : > { %954 = vmatpush.bf16.msrb.mxu2 %v1791_v54 }
  0x3d   : > { %1044 = vmatpush.bf16.msrb.mxu3 %v1799_v55 }
  0x3e   : > { %874 = vmatpush.bf16.msrb.mxu1 %v1783_v56 }
  0x3f   : > { %794 = vmatpush.bf16.msrb.mxu0 %v1774_v59  ;;  %v1852_v59 = vld [vmem:[%s2258_s4] ss:$0 sm:$0xff] }
  0x40   : > { %955 = vmatpush.bf16.msrb.mxu2 %v1790_v60 }
  0x41   : > { %1045 = vmatpush.bf16.msrb.mxu3 %v1798_v62 }
  0x42   : > { %875 = vmatpush.bf16.msrb.mxu1 %v1782_v63 }
  0x43   : > { %795 = vmatpush.bf16.msrb.mxu0 %v1773_v1  ;;  %v1853_v1 = vld [vmem:[%s2260_s6] ss:$0 sm:$0xff] }
  0x44   : > { %956 = vmatpush.bf16.msrb.mxu2 %v1789_v2 }
  0x45   : > { %1046 = vmatpush.bf16.msrb.mxu3 %v1797_v4 }
  0x46   : > { %876 = vmatpush.bf16.msrb.mxu1 %v1781_v5 }
  0x47   : > { %796 = vmatpush.bf16.msrb.mxu0 %v1772_v7 }
  0x48   : > { %957 = vmatpush.bf16.msrb.mxu2 %v1788_v8 }
  0x49   : > { %1047 = vmatpush.bf16.msrb.mxu3 %v1796_v10 }
  0x4a   : > { %877 = vmatpush.bf16.msrb.mxu1 %v1780_v11 }
  0x4b   : > { %797 = vmatpush.bf16.msrb.mxu0 %v1771_v14 }
  0x4c   : > { %958 = vmatpush.bf16.msrb.mxu2 %v1787_v15 }
  0x4d   : > { %1048 = vmatpush.bf16.msrb.mxu3 %v1795_v19 }
  0x4e   : > { %878 = vmatpush.bf16.msrb.mxu1 %v1779_v20  ;;  %798 = vmatmul.bf16.vlgmr.msrb.gmra.mxu0 %v740_v21 }
  0x4f   : > { %1122 = vmatpush.bf16.msra.mxu0 %v1810_v16  ;;  %959 = vmatmul.bf16.vlgmr.msrb.gmra.mxu2 %v885_v57 }
  0x50   : > { %1049 = vmatmul.bf16.vlgmr.msrb.gmra.mxu3 %v991_v23 }
  0x51   : > { %879 = vmatmul.bf16.vlgmr.msrb.gmra.mxu1 %v821_v24 }
  0x52   : > { %1166 = vmatpush.msra.mxu1 %v1145_v34 }
  0x53   : > { %1123 = vmatpush.bf16.msra.mxu0 %v1809_v22 }
  0x54   : > { %1167 = vmatpush.msra.mxu1 %v1144_v36 }
  0x56   : > { %1168 = vmatpush.msra.mxu1 %v1143_v40 }
  0x57   : > { %1124 = vmatpush.bf16.msra.mxu0 %v1808_v25 }
  0x58   : > { %1169 = vmatpush.msra.mxu1 %v1142_v44 }
  0x5b   : > { %1125 = vmatpush.bf16.msra.mxu0 %v1807_v26 }
  0x5f   : > { %1126 = vmatpush.bf16.msra.mxu0 %v1806_v27 }
  0x63   : > { %1127 = vmatpush.bf16.msra.mxu0 %v1805_v28 }
  0x67   : > { %1128 = vmatpush.bf16.msra.mxu0 %v1804_v29 }
  0x6b   : > { %1129 = vmatpush.bf16.msra.mxu0 %v1803_v30 }
  0x6e   : > { %1130 = vmatmul.bf16.vlgmr.msra.gmra.mxu0 %v1072_v31 }
  0xab   : > { %v488_v32 = vpop.f32.mrf.mxu0 }
  0xae   : > { %v549_v33 = vpop.f32.mrf.mxu1 }
  0xaf   : > { %v550_v46 = vadd.f32 %v549_v33, %v488_v32 }
  0xb2   : > { %v629_v35 = vpop.f32.mrf.mxu2 }
  0xb3   : > { %v709_v37 = vpop.f32.mrf.mxu3  ;;  %v490_v38 = vpop.f32.mrf.mxu0  ;;  %v633_v48 = vadd.f32 %v629_v35, %v550_v46 }
  0xb5   : > { %v713_v52 = vadd.f32 %v709_v37, %v633_v48 }
  0xb6   : > { %v551_v39 = vpop.f32.mrf.mxu1 }
  0xba   : > { %v631_v41 = vpop.f32.mrf.mxu2 }
  0xbb   : > { %v711_v42 = vpop.f32.mrf.mxu3 }
  0xcb   : > { %v799_v43 = vpop.f32.mrf.mxu0 }
  0xcc   : > { %v803_v54 = vadd.f32 %v799_v43, %v713_v52 }
  0xce   : > { %v880_v45 = vpop.f32.mrf.mxu1 }
  0xcf   : > { %v884_v56 = vadd.f32 %v880_v45, %v803_v54 }
  0xd2   : > { %v960_v47 = vpop.f32.mrf.mxu2 }
  0xd3   : > { %v1050_v49 = vpop.f32.mrf.mxu3  ;;  %v801_v50 = vpop.f32.mrf.mxu0  ;;  %v964_v57 = vadd.f32 %v960_v47, %v884_v56 }
  0xd5   : > { %v1054_v58 = vadd.f32 %v1050_v49, %v964_v57 }
  0xd6   : > { %v882_v51 = vpop.f32.mrf.mxu1 }
  0xda   : > { %v962_v53 = vpop.f32.mrf.mxu2 }
  0xdb   : > { %v1052_v55 = vpop.f32.mrf.mxu3 }
  0xeb   : > { %v1131_v60 = vpop.f32.mrf.mxu0 }
  0xec   : > { %v1135_v61 = vadd.f32 %v1131_v60, %v1054_v58 }
  0xee   : > { %v1140_v62 = vadd.f32 %v1852_v59, %v1135_v61 }
  0xf0   : > { %v1141_v63 = vmul.f32 %v1140_v62, %v1140_v62 }
  0xf2   : > { %1736 = vmatmul.msk.f32.vlgmr.msra.gmra.mxu1 %vm1150_vm0, %v1141_v63 }
  0xf3   : > { %v1133_v0 = vpop.f32.mrf.mxu0 }
 0x16f   : > { %v1171_v2 = vpop.f32.mrf.mxu1 }
 0x170   : > { %v1172_v3 = vadd.f32 %v1853_v1, %v1171_v2 }
 0x172   : > { %1854 = vrsqrt.f32 %v1172_v3  ;;  %vm1180_vm2 = vweird.f32 %v1172_v3 }
 0x178   : > { %v1855_v4 = vpop.eup %1854 }
 0x179   : > { %v1175_v5 = vmul.f32 %v1855_v4, %v1172_v3  ;;  %vm1181_vm1 = vweird.f32 %v1855_v4 }
 0x17a   : > { %vm1182_vm3 = vmor %vm1180_vm2, %vm1181_vm1 }
 0x17b   : > { %v1176_v6 = vmul.f32 %v1855_v4, %v1175_v5 }
 0x17d   : > { %v1177_v7 = vmul.f32 0.5, %v1176_v6 }
 0x17f   : > { %v1178_v8 = vsub.f32 1.5, %v1177_v7 }
 0x181   : > { %v1179_v9 = vmul.f32 %v1855_v4, %v1178_v8 }
 0x183   : > { %v1183_v10 = vsel %vm1182_vm3, %v1855_v4, %v1179_v9 }
 0x184   : > { %v1184_v11 = vmul.f32 %v1183_v10, %v1140_v62 }
 0x186   : > { %v1185_v12 = vpack.c.bf16 %v1184_v11, %v1184_v11 }
 0x188   : > { %1187 = vst.msk [vmem:[%s385_s22] sm:$0x3] %vm1186_vm4, %v1185_v12 }
 0x189 PF: > { %s17_s28 = sadd.s32 1, %s1894_s28   ;;  %s2263_s24 = smov %s1886_s26 }
 0x18a   : > { %p14_p10 = scmp.ge.s32.totalorder %s17_s28, 10   ;;  %s2264_s25 = smov %s1890_s27 }
 0x18b   : > { %s2265_s26 = smov %s2268_s29  ;;  %s2266_s27 = smov %s2272_s30 }
 0x18c   :  { %16 = sbr.rel (!%p14_p10) target bundleno = 3 (0x3), region = 92 }

// kernel: comp_decompressor_forward.12
= control target key start
LH: loop header
LB: loop body
LE: loop exit
PB: predicated region body
PF: predicated region fallthrough
CT: control target
= control target key end

     0   :  { %s1298_s24 = smov 0   ;;  %s1300_s25 = smov 0   ;;  %s1528_s0 = inlined_call_operand.vmem [shape: f32[2,4,4,48], index: 0, kind: input, shape index: {}, may-alias: {0,1,2}]   ;;  %s1529_s1 = inlined_call_operand.vmem [shape: f32[2,4,4,48], index: 1, kind: input, shape index: {}, may-alias: {0,1,2}]   ;;  %s1530_s2 = inlined_call_operand.vmem [shape: f32[2,4,4,48], index: 2, kind: input, shape index: {}, may-alias: {0,1,2}]   ;;  %s1531_s3 = inlined_call_operand.vmem [shape: bf16[9,48,128], index: 3, kind: input, shape index: {}]   ;;  %s1532_s4 = inlined_call_operand.vmem [shape: f32[1,128], index: 4, kind: input, shape index: {}]   ;;  %s1533_s5 = inlined_call_operand.vmem [shape: f32[128,128], index: 5, kind: input, shape index: {}]   ;;  %s1534_s6 = inlined_call_operand.vmem [shape: f32[1,128], index: 6, kind: input, shape index: {}]   ;;  %s1535_s7 = inlined_call_operand.vmem [shape: bf16[2,2,2,128], index: 7, kind: output, shape index: {}]  }
   0x1   :  { %s1302_s26 = smov 0   ;;  %s1304_s27 = smov 0  }
   0x2   :  { %s1306_s28 = smov 0  }
   0x3 LB: > { %s26_s29 = sadd.s32 1, %s1248_s26  ;;  %s29_s30 = sadd.s32 1, %s1252_s27  ;;  %s1256_s28 = sphi %s1306_s28, %s17_s28   ;;  %s1252_s27 = sphi %s1304_s27, %s1543_s27   ;;  %s1248_s26 = sphi %s1302_s26, %s1542_s26   ;;  %s1244_s25 = sphi %s1300_s25, %s1541_s25   ;;  %s1240_s24 = sphi %s1298_s24, %s1540_s24  }
   0x4   : > { %p27_p0 = scmp.ge.s32.totalorder %s26_s29, 2  ;;  %p972_p1 = scmp.ge.s32.totalorder %s1256_s28, 1 }
   0x5   : > { %p294_p2 = scmp.lt.s32.totalorder %s1256_s28, 5 }
   0x6   : > { %s1545_s29 = smov (%p27_p0, %s26_s29), 0  ;;  %s1547_s30 = smov (!%p27_p0, %s29_s30), %s1252_s27 }
   0x7   : > { %p295_p3 = pnand %p972_p1, %p294_p2  ;;  %p31_p4 = scmp.ge.s32.totalorder %s1547_s30, 2 }
   0x8   : > { %p349_p5 = scmp.lt.s32.totalorder (!%p295_p3), %s1244_s25, 1  ;;  %p351_p6 = scmp.lt.s32.totalorder (!%p295_p3), %s1240_s24, 3 }
   0x9   : > { %s1549_s30 = smov (%p31_p4, %s1547_s30), 0  ;;  %298 = sbr.rel (%p295_p3) target bundleno = 354 (0x162), region = 48 }
   0xa   : > { %1536 = sst [smem:[#allocation2_spill]] %s1549_s30  ;;  %s367_s14 = sadd.s32 (!%p295_p3), 2, %s1240_s24 }
   0xb   : > { %p1356_p7 = scmp.lt.s32.totalorder (!%p295_p3), %s367_s14, 3  ;;  %s357_s17 = sadd.s32 (!%p295_p3), 1, %s1240_s24 }
   0xc   : > { %p1388_p8 = scmp.lt.s32.totalorder (!%p295_p3), %s357_s17, 3  ;;  %p379_p9 = scmp.lt.s32.totalorder (!%p295_p3), %s1240_s24, 1 }
   0xe   : > { %v1149_v0 = vld [vmem:[%s1531_s3 + $0x10] sm:$0xff]  ;;  %v1152_v1 = vld [vmem:[%s1531_s3 + $0x28] sm:$0xff]  ;;  %v1158_v2 = vld [vmem:[%s1531_s3 + $0x58] sm:$0xff]  ;;  %s1551_s25 = smov (!%p349_p5, %s1244_s25), 1  ;;  %s1553_s14 = smov (!%p1356_p7, %s367_s14), 3  ;;  %vm425_vm0 = vcmask 392192  }
   0xf   : > { %467 = vmatpush.bf16.msra.mxu2 %v1149_v0  ;;  %434 = vmatpush.bf16.msra.mxu0 %v1152_v1  ;;  %v1148_v3 = vld [vmem:[%s1531_s3 + $0x8] sm:$0xff]  ;;  %v1151_v4 = vld [vmem:[%s1531_s3 + $0x20] sm:$0xff]  ;;  %s352_s19 = scalar_select %p351_p6, %s1240_s24, 3  ;;  %v1157_v5 = vld [vmem:[%s1531_s3 + $0x50] sm:$0xff] }
  0x10   : > { %554 = vmatpush.bf16.msra.mxu3 %v1158_v2  ;;  %s1354_s22 = sshll.u32 %s1551_s25, 2  ;;  %v1164_v6 = vld [vmem:[%s1531_s3 + $0x88] sm:$0xff]  ;;  %v1147_v7 = vld [vmem:[%s1531_s3] sm:$0xff]  ;;  %v1150_v8 = vld [vmem:[%s1531_s3 + $0x18] sm:$0xff]  ;;  %s1555_s17 = smov (!%p1388_p8, %s357_s17), 3 }
  0x11   : > { %s354_s8 = sadd.s32 %s1354_s22, %s352_s19  ;;  %v1155_v9 = vld [vmem:[%s1531_s3 + $0x40] sm:$0xff]  ;;  %v1156_v10 = vld [vmem:[%s1531_s3 + $0x48] sm:$0xff]  ;;  %646 = vmatpush.bf16.msra.mxu1 %v1164_v6  ;;  %v1161_v12 = vld [vmem:[%s1531_s3 + $0x70] sm:$0xff]  ;;  %s373_s23 = sadd.s32 %s1354_s22, %s1553_s14 }
  0x12   : > { %s974_s16 = sshll.u32 %s354_s8, 2  ;;  %v1170_v13 = vld [vmem:[%s1531_s3 + $0xb8] sm:$0xff]  ;;  %v1163_v15 = vld [vmem:[%s1531_s3 + $0x80] sm:$0xff]  ;;  %v1160_v19 = vld [vmem:[%s1531_s3 + $0x68] sm:$0xff]  ;;  %s363_s30 = sadd.s32 %s1354_s22, %s1555_s17 }
  0x13   : > { %468 = vmatpush.bf16.msra.mxu2 %v1148_v3  ;;  %435 = vmatpush.bf16.msra.mxu0 %v1151_v4  ;;  %s356_s19 = scalar_lea.vmem %s1528_s0, %s974_s16  ;;  %v1154_v18 = vld [vmem:[%s1531_s3 + $0x38] sm:$0xff]  ;;  %v1169_v20 = vld [vmem:[%s1531_s3 + $0xb0] sm:$0xff]  ;;  %s976_s20 = sshll.u32 %s363_s30, 2  ;;  %v1159_v25 = vld [vmem:[%s1531_s3 + $0x60] sm:$0xff] }
  0x14   : > { %555 = vmatpush.bf16.msra.mxu3 %v1157_v5  ;;  %v385_v11 = vld [vmem:[%s356_s19] sm:$0xf]  ;;  %s978_s19 = sshll.u32 %s373_s23, 2  ;;  %v1162_v22 = vld [vmem:[%s1531_s3 + $0x78] sm:$0xff]  ;;  %v1153_v24 = vld [vmem:[%s1531_s3 + $0x30] sm:$0xff]  ;;  %s365_s22 = scalar_lea.vmem %s1529_s1, %s976_s20 }
  0x15   : > { %v386_v14 = vpack.c.bf16 %v385_v11, %v385_v11  ;;  %647 = vmatpush.bf16.msra.mxu1 %v1163_v15  ;;  %s375_s16 = scalar_lea.vmem %s1530_s2, %s978_s19  ;;  %v1167_v26 = vld [vmem:[%s1531_s3 + $0xa0] sm:$0xff]  ;;  %v1173_v27 = vld [vmem:[%s1531_s3 + $0xd0] sm:$0xff]  ;;  %v1168_v30 = vld [vmem:[%s1531_s3 + $0xa8] sm:$0xff]  ;;  %s1557_s24 = smov (!%p379_p9, %s1240_s24), 1 }
  0x16   : > { %v655_v28 = vld [vmem:[%s375_s16] sm:$0xf]  ;;  %v1166_v32 = vld [vmem:[%s1531_s3 + $0x98] sm:$0xff]  ;;  %v1172_v36 = vld [vmem:[%s1531_s3 + $0xc8] sm:$0xff]  ;;  %s979_s19 = sshll.u32 %s1551_s25, 1 }
  0x17   : > { %469 = vmatpush.bf16.msra.mxu2 %v1147_v7  ;;  %436 = vmatpush.bf16.msra.mxu0 %v1150_v8  ;;  %v401_v16 = vshrl.u32 %v386_v14, 16  ;;  %v403_v17 = vshll.u32 %v386_v14, 16  ;;  %v519_v29 = vld [vmem:[%s365_s22] sm:$0xf]  ;;  %v656_v33 = vpack.c.bf16 %v655_v28, %v655_v28  ;;  %v1165_v37 = vld [vmem:[%s1531_s3 + $0x90] sm:$0xff]  ;;  %v483_v38 = vrot.slane %v386_v14, 1  ;;  %s382_s8 = sadd.s32 %s979_s19, %s1557_s24 }
  0x18   : > { %556 = vmatpush.bf16.msra.mxu3 %v1156_v10  ;;  %v520_v31 = vpack.c.bf16 %v519_v29, %v519_v29  ;;  %v1171_v42 = vld [vmem:[%s1531_s3 + $0xc0] sm:$0xff]  ;;  %v812_v48 = vld [vmem:[%s1533_s5 + $0x78] sm:$0xff]  ;;  %v811_v49 = vld [vmem:[%s1533_s5 + $0x70] sm:$0xff]  ;;  %s383_s14 = scalar_lea.vmem %s1535_s7, %s382_s8 }
  0x19   : > { %v405_v21 = vrot.slane %v403_v17, 1  ;;  %648 = vmatpush.bf16.msra.mxu1 %v1162_v22  ;;  %v708_v41 = vshll.u32 %v656_v33, 16  ;;  %v706_v44 = vshrl.u32 %v656_v33, 16  ;;  %v755_v47 = vrot.slane %v656_v33, 1  ;;  %v810_v50 = vld [vmem:[%s1533_s5 + $0x68] sm:$0xff]  ;;  %v809_v51 = vld [vmem:[%s1533_s5 + $0x60] sm:$0xff] }
  0x1a   : > { %1011 = vmatmul.msk.bf16.vlgmr.msra.gmra.mxu2 %vm425_vm0, %v386_v14  ;;  %v572_v34 = vshll.u32 %v520_v31, 16  ;;  %v619_v35 = vrot.slane %v520_v31, 1  ;;  %v570_v39 = vshrl.u32 %v520_v31, 16  ;;  %v808_v52 = vld [vmem:[%s1533_s5 + $0x58] sm:$0xff]  ;;  %v807_v53 = vld [vmem:[%s1533_s5 + $0x50] sm:$0xff]  ;;  %v806_v54 = vld [vmem:[%s1533_s5 + $0x48] sm:$0xff] }
  0x1b   : > { %510 = vmatpush.bf16.msrb.mxu2 %v1155_v9  ;;  %602 = vmatpush.bf16.msrb.mxu0 %v1161_v12  ;;  %v406_v23 = vor.u32 %v405_v21, %v401_v16  ;;  %v710_v45 = vrot.slane %v708_v41, 1  ;;  %v805_v55 = vld [vmem:[%s1533_s5 + $0x40] sm:$0xff]  ;;  %v804_v56 = vld [vmem:[%s1533_s5 + $0x38] sm:$0xff]  ;;  %v803_v57 = vld [vmem:[%s1533_s5 + $0x30] sm:$0xff] }
  0x1c   : > { %738 = vmatpush.bf16.msrb.mxu3 %v1170_v13  ;;  %1087 = vmatmul.msk.bf16.vlgmr.msra.gmra.mxu1 %vm425_vm0, %v619_v35  ;;  %v574_v40 = vrot.slane %v572_v34, 1  ;;  %v802_v59 = vld [vmem:[%s1533_s5 + $0x28] sm:$0xff]  ;;  %v801_v61 = vld [vmem:[%s1533_s5 + $0x20] sm:$0xff]  ;;  %v800_v62 = vld [vmem:[%s1533_s5 + $0x18] sm:$0xff] }
  0x1d   : > { %998 = vmatmul.msk.bf16.vlgmr.msra.gmra.mxu0 %vm425_vm0, %v406_v23  ;;  %1049 = vmatmul.msk.bf16.vlgmr.msra.gmra.mxu3 %vm425_vm0, %v520_v31  ;;  %v711_v46 = vor.u32 %v710_v45, %v706_v44  ;;  %v799_v0 = vld [vmem:[%s1533_s5 + $0x10] sm:$0xff]  ;;  %v798_v2 = vld [vmem:[%s1533_s5 + $0x8] sm:$0xff]  ;;  %v797_v5 = vld [vmem:[%s1533_s5] sm:$0xff] }
  0x1e   : > { %v575_v43 = vor.u32 %v574_v40, %v570_v39  ;;  %817 = vmatpush.msrb.mxu1 %v812_v48  ;;  %v1214_v23 = vld [vmem:[%s1532_s4] ss:$0 sm:$0xff] }
  0x1f   : > { %511 = vmatpush.bf16.msrb.mxu2 %v1154_v18  ;;  %603 = vmatpush.bf16.msrb.mxu0 %v1160_v19  ;;  %v1215_v29 = vld [vmem:[%s1534_s6] ss:$0 sm:$0xff] }
  0x20   : > { %739 = vmatpush.bf16.msrb.mxu3 %v1169_v20  ;;  %818 = vmatpush.msrb.mxu1 %v811_v49 }
  0x22   : > { %819 = vmatpush.msrb.mxu1 %v810_v50 }
  0x23   : > { %512 = vmatpush.bf16.msrb.mxu2 %v1153_v24  ;;  %604 = vmatpush.bf16.msrb.mxu0 %v1159_v25 }
  0x24   : > { %740 = vmatpush.bf16.msrb.mxu3 %v1168_v30  ;;  %820 = vmatpush.msrb.mxu1 %v809_v51 }
  0x26   : > { %821 = vmatpush.msrb.mxu1 %v808_v52 }
  0x27   : > { %690 = vmatpush.bf16.msra.mxu2 %v1167_v26  ;;  %782 = vmatpush.bf16.msra.mxu0 %v1173_v27 }
  0x28   : > { %822 = vmatpush.msrb.mxu1 %v807_v53 }
  0x2a   : > { %1030 = vmatmul.msk.bf16.vlgmr.msrb.gmra.mxu2 %vm425_vm0, %v483_v38  ;;  %823 = vmatpush.msrb.mxu1 %v806_v54 }
  0x2b   : > { %691 = vmatpush.bf16.msra.mxu2 %v1166_v32  ;;  %783 = vmatpush.bf16.msra.mxu0 %v1172_v36 }
  0x2c   : > { %824 = vmatpush.msrb.mxu1 %v805_v55 }
  0x2d   : > { %1068 = vmatmul.msk.bf16.vlgmr.msrb.gmra.mxu0 %vm425_vm0, %v575_v43  ;;  %1125 = vmatmul.msk.bf16.vlgmr.msrb.gmra.mxu3 %vm425_vm0, %v711_v46 }
  0x2e   : > { %825 = vmatpush.msrb.mxu1 %v804_v56 }
  0x2f   : > { %692 = vmatpush.bf16.msra.mxu2 %v1165_v37  ;;  %784 = vmatpush.bf16.msra.mxu0 %v1171_v42 }
  0x30   : > { %826 = vmatpush.msrb.mxu1 %v803_v57 }
  0x32   : > { %827 = vmatpush.msrb.mxu1 %v802_v59 }
  0x34   : > { %828 = vmatpush.msrb.mxu1 %v801_v61 }
  0x36   : > { %829 = vmatpush.msrb.mxu1 %v800_v62 }
  0x38   : > { %830 = vmatpush.msrb.mxu1 %v799_v0 }
  0x3a   : > { %1106 = vmatmul.msk.bf16.vlgmr.msra.gmra.mxu2 %vm425_vm0, %v656_v33  ;;  %831 = vmatpush.msrb.mxu1 %v798_v2 }
  0x3c   : > { %832 = vmatpush.msrb.mxu1 %v797_v5 }
  0x3d   : > { %1144 = vmatmul.msk.bf16.vlgmr.msra.gmra.mxu0 %vm425_vm0, %v755_v47 }
  0x99   : > { %v650_v63 = vpop.f32.mrf.mxu1 }
  0x9a   : > { %v438_v58 = vpop.f32.mrf.mxu0 }
  0x9d   : > { %v471_v60 = vpop.f32.mrf.mxu2 }
  0x9e   : > { %v472_v10 = vadd.f32 %v471_v60, %v438_v58 }
  0xa0   : > { %v558_v4 = vpop.f32.mrf.mxu3 }
  0xa1   : > { %v652_v6 = vpop.f32.mrf.mxu1 }
  0xa2   : > { %v440_v1 = vpop.f32.mrf.mxu0 }
  0xa5   : > { %v473_v3 = vpop.f32.mrf.mxu2 }
  0xa8   : > { %v560_v9 = vpop.f32.mrf.mxu3 }
  0xaa   : > { %v606_v7 = vpop.f32.mrf.mxu0 }
  0xad   : > { %v514_v8 = vpop.f32.mrf.mxu2 }
  0xae   : > { %v518_v11 = vadd.f32 %v514_v8, %v472_v10 }
  0xb0   : > { %v562_v13 = vadd.f32 %v558_v4, %v518_v11  ;;  %v742_v15 = vpop.f32.mrf.mxu3 }
  0xb2   : > { %v608_v12 = vpop.f32.mrf.mxu0  ;;  %v610_v16 = vadd.f32 %v606_v7, %v562_v13 }
  0xb4   : > { %v654_v18 = vadd.f32 %v650_v63, %v610_v16 }
  0xb5   : > { %v516_v14 = vpop.f32.mrf.mxu2 }
  0xb8   : > { %v744_v20 = vpop.f32.mrf.mxu3 }
  0xba   : > { %v786_v17 = vpop.f32.mrf.mxu0 }
  0xbd   : > { %v694_v19 = vpop.f32.mrf.mxu2 }
  0xbe   : > { %v698_v21 = vadd.f32 %v694_v19, %v654_v18 }
  0xc0   : > { %v746_v22 = vadd.f32 %v742_v15, %v698_v21 }
  0xc2   : > { %v790_v24 = vadd.f32 %v786_v17, %v746_v22  ;;  %v788_v25 = vpop.f32.mrf.mxu0 }
  0xc4   : > { %v795_v26 = vadd.f32 %v1214_v23, %v790_v24 }
  0xc5   : > { %v696_v27 = vpop.f32.mrf.mxu2 }
  0xc6   : > { %v796_v28 = vmul.f32 %v795_v26, %v795_v26 }
  0xc8   : > { %833 = vmatmul.f32.vlgmr.msrb.gmra.mxu1 %v796_v28 }
 0x145   : > { %v834_v30 = vpop.f32.mrf.mxu1 }
 0x146   : > { %v835_v31 = vadd.f32 %v1215_v29, %v834_v30 }
 0x148   : > { %1216 = vrsqrt.f32 %v835_v31  ;;  %vm844_vm1 = vcmp.eq.f32.partialorder %v835_v31, inf  ;;  %v847_v39 = vand.u32 2147483648, %v835_v31  ;;  %vm846_vm2 = vcmp.eq.f32.partialorder %v835_v31, 0.0 }
 0x14e   : > { %v1217_v32 = vpop.eup %1216 }
 0x14f   : > { %v838_v33 = vmul.f32 %v1217_v32, %v835_v31 }
 0x151   : > { %v839_v34 = vmul.f32 %v1217_v32, %v838_v33 }
 0x153   : > { %v840_v35 = vmul.f32 0.5, %v839_v34 }
 0x155   : > { %v841_v36 = vsub.f32 1.5, %v840_v35 }
 0x157   : > { %v842_v37 = vmul.f32 %v1217_v32, %v841_v36 }
 0x159   : > { %v843_v38 = vmul.f32 %v842_v37, %v835_v31 }
 0x15b   : > { %v845_v40 = vsel %vm844_vm1, %v835_v31, %v843_v38 }
 0x15c   : > { %v848_v41 = vsel %vm846_vm2, %v847_v39, %v845_v40 }
 0x15d   : > { %v849_v42 = vmul.f32 %v848_v41, %v795_v26 }
 0x15f   : > { %v850_v43 = vpack.c.bf16 %v849_v42, %v849_v42 }
 0x161   : > { %851 = vst [vmem:[%s383_s14] sm:$0x1] %v850_v43 }
 0x162 PF: > { %s17_s28 = sadd.s32 1, %s1256_s28   ;;  %s1539_s11 = sld [smem:[#allocation2_spill]] }
 0x163   : > { %p14_p10 = scmp.ge.s32.totalorder %s17_s28, 6   ;;  %s1540_s24 = smov %s1248_s26 }
 0x164   : > { %s1541_s25 = smov %s1252_s27  ;;  %s1542_s26 = smov %s1545_s29 }
 0x165   :  { %16 = sbr.rel (!%p14_p10) target bundleno = 3 (0x3), region = 92 }
 0x168   : > { %s1543_s27 = smov %s1539_s11 }

// kernel: comp_decompressor_forward.11
= control target key start
LH: loop header
LB: loop body
LE: loop exit
PB: predicated region body
PF: predicated region fallthrough
CT: control target
= control target key end

     0   :  { %s1832_s18 = smov 0   ;;  %s1834_s19 = smov 0   ;;  %s2140_s0 = inlined_call_operand.vmem [shape: bf16[2,4,4,128], index: 0, kind: input, shape index: {}, may-alias: {0,1,2}]   ;;  %s2141_s1 = inlined_call_operand.vmem [shape: bf16[2,4,4,128], index: 1, kind: input, shape index: {}, may-alias: {0,1,2}]   ;;  %s2142_s2 = inlined_call_operand.vmem [shape: bf16[2,4,4,128], index: 2, kind: input, shape index: {}, may-alias: {0,1,2}]   ;;  %s2143_s3 = inlined_call_operand.vmem [shape: bf16[9,128,48], index: 3, kind: input, shape index: {}]   ;;  %s2144_s4 = inlined_call_operand.vmem [shape: f32[1,48], index: 4, kind: input, shape index: {}]   ;;  %s2145_s5 = inlined_call_operand.vmem [shape: f32[2,2,2,48], index: 5, kind: output, shape index: {}]  }
   0x1   :  { %s1836_s20 = smov 0   ;;  %s1838_s21 = smov 0  }
   0x2   :  { %s1840_s22 = smov 0  }
   0x3 LB: > { %s24_s23 = sadd.s32 1, %s1792_s20  ;;  %s27_s24 = sadd.s32 1, %s1796_s21  ;;  %s1800_s22 = sphi %s1840_s22, %s15_s22   ;;  %s1796_s21 = sphi %s1838_s21, %s2150_s21   ;;  %s1792_s20 = sphi %s1836_s20, %s2149_s20   ;;  %s1788_s19 = sphi %s1834_s19, %s2148_s19   ;;  %s1784_s18 = sphi %s1832_s18, %s2147_s18  }
   0x4   : > { %p25_p0 = scmp.ge.s32.totalorder %s24_s23, 2  ;;  %p1222_p1 = scmp.ge.s32.totalorder %s1800_s22, 1 }
   0x5   : > { %p244_p2 = scmp.lt.s32.totalorder %s1800_s22, 5 }
   0x6   : > { %s2152_s23 = smov (%p25_p0, %s24_s23), 0  ;;  %s2154_s24 = smov (!%p25_p0, %s27_s24), %s1796_s21 }
   0x7   : > { %p245_p3 = pnand %p1222_p1, %p244_p2  ;;  %p29_p4 = scmp.ge.s32.totalorder %s2154_s24, 2 }
   0x8   : > { %p296_p5 = scmp.lt.s32.totalorder (!%p245_p3), %s1788_s19, 1  ;;  %p298_p6 = scmp.lt.s32.totalorder (!%p245_p3), %s1784_s18, 3 }
   0x9   : > { %s2156_s24 = smov (%p29_p4, %s2154_s24), 0  ;;  %248 = sbr.rel (%p245_p3) target bundleno = 244 (0xf4), region = 40 }
   0xa   : > { %s304_s10 = sadd.s32 (!%p245_p3), 1, %s1784_s18  ;;  %s314_s15 = sadd.s32 (!%p245_p3), 2, %s1784_s18 }
   0xb   : > { %p307_p7 = scmp.lt.s32.totalorder (!%p245_p3), %s304_s10, 3  ;;  %p1989_p8 = scmp.lt.s32.totalorder (!%p245_p3), %s314_s15, 3 }
   0xc   : > { %p326_p9 = scmp.lt.s32.totalorder (!%p245_p3), %s1784_s18, 1 }
   0xe   : > { %v1664_v0 = vld [vmem:[%s2143_s3 + $0x78] sm:$0xff]  ;;  %v1663_v4 = vld [vmem:[%s2143_s3 + $0x70] sm:$0xff]  ;;  %s2158_s19 = smov (!%p296_p5, %s1788_s19), 1  ;;  %v1662_v8 = vld [vmem:[%s2143_s3 + $0x68] sm:$0xff]  ;;  %s2160_s10 = smov (!%p307_p7, %s304_s10), 3  ;;  %vm1094_vm0 = vcmask 386048  }
   0xf   : > { %v1672_v1 = vld [vmem:[%s2143_s3 + $0xb8] sm:$0xff]  ;;  %424 = vmatpush.bf16.msra.mxu0 %v1664_v0  ;;  %v1671_v5 = vld [vmem:[%s2143_s3 + $0xb0] sm:$0xff]  ;;  %s299_s16 = scalar_select %p298_p6, %s1784_s18, 3  ;;  %v1670_v9 = vld [vmem:[%s2143_s3 + $0xa8] sm:$0xff] }
  0x10   : > { %v1680_v2 = vld [vmem:[%s2143_s3 + $0xf8] sm:$0xff]  ;;  %568 = vmatpush.bf16.msra.mxu2 %v1672_v1  ;;  %v1679_v6 = vld [vmem:[%s2143_s3 + $0xf0] sm:$0xff]  ;;  %s1893_s17 = sshll.u32 %s2158_s19, 2  ;;  %v1678_v10 = vld [vmem:[%s2143_s3 + $0xe8] sm:$0xff]  ;;  %s2162_s15 = smov (!%p1989_p8, %s314_s15), 3 }
  0x11   : > { %v1656_v3 = vld [vmem:[%s2143_s3 + $0x38] sm:$0xff]  ;;  %648 = vmatpush.bf16.msra.mxu3 %v1680_v2  ;;  %v1655_v7 = vld [vmem:[%s2143_s3 + $0x30] sm:$0xff]  ;;  %s301_s29 = sadd.s32 %s1893_s17, %s299_s16  ;;  %v1654_v11 = vld [vmem:[%s2143_s3 + $0x28] sm:$0xff]  ;;  %s310_s30 = sadd.s32 %s1893_s17, %s2160_s10 }
  0x12   : > { %485 = vmatpush.bf16.msra.mxu1 %v1656_v3  ;;  %s1224_s9 = sshll.u32 %s301_s29, 1  ;;  %v1661_v12 = vld [vmem:[%s2143_s3 + $0x60] sm:$0xff]  ;;  %v1660_v16 = vld [vmem:[%s2143_s3 + $0x58] sm:$0xff]  ;;  %v1659_v21 = vld [vmem:[%s2143_s3 + $0x50] sm:$0xff]  ;;  %s1226_s10 = sshll.u32 %s310_s30, 1 }
  0x13   : > { %425 = vmatpush.bf16.msra.mxu0 %v1663_v4  ;;  %v1669_v13 = vld [vmem:[%s2143_s3 + $0xa0] sm:$0xff]  ;;  %s303_s29 = scalar_lea.vmem %s2140_s0, %s1224_s9  ;;  %v1668_v17 = vld [vmem:[%s2143_s3 + $0x98] sm:$0xff]  ;;  %v1667_v22 = vld [vmem:[%s2143_s3 + $0x90] sm:$0xff]  ;;  %s312_s30 = scalar_lea.vmem %s2141_s1, %s1226_s10 }
  0x14   : > { %569 = vmatpush.bf16.msra.mxu2 %v1671_v5  ;;  %v1677_v14 = vld [vmem:[%s2143_s3 + $0xe0] sm:$0xff]  ;;  %v1676_v18 = vld [vmem:[%s2143_s3 + $0xd8] sm:$0xff]  ;;  %v1675_v23 = vld [vmem:[%s2143_s3 + $0xd0] sm:$0xff]  ;;  %s320_s16 = sadd.s32 %s1893_s17, %s2162_s15  ;;  %s2164_s18 = smov (!%p326_p9, %s1784_s18), 1 }
  0x15   : > { %649 = vmatpush.bf16.msra.mxu3 %v1679_v6  ;;  %v1653_v15 = vld [vmem:[%s2143_s3 + $0x20] sm:$0xff]  ;;  %v1652_v19 = vld [vmem:[%s2143_s3 + $0x18] sm:$0xff]  ;;  %v1651_v24 = vld [vmem:[%s2143_s3 + $0x10] sm:$0xff]  ;;  %s1228_s17 = sshll.u32 %s320_s16, 1  ;;  %s1229_s8 = sshll.u32 %s2158_s19, 1 }
  0x16   : > { %486 = vmatpush.bf16.msra.mxu1 %v1655_v7  ;;  %v1936_v20 = vld [vmem:[%s303_s29] sm:$0x3]  ;;  %v1658_v25 = vld [vmem:[%s2143_s3 + $0x48] sm:$0xff]  ;;  %v1688_v35 = vld [vmem:[%s2143_s3 + $0x138] sm:$0xff]  ;;  %s322_s14 = scalar_lea.vmem %s2142_s2, %s1228_s17  ;;  %s329_s11 = sadd.s32 %s1229_s8, %s2164_s18 }
  0x17   : > { %426 = vmatpush.bf16.msra.mxu0 %v1662_v8  ;;  %367 = vst [vmem:[#allocation1] ss:$4 sm:$0xff] %v1936_v20  ;;  %v1666_v26 = vld [vmem:[%s2143_s3 + $0x88] sm:$0xff]  ;;  %v1657_v31 = vld [vmem:[%s2143_s3 + $0x40] sm:$0xff]  ;;  %v1704_v36 = vld [vmem:[%s2143_s3 + $0x1b8] sm:$0xff]  ;;  %s1230_s9 = sshll.u32 %s329_s11, 1 }
  0x18   : > { %570 = vmatpush.bf16.msra.mxu2 %v1670_v9  ;;  %v1674_v27 = vld [vmem:[%s2143_s3 + $0xc8] sm:$0xff]  ;;  %v1665_v32 = vld [vmem:[%s2143_s3 + $0x80] sm:$0xff]  ;;  %v1712_v39 = vld [vmem:[%s2143_s3 + $0x1f8] sm:$0xff]  ;;  %s331_s25 = scalar_lea.vmem %s2145_s5, %s1230_s9 }
  0x19   : > { %650 = vmatpush.bf16.msra.mxu3 %v1678_v10  ;;  %v1650_v28 = vld [vmem:[%s2143_s3 + $0x8] sm:$0xff]  ;;  %v1673_v37 = vld [vmem:[%s2143_s3 + $0xc0] sm:$0xff]  ;;  %v1696_v40 = vld [vmem:[%s2143_s3 + $0x178] sm:$0xff] }
  0x1a   : > { %487 = vmatpush.bf16.msra.mxu1 %v1654_v11  ;;  %v1649_v38 = vld [vmem:[%s2143_s3] sm:$0xff]  ;;  %v1687_v43 = vld [vmem:[%s2143_s3 + $0x130] sm:$0xff]  ;;  %v1686_v49 = vld [vmem:[%s2143_s3 + $0x128] sm:$0xff] }
  0x1b   : > { %427 = vmatpush.bf16.msra.mxu0 %v1661_v12  ;;  %v582_v41 = vld [vmem:[%s312_s30] sm:$0x3]  ;;  %v1703_v44 = vld [vmem:[%s2143_s3 + $0x1b0] sm:$0xff]  ;;  %v1702_v50 = vld [vmem:[%s2143_s3 + $0x1a8] sm:$0xff] }
  0x1c   : > { %571 = vmatpush.bf16.msra.mxu2 %v1669_v13  ;;  %v1711_v47 = vld [vmem:[%s2143_s3 + $0x1f0] sm:$0xff]  ;;  %v1710_v51 = vld [vmem:[%s2143_s3 + $0x1e8] sm:$0xff]  ;;  %v1685_v53 = vld [vmem:[%s2143_s3 + $0x120] sm:$0xff] }
  0x1d   : > { %651 = vmatpush.bf16.msra.mxu3 %v1677_v14  ;;  %v1695_v48 = vld [vmem:[%s2143_s3 + $0x170] sm:$0xff]  ;;  %v1694_v52 = vld [vmem:[%s2143_s3 + $0x168] sm:$0xff]  ;;  %v1701_v54 = vld [vmem:[%s2143_s3 + $0x1a0] sm:$0xff] }
  0x1e   : > { %488 = vmatpush.bf16.msra.mxu1 %v1653_v15  ;;  %v368_v29 = vld.sshfl [vmem:[#allocation1] sm:$0xff pattern:$0x73625140]  ;;  %v1684_v58 = vld [vmem:[%s2143_s3 + $0x118] sm:$0xff]  ;;  %v1683_v63 = vld [vmem:[%s2143_s3 + $0x110] sm:$0xff] }
  0x1f   : > { %428 = vmatpush.bf16.msra.mxu0 %v1660_v16  ;;  %515 = vst [vmem:[#allocation1] ss:$4 sm:$0xff] %v1936_v20  ;;  %v371_v30 = vshll.u32 %v368_v29, 16  ;;  %v369_v33 = vshrl.u32 %v368_v29, 16  ;;  %v1709_v56 = vld [vmem:[%s2143_s3 + $0x1e0] sm:$0xff]  ;;  %v1700_v59 = vld [vmem:[%s2143_s3 + $0x198] sm:$0xff] }
  0x20   : > { %572 = vmatpush.bf16.msra.mxu2 %v1668_v17  ;;  %v1693_v57 = vld [vmem:[%s2143_s3 + $0x160] sm:$0xff]  ;;  %v1708_v60 = vld [vmem:[%s2143_s3 + $0x1d8] sm:$0xff]  ;;  %v1699_v0 = vld [vmem:[%s2143_s3 + $0x190] sm:$0xff] }
  0x21   : > { %652 = vmatpush.bf16.msra.mxu3 %v1676_v18  ;;  %v373_v34 = vrot.slane %v371_v30, 1  ;;  %v1692_v61 = vld [vmem:[%s2143_s3 + $0x158] sm:$0xff]  ;;  %v835_v62 = vld [vmem:[%s322_s14] sm:$0x3]  ;;  %v1707_v2 = vld [vmem:[%s2143_s3 + $0x1d0] sm:$0xff] }
  0x22   : > { %489 = vmatpush.bf16.msra.mxu1 %v1652_v19  ;;  %v1691_v3 = vld [vmem:[%s2143_s3 + $0x150] sm:$0xff]  ;;  %v1682_v5 = vld [vmem:[%s2143_s3 + $0x108] sm:$0xff]  ;;  %v1681_v11 = vld [vmem:[%s2143_s3 + $0x100] sm:$0xff] }
  0x23   : > { %429 = vmatpush.bf16.msra.mxu0 %v1659_v21  ;;  %v374_v42 = vor.u32 %v373_v34, %v369_v33  ;;  %v1698_v6 = vld [vmem:[%s2143_s3 + $0x188] sm:$0xff]  ;;  %v1697_v12 = vld [vmem:[%s2143_s3 + $0x180] sm:$0xff]  ;;  %v1720_v14 = vld [vmem:[%s2143_s3 + $0x238] sm:$0xff] }
  0x24   : > { %573 = vmatpush.bf16.msra.mxu2 %v1667_v22  ;;  %v1706_v7 = vld [vmem:[%s2143_s3 + $0x1c8] sm:$0xff]  ;;  %v1705_v17 = vld [vmem:[%s2143_s3 + $0x1c0] sm:$0xff]  ;;  %v1719_v21 = vld [vmem:[%s2143_s3 + $0x230] sm:$0xff] }
  0x25   : > { %653 = vmatpush.bf16.msra.mxu3 %v1675_v23  ;;  %v1690_v8 = vld [vmem:[%s2143_s3 + $0x148] sm:$0xff]  ;;  %v1689_v18 = vld [vmem:[%s2143_s3 + $0x140] sm:$0xff] }
  0x26   : > { %490 = vmatpush.bf16.msra.mxu1 %v1651_v24  ;;  %v516_v45 = vld.sshfl [vmem:[#allocation1] sm:$0xff pattern:$0x73625140]  ;;  %v1718_v24 = vld [vmem:[%s2143_s3 + $0x228] sm:$0xff] }
  0x27   : > { %430 = vmatpush.bf16.msra.mxu0 %v1658_v25  ;;  %v518_v46 = vrot.slane %v516_v45, 1  ;;  %680 = vst [vmem:[#allocation1] ss:$4 sm:$0xff] %v582_v41  ;;  %v1717_v25 = vld [vmem:[%s2143_s3 + $0x220] sm:$0xff] }
  0x28   : > { %574 = vmatpush.bf16.msra.mxu2 %v1666_v26  ;;  %v1716_v26 = vld [vmem:[%s2143_s3 + $0x218] sm:$0xff]  ;;  %v1713_v29 = vld [vmem:[%s2143_s3 + $0x200] sm:$0xff] }
  0x29   : > { %654 = vmatpush.bf16.msra.mxu3 %v1674_v27  ;;  %v1715_v27 = vld [vmem:[%s2143_s3 + $0x210] sm:$0xff] }
  0x2a   : > { %491 = vmatpush.bf16.msra.mxu1 %v1650_v28  ;;  %v1714_v28 = vld [vmem:[%s2143_s3 + $0x208] sm:$0xff] }
  0x2b   : > { %431 = vmatpush.bf16.msra.mxu0 %v1657_v31 }
  0x2c   : > { %575 = vmatpush.bf16.msra.mxu2 %v1665_v32 }
  0x2d   : > { %655 = vmatpush.bf16.msra.mxu3 %v1673_v37 }
  0x2e   : > { %492 = vmatpush.bf16.msra.mxu1 %v1649_v38  ;;  %432 = vmatmul.bf16.vlgmr.msra.gmra.mxu0 %v374_v42  ;;  %v681_v55 = vld.sshfl [vmem:[#allocation1] sm:$0xff pattern:$0x73625140] }
  0x2f   : > { %737 = vmatpush.bf16.msrb.mxu0 %v1688_v35  ;;  %576 = vmatmul.bf16.vlgmr.msra.gmra.mxu2 %v518_v46  ;;  %768 = vst [vmem:[#allocation1] ss:$4 sm:$0xff] %v582_v41  ;;  %v684_v4 = vshll.u32 %v681_v55, 16  ;;  %v682_v9 = vshrl.u32 %v681_v55, 16  ;;  %v1761_v55 = vld [vmem:[%s2144_s4] ss:$0 sm:$0xff] }
  0x30   : > { %901 = vmatpush.bf16.msrb.mxu2 %v1704_v36  ;;  %656 = vmatmul.bf16.vlgmr.msra.gmra.mxu3 %v582_v41 }
  0x31   : > { %990 = vmatpush.bf16.msrb.mxu3 %v1712_v39  ;;  %493 = vmatmul.bf16.vlgmr.msra.gmra.mxu1 %v1936_v20  ;;  %v686_v10 = vrot.slane %v684_v4, 1 }
  0x32   : > { %821 = vmatpush.bf16.msrb.mxu1 %v1696_v40 }
  0x33   : > { %738 = vmatpush.bf16.msrb.mxu0 %v1687_v43  ;;  %v687_v19 = vor.u32 %v686_v10, %v682_v9 }
  0x34   : > { %902 = vmatpush.bf16.msrb.mxu2 %v1703_v44 }
  0x35   : > { %991 = vmatpush.bf16.msrb.mxu3 %v1711_v47 }
  0x36   : > { %822 = vmatpush.bf16.msrb.mxu1 %v1695_v48  ;;  %v769_v1 = vld.sshfl [vmem:[#allocation1] sm:$0xff pattern:$0x73625140] }
  0x37   : > { %739 = vmatpush.bf16.msrb.mxu0 %v1686_v49  ;;  %933 = vst [vmem:[#allocation1] ss:$4 sm:$0xff] %v835_v62  ;;  %v771_v23 = vrot.slane %v769_v1, 1 }
  0x38   : > { %903 = vmatpush.bf16.msrb.mxu2 %v1702_v50 }
  0x39   : > { %992 = vmatpush.bf16.msrb.mxu3 %v1710_v51 }
  0x3a   : > { %823 = vmatpush.bf16.msrb.mxu1 %v1694_v52 }
  0x3b   : > { %740 = vmatpush.bf16.msrb.mxu0 %v1685_v53 }
  0x3c   : > { %904 = vmatpush.bf16.msrb.mxu2 %v1701_v54 }
  0x3d   : > { %993 = vmatpush.bf16.msrb.mxu3 %v1709_v56 }
  0x3e   : > { %824 = vmatpush.bf16.msrb.mxu1 %v1693_v57  ;;  %v934_v13 = vld.sshfl [vmem:[#allocation1] sm:$0xff pattern:$0x73625140] }
  0x3f   : > { %741 = vmatpush.bf16.msrb.mxu0 %v1684_v58  ;;  %v935_v15 = vshrl.u32 %v934_v13, 16  ;;  %v937_v16 = vshll.u32 %v934_v13, 16  ;;  %1021 = vst [vmem:[#allocation1] ss:$4 sm:$0xff] %v835_v62 }
  0x40   : > { %905 = vmatpush.bf16.msrb.mxu2 %v1700_v59 }
  0x41   : > { %994 = vmatpush.bf16.msrb.mxu3 %v1708_v60  ;;  %v939_v20 = vrot.slane %v937_v16, 1 }
  0x42   : > { %825 = vmatpush.bf16.msrb.mxu1 %v1692_v61 }
  0x43   : > { %742 = vmatpush.bf16.msrb.mxu0 %v1683_v63  ;;  %v940_v22 = vor.u32 %v939_v20, %v935_v15 }
  0x44   : > { %906 = vmatpush.bf16.msrb.mxu2 %v1699_v0 }
  0x45   : > { %995 = vmatpush.bf16.msrb.mxu3 %v1707_v2 }
  0x46   : > { %826 = vmatpush.bf16.msrb.mxu1 %v1691_v3  ;;  %v1022_v30 = vld.sshfl [vmem:[#allocation1] sm:$0xff pattern:$0x73625140] }
  0x47   : > { %743 = vmatpush.bf16.msrb.mxu0 %v1682_v5  ;;  %v1024_v31 = vrot.slane %v1022_v30, 1 }
  0x48   : > { %907 = vmatpush.bf16.msrb.mxu2 %v1698_v6 }
  0x49   : > { %996 = vmatpush.bf16.msrb.mxu3 %v1706_v7 }
  0x4a   : > { %827 = vmatpush.bf16.msrb.mxu1 %v1690_v8 }
  0x4b   : > { %744 = vmatpush.bf16.msrb.mxu0 %v1681_v11 }
  0x4c   : > { %908 = vmatpush.bf16.msrb.mxu2 %v1697_v12 }
  0x4d   : > { %997 = vmatpush.bf16.msrb.mxu3 %v1705_v17 }
  0x4e   : > { %828 = vmatpush.bf16.msrb.mxu1 %v1689_v18  ;;  %745 = vmatmul.bf16.vlgmr.msrb.gmra.mxu0 %v687_v19 }
  0x4f   : > { %1074 = vmatpush.bf16.msra.mxu0 %v1720_v14  ;;  %909 = vmatmul.bf16.vlgmr.msrb.gmra.mxu2 %v835_v62 }
  0x50   : > { %998 = vmatmul.bf16.vlgmr.msrb.gmra.mxu3 %v940_v22 }
  0x51   : > { %829 = vmatmul.bf16.vlgmr.msrb.gmra.mxu1 %v771_v23 }
  0x53   : > { %1075 = vmatpush.bf16.msra.mxu0 %v1719_v21 }
  0x57   : > { %1076 = vmatpush.bf16.msra.mxu0 %v1718_v24 }
  0x5b   : > { %1077 = vmatpush.bf16.msra.mxu0 %v1717_v25 }
  0x5f   : > { %1078 = vmatpush.bf16.msra.mxu0 %v1716_v26 }
  0x63   : > { %1079 = vmatpush.bf16.msra.mxu0 %v1715_v27 }
  0x67   : > { %1080 = vmatpush.bf16.msra.mxu0 %v1714_v28 }
  0x6b   : > { %1081 = vmatpush.bf16.msra.mxu0 %v1713_v29 }
  0x6e   : > { %1082 = vmatmul.bf16.vlgmr.msra.gmra.mxu0 %v1024_v31 }
  0xab   : > { %v433_v32 = vpop.f32.mrf.mxu0 }
  0xae   : > { %v494_v33 = vpop.f32.mrf.mxu1 }
  0xaf   : > { %v495_v42 = vadd.f32 %v494_v33, %v433_v32 }
  0xb2   : > { %v577_v34 = vpop.f32.mrf.mxu2 }
  0xb3   : > { %v657_v35 = vpop.f32.mrf.mxu3  ;;  %v435_v36 = vpop.f32.mrf.mxu0  ;;  %v581_v44 = vadd.f32 %v577_v34, %v495_v42 }
  0xb5   : > { %v661_v48 = vadd.f32 %v657_v35, %v581_v44 }
  0xb6   : > { %v496_v37 = vpop.f32.mrf.mxu1 }
  0xba   : > { %v579_v38 = vpop.f32.mrf.mxu2 }
  0xbb   : > { %v659_v39 = vpop.f32.mrf.mxu3 }
  0xcb   : > { %v746_v40 = vpop.f32.mrf.mxu0 }
  0xcc   : > { %v750_v50 = vadd.f32 %v746_v40, %v661_v48 }
  0xce   : > { %v830_v41 = vpop.f32.mrf.mxu1 }
  0xcf   : > { %v834_v52 = vadd.f32 %v830_v41, %v750_v50 }
  0xd2   : > { %v910_v43 = vpop.f32.mrf.mxu2 }
  0xd3   : > { %v999_v45 = vpop.f32.mrf.mxu3  ;;  %v748_v46 = vpop.f32.mrf.mxu0  ;;  %v914_v53 = vadd.f32 %v910_v43, %v834_v52 }
  0xd5   : > { %v1003_v54 = vadd.f32 %v999_v45, %v914_v53 }
  0xd6   : > { %v832_v47 = vpop.f32.mrf.mxu1 }
  0xda   : > { %v912_v49 = vpop.f32.mrf.mxu2 }
  0xdb   : > { %v1001_v51 = vpop.f32.mrf.mxu3 }
  0xeb   : > { %v1083_v56 = vpop.f32.mrf.mxu0 }
  0xec   : > { %v1087_v57 = vadd.f32 %v1083_v56, %v1003_v54 }
  0xee   : > { %v1092_v58 = vadd.f32 %v1761_v55, %v1087_v57 }
  0xf0   : > { %v1093_v59 = vfloor.f32 %v1092_v58 }
  0xf2   : > { %1095 = vst.msk [vmem:[%s331_s25] sm:$0x3] %vm1094_vm0, %v1093_v59 }
  0xf3   : > { %v1085_v60 = vpop.f32.mrf.mxu0 }
  0xf4 PF: > { %s15_s22 = sadd.s32 1, %s1800_s22   ;;  %s2147_s18 = smov %s1792_s20 }
  0xf5   : > { %p12_p10 = scmp.ge.s32.totalorder %s15_s22, 6   ;;  %s2148_s19 = smov %s1796_s21 }
  0xf6   : > { %s2149_s20 = smov %s2152_s23  ;;  %s2150_s21 = smov %s2156_s24 }
  0xf7   :  { %14 = sbr.rel (!%p12_p10) target bundleno = 3 (0x3), region = 84 }

// kernel: comp_decompressor_forward.13
= control target key start
LH: loop header
LB: loop body
LE: loop exit
PB: predicated region body
PF: predicated region fallthrough
CT: control target
= control target key end

     0   :  { %s1178_s24 = smov 0   ;;  %s1180_s25 = smov 0   ;;  %s1379_s0 = inlined_call_operand.vmem [shape: bf16[2,6,6,32], index: 0, kind: input, shape index: {}, may-alias: {0,1,2}]   ;;  %s1380_s1 = inlined_call_operand.vmem [shape: bf16[2,6,6,32], index: 1, kind: input, shape index: {}, may-alias: {0,1,2}]   ;;  %s1381_s2 = inlined_call_operand.vmem [shape: bf16[2,6,6,32], index: 2, kind: input, shape index: {}, may-alias: {0,1,2}]   ;;  %s1382_s3 = inlined_call_operand.vmem [shape: bf16[9,32,128], index: 3, kind: input, shape index: {}]   ;;  %s1383_s4 = inlined_call_operand.vmem [shape: f32[1,128], index: 4, kind: input, shape index: {}]   ;;  %s1384_s5 = inlined_call_operand.vmem [shape: f32[128,128], index: 5, kind: input, shape index: {}]   ;;  %s1385_s6 = inlined_call_operand.vmem [shape: f32[1,128], index: 6, kind: input, shape index: {}]   ;;  %s1386_s7 = inlined_call_operand.vmem [shape: bf16[2,4,4,128], index: 7, kind: output, shape index: {}]  }
   0x1   :  { %s1182_s26 = smov 0   ;;  %s1184_s27 = smov 0  }
   0x2   :  { %s1186_s28 = smov 0  }
   0x3 LB: > { %s26_s29 = sadd.s32 1, %s1128_s26  ;;  %s29_s30 = sadd.s32 1, %s1132_s27  ;;  %s1136_s28 = sphi %s1186_s28, %s17_s28   ;;  %s1132_s27 = sphi %s1184_s27, %s1391_s27   ;;  %s1128_s26 = sphi %s1182_s26, %s1390_s26   ;;  %s1124_s25 = sphi %s1180_s25, %s1389_s25   ;;  %s1120_s24 = sphi %s1178_s24, %s1388_s24  }
   0x4   : > { %p27_p0 = scmp.ge.s32.totalorder %s26_s29, 4  ;;  %p914_p1 = scmp.ge.s32.totalorder %s1136_s28, 1 }
   0x5   : > { %p294_p2 = scmp.lt.s32.totalorder %s1136_s28, 9 }
   0x6   : > { %s1393_s29 = smov (%p27_p0, %s26_s29), 0  ;;  %s1395_s30 = smov (!%p27_p0, %s29_s30), %s1132_s27 }
   0x7   : > { %p295_p3 = pnand %p914_p1, %p294_p2  ;;  %p31_p4 = scmp.ge.s32.totalorder %s1395_s30, 2 }
   0x8   : > { %p350_p5 = scmp.lt.s32.totalorder (!%p295_p3), %s1124_s25, 1  ;;  %p352_p6 = scmp.lt.s32.totalorder (!%p295_p3), %s1120_s24, 5 }
   0x9   : > { %s1397_s30 = smov (%p31_p4, %s1395_s30), 0  ;;  %298 = sbr.rel (%p295_p3) target bundleno = 350 (0x15e), region = 48 }
   0xa   : > { %s368_s10 = sadd.s32 (!%p295_p3), 2, %s1120_s24  ;;  %s358_s20 = sadd.s32 (!%p295_p3), 1, %s1120_s24 }
   0xb   : > { %p1247_p7 = scmp.lt.s32.totalorder (!%p295_p3), %s368_s10, 5  ;;  %p361_p8 = scmp.lt.s32.totalorder (!%p295_p3), %s358_s20, 5 }
   0xc   : > { %p380_p9 = scmp.lt.s32.totalorder (!%p295_p3), %s1120_s24, 3 }
   0xe   : > { %v1036_v0 = vld [vmem:[%s1382_s3 + $0x8] sm:$0xff]  ;;  %v1038_v1 = vld [vmem:[%s1382_s3 + $0x18] sm:$0xff]  ;;  %v1035_v3 = vld [vmem:[%s1382_s3] sm:$0xff]  ;;  %s1399_s25 = smov (!%p350_p5, %s1124_s25), 1  ;;  %vm419_vm0 = vcmask 261120   ;;  %s1401_s10 = smov (!%p1247_p7, %s368_s10), 5 }
   0xf   : > { %v1042_v2 = vld [vmem:[%s1382_s3 + $0x38] sm:$0xff]  ;;  %457 = vmatpush.bf16.msra.mxu2 %v1036_v0  ;;  %s353_s17 = scalar_select %p352_p6, %s1120_s24, 5  ;;  %v1040_v4 = vld [vmem:[%s1382_s3 + $0x28] sm:$0xff]  ;;  %429 = vmatpush.bf16.msra.mxu0 %v1038_v1  ;;  %v1037_v5 = vld [vmem:[%s1382_s3 + $0x10] sm:$0xff] }
  0x10   : > { %526 = vmatpush.bf16.msra.mxu3 %v1042_v2  ;;  %s1234_s22 = smul.u32 6, %s1399_s25  ;;  %v1041_v6 = vld [vmem:[%s1382_s3 + $0x30] sm:$0xff]  ;;  %v1044_v7 = vld [vmem:[%s1382_s3 + $0x48] sm:$0xff]  ;;  %v1046_v8 = vld [vmem:[%s1382_s3 + $0x58] sm:$0xff]  ;;  %s1403_s20 = smov (!%p361_p8, %s358_s20), 5 }
  0x11   : > { %v1050_v9 = vld [vmem:[%s1382_s3 + $0x78] sm:$0xff]  ;;  %605 = vmatpush.bf16.msra.mxu1 %v1046_v8  ;;  %v1045_v10 = vld [vmem:[%s1382_s3 + $0x50] sm:$0xff]  ;;  %v1039_v11 = vld [vmem:[%s1382_s3 + $0x20] sm:$0xff]  ;;  %s1405_s24 = smov (!%p380_p9, %s1120_s24), 3  ;;  %s918_s9 = sshll.u32 %s1399_s25, 2 }
  0x12   : > { %s355_s18 = sadd.s32 %s1234_s22, %s353_s17  ;;  %v1048_v12 = vld [vmem:[%s1382_s3 + $0x68] sm:$0xff]  ;;  %v1043_v13 = vld [vmem:[%s1382_s3 + $0x40] sm:$0xff]  ;;  %v1049_v15 = vld [vmem:[%s1382_s3 + $0x70] sm:$0xff]  ;;  %s383_s11 = sadd.s32 %s918_s9, %s1405_s24 }
  0x13   : > { %458 = vmatpush.bf16.msra.mxu2 %v1035_v3  ;;  %s915_s21 = sshll.u32 %s355_s18, 2  ;;  %430 = vmatpush.bf16.msra.mxu0 %v1037_v5  ;;  %v1047_v18 = vld [vmem:[%s1382_s3 + $0x60] sm:$0xff]  ;;  %v1052_v24 = vld [vmem:[%s1382_s3 + $0x88] sm:$0xff]  ;;  %v748_v42 = vld [vmem:[%s1384_s5 + $0x78] sm:$0xff] }
  0x14   : > { %s357_s12 = scalar_lea.vmem %s1379_s0, %s915_s21  ;;  %527 = vmatpush.bf16.msra.mxu3 %v1041_v6  ;;  %s374_s21 = sadd.s32 %s1234_s22, %s1401_s10  ;;  %v1051_v29 = vld [vmem:[%s1382_s3 + $0x80] sm:$0xff]  ;;  %v747_v43 = vld [vmem:[%s1384_s5 + $0x70] sm:$0xff]  ;;  %v746_v44 = vld [vmem:[%s1384_s5 + $0x68] sm:$0xff] }
  0x15   : > { %v387_v14 = vld [vmem:[%s357_s12] sm:$0x7]  ;;  %606 = vmatpush.bf16.msra.mxu1 %v1045_v10  ;;  %s917_s23 = sshll.u32 %s374_s21, 2  ;;  %s364_s10 = sadd.s32 %s1234_s22, %s1403_s20  ;;  %v744_v46 = vld [vmem:[%s1384_s5 + $0x58] sm:$0xff]  ;;  %v743_v47 = vld [vmem:[%s1384_s5 + $0x50] sm:$0xff] }
  0x16   : > { %v398_v16 = vunpack.c.l.b16 %v387_v14  ;;  %941 = vmatmul.msk.bf16.vlgmr.msra.gmra.mxu2 %vm419_vm0, %v387_v14  ;;  %s376_s12 = scalar_lea.vmem %s1381_s2, %s917_s23  ;;  %s916_s17 = sshll.u32 %s364_s10, 2  ;;  %v745_v45 = vld [vmem:[%s1384_s5 + $0x60] sm:$0xff]  ;;  %v742_v48 = vld [vmem:[%s1384_s5 + $0x48] sm:$0xff]  ;;  %v740_v50 = vld [vmem:[%s1384_s5 + $0x38] sm:$0xff] }
  0x17   : > { %491 = vmatpush.bf16.msrb.mxu2 %v1040_v4  ;;  %570 = vmatpush.bf16.msrb.mxu0 %v1044_v7  ;;  %v613_v19 = vld [vmem:[%s376_s12] sm:$0x7]  ;;  %s366_s19 = scalar_lea.vmem %s1380_s1, %s916_s17  ;;  %v739_v51 = vld [vmem:[%s1384_s5 + $0x30] sm:$0xff]  ;;  %v738_v52 = vld [vmem:[%s1384_s5 + $0x28] sm:$0xff]  ;;  %s919_s12 = sshll.u32 %s383_s11, 1 }
  0x18   : > { %684 = vmatpush.bf16.msrb.mxu3 %v1050_v9  ;;  %v399_v17 = vpack.c.b16 %v398_v16, %v398_v16  ;;  %v654_v22 = vunpack.c.l.b16 %v613_v19  ;;  %v499_v26 = vld [vmem:[%s366_s19] sm:$0x7]  ;;  %v736_v55 = vld [vmem:[%s1384_s5 + $0x18] sm:$0xff]  ;;  %v735_v57 = vld [vmem:[%s1384_s5 + $0x10] sm:$0xff]  ;;  %s385_s13 = scalar_lea.vmem %s1386_s7, %s919_s12 }
  0x19   : > { %967 = vmatmul.msk.bf16.vlgmr.msra.gmra.mxu3 %vm419_vm0, %v499_v26  ;;  %v540_v28 = vunpack.c.l.b16 %v499_v26  ;;  %753 = vmatpush.msrb.mxu1 %v748_v42  ;;  %v741_v49 = vld [vmem:[%s1384_s5 + $0x40] sm:$0xff]  ;;  %v734_v58 = vld [vmem:[%s1384_s5 + $0x8] sm:$0xff] }
  0x1a   : > { %v401_v20 = vshrl.u32 %v399_v17, 16  ;;  %v403_v21 = vshll.u32 %v399_v17, 16  ;;  %v655_v27 = vpack.c.b16 %v654_v22, %v654_v22  ;;  %v469_v31 = vrot.slane %v399_v17, 1  ;;  %v737_v54 = vld [vmem:[%s1384_s5 + $0x20] sm:$0xff] }
  0x1b   : > { %492 = vmatpush.bf16.msrb.mxu2 %v1039_v11  ;;  %571 = vmatpush.bf16.msrb.mxu0 %v1043_v13  ;;  %v541_v30 = vpack.c.b16 %v540_v28, %v540_v28  ;;  %v733_v60 = vld [vmem:[%s1384_s5] sm:$0xff] }
  0x1c   : > { %685 = vmatpush.bf16.msrb.mxu3 %v1049_v15  ;;  %v405_v23 = vrot.slane %v403_v21, 1  ;;  %v659_v33 = vshll.u32 %v655_v27, 16  ;;  %v657_v37 = vshrl.u32 %v655_v27, 16  ;;  %v697_v41 = vrot.slane %v655_v27, 1  ;;  %754 = vmatpush.msrb.mxu1 %v747_v43  ;;  %v1094_v16 = vld [vmem:[%s1383_s4] ss:$0 sm:$0xff] }
  0x1d   : > { %v545_v32 = vshll.u32 %v541_v30, 16  ;;  %v583_v34 = vrot.slane %v541_v30, 1  ;;  %v543_v35 = vshrl.u32 %v541_v30, 16 }
  0x1e   : > { %v406_v25 = vor.u32 %v405_v23, %v401_v20  ;;  %v661_v38 = vrot.slane %v659_v33, 1  ;;  %755 = vmatpush.msrb.mxu1 %v746_v44  ;;  %v1095_v23 = vld [vmem:[%s1385_s6] ss:$0 sm:$0xff] }
  0x1f   : > { %640 = vmatpush.bf16.msra.mxu2 %v1048_v12  ;;  %993 = vmatmul.msk.bf16.vlgmr.msra.gmra.mxu1 %vm419_vm0, %v583_v34  ;;  %v547_v36 = vrot.slane %v545_v32, 1 }
  0x20   : > { %932 = vmatmul.msk.bf16.vlgmr.msra.gmra.mxu0 %vm419_vm0, %v406_v25  ;;  %v662_v40 = vor.u32 %v661_v38, %v657_v37  ;;  %756 = vmatpush.msrb.mxu1 %v745_v45 }
  0x21   : > { %719 = vmatpush.bf16.msra.mxu0 %v1052_v24  ;;  %v548_v39 = vor.u32 %v547_v36, %v543_v35 }
  0x22   : > { %757 = vmatpush.msrb.mxu1 %v744_v46 }
  0x23   : > { %641 = vmatpush.bf16.msra.mxu2 %v1047_v18 }
  0x24   : > { %758 = vmatpush.msrb.mxu1 %v743_v47 }
  0x25   : > { %720 = vmatpush.bf16.msra.mxu0 %v1051_v29 }
  0x26   : > { %954 = vmatmul.msk.bf16.vlgmr.msrb.gmra.mxu2 %vm419_vm0, %v469_v31  ;;  %759 = vmatpush.msrb.mxu1 %v742_v48 }
  0x28   : > { %760 = vmatpush.msrb.mxu1 %v741_v49 }
  0x29   : > { %1019 = vmatmul.msk.bf16.vlgmr.msrb.gmra.mxu3 %vm419_vm0, %v662_v40 }
  0x2a   : > { %761 = vmatpush.msrb.mxu1 %v740_v50 }
  0x2c   : > { %762 = vmatpush.msrb.mxu1 %v739_v51 }
  0x2e   : > { %763 = vmatpush.msrb.mxu1 %v738_v52 }
  0x30   : > { %980 = vmatmul.msk.bf16.vlgmr.msrb.gmra.mxu0 %vm419_vm0, %v548_v39  ;;  %764 = vmatpush.msrb.mxu1 %v737_v54 }
  0x32   : > { %765 = vmatpush.msrb.mxu1 %v736_v55 }
  0x34   : > { %766 = vmatpush.msrb.mxu1 %v735_v57 }
  0x36   : > { %1006 = vmatmul.msk.bf16.vlgmr.msra.gmra.mxu2 %vm419_vm0, %v613_v19  ;;  %767 = vmatpush.msrb.mxu1 %v734_v58 }
  0x38   : > { %768 = vmatpush.msrb.mxu1 %v733_v60 }
  0x40   : > { %1032 = vmatmul.msk.bf16.vlgmr.msra.gmra.mxu0 %vm419_vm0, %v697_v41 }
  0x99   : > { %v460_v53 = vpop.f32.mrf.mxu2 }
  0x9c   : > { %v529_v61 = vpop.f32.mrf.mxu3  ;;  %v608_v62 = vpop.f32.mrf.mxu1 }
  0x9d   : > { %v432_v56 = vpop.f32.mrf.mxu0 }
  0x9e   : > { %v461_v1 = vadd.f32 %v460_v53, %v432_v56 }
  0xa1   : > { %v462_v59 = vpop.f32.mrf.mxu2 }
  0xa4   : > { %v531_v2 = vpop.f32.mrf.mxu3  ;;  %v610_v3 = vpop.f32.mrf.mxu1 }
  0xa5   : > { %v434_v63 = vpop.f32.mrf.mxu0 }
  0xa9   : > { %v494_v0 = vpop.f32.mrf.mxu2 }
  0xaa   : > { %v498_v4 = vadd.f32 %v494_v0, %v461_v1 }
  0xac   : > { %v533_v6 = vadd.f32 %v529_v61, %v498_v4  ;;  %v687_v8 = vpop.f32.mrf.mxu3 }
  0xad   : > { %v573_v5 = vpop.f32.mrf.mxu0 }
  0xae   : > { %v577_v9 = vadd.f32 %v573_v5, %v533_v6 }
  0xb0   : > { %v612_v11 = vadd.f32 %v608_v62, %v577_v9 }
  0xb1   : > { %v496_v7 = vpop.f32.mrf.mxu2 }
  0xb4   : > { %v689_v14 = vpop.f32.mrf.mxu3 }
  0xb5   : > { %v575_v10 = vpop.f32.mrf.mxu0 }
  0xb9   : > { %v643_v12 = vpop.f32.mrf.mxu2 }
  0xba   : > { %v647_v13 = vadd.f32 %v643_v12, %v612_v11 }
  0xbc   : > { %v691_v15 = vadd.f32 %v687_v8, %v647_v13 }
  0xbd   : > { %v722_v17 = vpop.f32.mrf.mxu0 }
  0xbe   : > { %v726_v18 = vadd.f32 %v722_v17, %v691_v15 }
  0xc0   : > { %v731_v19 = vadd.f32 %v1094_v16, %v726_v18 }
  0xc1   : > { %v645_v20 = vpop.f32.mrf.mxu2 }
  0xc2   : > { %v732_v21 = vmul.f32 %v731_v19, %v731_v19 }
  0xc4   : > { %769 = vmatmul.f32.vlgmr.msrb.gmra.mxu1 %v732_v21 }
  0xc5   : > { %v724_v22 = vpop.f32.mrf.mxu0 }
 0x141   : > { %v770_v24 = vpop.f32.mrf.mxu1 }
 0x142   : > { %v771_v25 = vadd.f32 %v1095_v23, %v770_v24 }
 0x144   : > { %1096 = vrsqrt.f32 %v771_v25  ;;  %vm780_vm1 = vcmp.eq.f32.partialorder %v771_v25, inf  ;;  %v783_v33 = vand.u32 2147483648, %v771_v25  ;;  %vm782_vm2 = vcmp.eq.f32.partialorder %v771_v25, 0.0 }
 0x14a   : > { %v1097_v26 = vpop.eup %1096 }
 0x14b   : > { %v774_v27 = vmul.f32 %v1097_v26, %v771_v25 }
 0x14d   : > { %v775_v28 = vmul.f32 %v1097_v26, %v774_v27 }
 0x14f   : > { %v776_v29 = vmul.f32 0.5, %v775_v28 }
 0x151   : > { %v777_v30 = vsub.f32 1.5, %v776_v29 }
 0x153   : > { %v778_v31 = vmul.f32 %v1097_v26, %v777_v30 }
 0x155   : > { %v779_v32 = vmul.f32 %v778_v31, %v771_v25 }
 0x157   : > { %v781_v34 = vsel %vm780_vm1, %v771_v25, %v779_v32 }
 0x158   : > { %v784_v35 = vsel %vm782_vm2, %v783_v33, %v781_v34 }
 0x159   : > { %v785_v36 = vmul.f32 %v784_v35, %v731_v19 }
 0x15b   : > { %v786_v37 = vpack.c.bf16 %v785_v36, %v785_v36 }
 0x15d   : > { %787 = vst [vmem:[%s385_s13] sm:$0x3] %v786_v37 }
 0x15e PF: > { %s17_s28 = sadd.s32 1, %s1136_s28   ;;  %s1388_s24 = smov %s1128_s26 }
 0x15f   : > { %p14_p10 = scmp.ge.s32.totalorder %s17_s28, 10   ;;  %s1389_s25 = smov %s1132_s27 }
 0x160   : > { %s1390_s26 = smov %s1393_s29  ;;  %s1391_s27 = smov %s1397_s30 }
 0x161   :  { %16 = sbr.rel (!%p14_p10) target bundleno = 3 (0x3), region = 92 }

// kernel: comp_decompressor_forward.14
= control target key start
LH: loop header
LB: loop body
LE: loop exit
PB: predicated region body
PF: predicated region fallthrough
CT: control target
= control target key end

     0   :  { %s1223_s24 = smov 0   ;;  %s1225_s25 = smov 0   ;;  %s1429_s0 = inlined_call_operand.vmem [shape: bf16[2,10,10,32], index: 0, kind: input, shape index: {}, may-alias: {0,1,2}]   ;;  %s1430_s1 = inlined_call_operand.vmem [shape: bf16[2,10,10,32], index: 1, kind: input, shape index: {}, may-alias: {0,1,2}]   ;;  %s1431_s2 = inlined_call_operand.vmem [shape: bf16[2,10,10,32], index: 2, kind: input, shape index: {}, may-alias: {0,1,2}]   ;;  %s1432_s3 = inlined_call_operand.vmem [shape: bf16[9,32,128], index: 3, kind: input, shape index: {}]   ;;  %s1433_s4 = inlined_call_operand.vmem [shape: f32[1,128], index: 4, kind: input, shape index: {}]   ;;  %s1434_s5 = inlined_call_operand.vmem [shape: f32[128,128], index: 5, kind: input, shape index: {}]   ;;  %s1435_s6 = inlined_call_operand.vmem [shape: f32[1,128], index: 6, kind: input, shape index: {}]   ;;  %s1436_s7 = inlined_call_operand.vmem [shape: bf16[2,8,8,128], index: 7, kind: output, shape index: {}]  }
   0x1   :  { %s1227_s26 = smov 0   ;;  %s1229_s27 = smov 0  }
   0x2   :  { %s1231_s28 = smov 0  }
   0x3 LB: > { %s26_s29 = sadd.s32 1, %s1173_s26  ;;  %s29_s30 = sadd.s32 1, %s1177_s27  ;;  %s1181_s28 = sphi %s1231_s28, %s17_s28   ;;  %s1177_s27 = sphi %s1229_s27, %s1441_s27   ;;  %s1173_s26 = sphi %s1227_s26, %s1440_s26   ;;  %s1169_s25 = sphi %s1225_s25, %s1439_s25   ;;  %s1165_s24 = sphi %s1223_s24, %s1438_s24  }
   0x4   : > { %p27_p0 = scmp.ge.s32.totalorder %s26_s29, 8  ;;  %p941_p1 = scmp.ge.s32.totalorder %s1181_s28, 1 }
   0x5   : > { %p297_p2 = scmp.lt.s32.totalorder %s1181_s28, 17 }
   0x6   : > { %s1443_s29 = smov (%p27_p0, %s26_s29), 0  ;;  %s1445_s30 = smov (!%p27_p0, %s29_s30), %s1177_s27 }
   0x7   : > { %p298_p3 = pnand %p941_p1, %p297_p2  ;;  %p31_p4 = scmp.ge.s32.totalorder %s1445_s30, 2 }
   0x8   : > { %p356_p5 = scmp.lt.s32.totalorder (!%p298_p3), %s1169_s25, 1  ;;  %p358_p6 = scmp.lt.s32.totalorder (!%p298_p3), %s1165_s24, 9 }
   0x9   : > { %s1447_s30 = smov (%p31_p4, %s1445_s30), 0  ;;  %301 = sbr.rel (%p298_p3) target bundleno = 350 (0x15e), region = 48 }
   0xa   : > { %s376_s10 = sadd.s32 (!%p298_p3), 2, %s1165_s24  ;;  %s365_s13 = sadd.s32 (!%p298_p3), 1, %s1165_s24 }
   0xb   : > { %p1292_p7 = scmp.lt.s32.totalorder (!%p298_p3), %s376_s10, 9  ;;  %p368_p8 = scmp.lt.s32.totalorder (!%p298_p3), %s365_s13, 9 }
   0xc   : > { %p389_p9 = scmp.lt.s32.totalorder (!%p298_p3), %s1165_s24, 7 }
   0xe   : > { %v1079_v0 = vld [vmem:[%s1432_s3 + $0x8] sm:$0xff]  ;;  %v1081_v1 = vld [vmem:[%s1432_s3 + $0x18] sm:$0xff]  ;;  %v1078_v3 = vld [vmem:[%s1432_s3] sm:$0xff]  ;;  %s1449_s25 = smov (!%p356_p5, %s1169_s25), 1  ;;  %vm431_vm0 = vcmask 261120   ;;  %s1451_s10 = smov (!%p1292_p7, %s376_s10), 9 }
   0xf   : > { %v1086_v2 = vld [vmem:[%s1432_s3 + $0x38] sm:$0xff]  ;;  %469 = vmatpush.bf16.msra.mxu2 %v1079_v0  ;;  %s359_s17 = scalar_select %p358_p6, %s1165_s24, 9  ;;  %v1083_v4 = vld [vmem:[%s1432_s3 + $0x28] sm:$0xff]  ;;  %441 = vmatpush.bf16.msra.mxu0 %v1081_v1  ;;  %v1080_v5 = vld [vmem:[%s1432_s3 + $0x10] sm:$0xff] }
  0x10   : > { %539 = vmatpush.bf16.msra.mxu3 %v1086_v2  ;;  %s1279_s22 = smul.u32 20, %s1449_s25  ;;  %v1085_v6 = vld [vmem:[%s1432_s3 + $0x30] sm:$0xff]  ;;  %v1088_v7 = vld [vmem:[%s1432_s3 + $0x48] sm:$0xff]  ;;  %v1090_v8 = vld [vmem:[%s1432_s3 + $0x58] sm:$0xff]  ;;  %s1453_s13 = smov (!%p368_p8, %s365_s13), 9 }
  0x11   : > { %s942_s14 = sshll.u32 %s359_s17, 1  ;;  %v1095_v9 = vld [vmem:[%s1432_s3 + $0x78] sm:$0xff]  ;;  %620 = vmatpush.bf16.msra.mxu1 %v1090_v8  ;;  %v1089_v10 = vld [vmem:[%s1432_s3 + $0x50] sm:$0xff]  ;;  %v1082_v11 = vld [vmem:[%s1432_s3 + $0x20] sm:$0xff]  ;;  %s944_s18 = sshll.u32 %s1453_s13, 1 }
  0x12   : > { %s362_s19 = sadd.s32 %s1279_s22, %s942_s14  ;;  %v1093_v12 = vld [vmem:[%s1432_s3 + $0x68] sm:$0xff]  ;;  %v1087_v13 = vld [vmem:[%s1432_s3 + $0x40] sm:$0xff]  ;;  %v1094_v16 = vld [vmem:[%s1432_s3 + $0x70] sm:$0xff]  ;;  %s1455_s24 = smov (!%p389_p9, %s1165_s24), 7 }
  0x13   : > { %470 = vmatpush.bf16.msra.mxu2 %v1078_v3  ;;  %s943_s23 = sshll.u32 %s362_s19, 2  ;;  %442 = vmatpush.bf16.msra.mxu0 %v1080_v5  ;;  %v1092_v19 = vld [vmem:[%s1432_s3 + $0x60] sm:$0xff]  ;;  %v1097_v23 = vld [vmem:[%s1432_s3 + $0x88] sm:$0xff]  ;;  %s372_s19 = sadd.s32 %s1279_s22, %s944_s18  ;;  %v766_v45 = vld [vmem:[%s1434_s5 + $0x78] sm:$0xff] }
  0x14   : > { %s364_s12 = scalar_lea.vmem %s1429_s0, %s943_s23  ;;  %540 = vmatpush.bf16.msra.mxu3 %v1085_v6  ;;  %s946_s23 = sshll.u32 %s1451_s10, 1  ;;  %v1096_v27 = vld [vmem:[%s1432_s3 + $0x80] sm:$0xff]  ;;  %v765_v46 = vld [vmem:[%s1434_s5 + $0x70] sm:$0xff]  ;;  %v764_v47 = vld [vmem:[%s1434_s5 + $0x68] sm:$0xff] }
  0x15   : > { %v396_v14 = vld [vmem:[%s364_s12] sm:$0xf]  ;;  %v1077_v17 = vld [vmem:[%s364_s12] sm:$0x10]  ;;  %621 = vmatpush.bf16.msra.mxu1 %v1089_v10  ;;  %s383_s17 = sadd.s32 %s1279_s22, %s946_s23  ;;  %s945_s20 = sshll.u32 %s372_s19, 2  ;;  %v762_v49 = vld [vmem:[%s1434_s5 + $0x58] sm:$0xff] }
  0x16   : > { %v956_v15 = vld [vmem:[%s364_s12] sm:$0xf]  ;;  %975 = vmatmul.msk.bf16.vlgmr.msra.gmra.mxu2 %vm431_vm0, %v396_v14  ;;  %s947_s9 = sshll.u32 %s383_s17, 2  ;;  %s374_s17 = scalar_lea.vmem %s1430_s1, %s945_s20  ;;  %v761_v50 = vld [vmem:[%s1434_s5 + $0x50] sm:$0xff]  ;;  %v760_v51 = vld [vmem:[%s1434_s5 + $0x48] sm:$0xff] }
  0x17   : > { %503 = vmatpush.bf16.msrb.mxu2 %v1083_v4  ;;  %585 = vmatpush.bf16.msrb.mxu0 %v1088_v7  ;;  %v957_v18 = vor.u32 %v1077_v17, %v956_v15  ;;  %s1331_s10 = scalar_lea.vmem %s1431_s2, %s947_s9  ;;  %v511_v28 = vld [vmem:[%s374_s17] sm:$0xf]  ;;  %v1084_v30 = vld [vmem:[%s374_s17] sm:$0x10]  ;;  %v758_v53 = vld [vmem:[%s1434_s5 + $0x38] sm:$0xff]  ;;  %s948_s12 = sshll.u32 %s1449_s25, 3 }
  0x18   : > { %702 = vmatpush.bf16.msrb.mxu3 %v1095_v9  ;;  %v1051_v25 = vld [vmem:[%s1331_s10] sm:$0xf]  ;;  %v1091_v26 = vld [vmem:[%s1331_s10] sm:$0x10]  ;;  %v757_v54 = vld [vmem:[%s1434_s5 + $0x30] sm:$0xff]  ;;  %s392_s14 = sadd.s32 %s948_s12, %s1455_s24 }
  0x19   : > { %v413_v20 = vshrl.u32 %v957_v18, 16  ;;  %v415_v21 = vshll.u32 %v957_v18, 16  ;;  %v1008_v29 = vld [vmem:[%s374_s17] sm:$0xf]  ;;  %1001 = vmatmul.msk.bf16.vlgmr.msra.gmra.mxu3 %vm431_vm0, %v511_v28  ;;  %v481_v32 = vrot.slane %v957_v18, 1  ;;  %v1052_v33 = vor.u32 %v1091_v26, %v1051_v25  ;;  %771 = vmatpush.msrb.mxu1 %v766_v45  ;;  %v756_v56 = vld [vmem:[%s1434_s5 + $0x28] sm:$0xff] }
  0x1a   : > { %v1009_v31 = vor.u32 %v1084_v30, %v1008_v29  ;;  %v628_v43 = vld [vmem:[%s1331_s10] sm:$0xf]  ;;  %v754_v59 = vld [vmem:[%s1434_s5 + $0x18] sm:$0xff]  ;;  %v753_v60 = vld [vmem:[%s1434_s5 + $0x10] sm:$0xff]  ;;  %s949_s10 = sshll.u32 %s392_s14, 2 }
  0x1b   : > { %504 = vmatpush.bf16.msrb.mxu2 %v1082_v11  ;;  %586 = vmatpush.bf16.msrb.mxu0 %v1087_v13  ;;  %v417_v22 = vrot.slane %v415_v21, 1  ;;  %v677_v36 = vshll.u32 %v1052_v33, 16  ;;  %v675_v39 = vshrl.u32 %v1052_v33, 16  ;;  %v715_v44 = vrot.slane %v1052_v33, 1  ;;  %v763_v48 = vld [vmem:[%s1434_s5 + $0x60] sm:$0xff]  ;;  %v752_v62 = vld [vmem:[%s1434_s5 + $0x8] sm:$0xff]  ;;  %s394_s19 = scalar_lea.vmem %s1436_s7, %s949_s10 }
  0x1c   : > { %703 = vmatpush.bf16.msrb.mxu3 %v1094_v16  ;;  %v560_v34 = vshll.u32 %v1009_v31, 16  ;;  %v598_v35 = vrot.slane %v1009_v31, 1  ;;  %v558_v37 = vshrl.u32 %v1009_v31, 16  ;;  %772 = vmatpush.msrb.mxu1 %v765_v46  ;;  %v759_v52 = vld [vmem:[%s1434_s5 + $0x40] sm:$0xff] }
  0x1d   : > { %v418_v24 = vor.u32 %v417_v22, %v413_v20  ;;  %v679_v40 = vrot.slane %v677_v36, 1  ;;  %v755_v58 = vld [vmem:[%s1434_s5 + $0x20] sm:$0xff] }
  0x1e   : > { %1031 = vmatmul.msk.bf16.vlgmr.msra.gmra.mxu1 %vm431_vm0, %v598_v35  ;;  %v562_v38 = vrot.slane %v560_v34, 1  ;;  %v751_v1 = vld [vmem:[%s1434_s5] sm:$0xff] }
  0x1f   : > { %656 = vmatpush.bf16.msra.mxu2 %v1093_v12  ;;  %966 = vmatmul.msk.bf16.vlgmr.msra.gmra.mxu0 %vm431_vm0, %v418_v24  ;;  %v680_v42 = vor.u32 %v679_v40, %v675_v39  ;;  %v1140_v26 = vld [vmem:[%s1435_s6] ss:$0 sm:$0xff] }
  0x20   : > { %737 = vmatpush.bf16.msra.mxu0 %v1097_v23  ;;  %v563_v41 = vor.u32 %v562_v38, %v558_v37  ;;  %773 = vmatpush.msrb.mxu1 %v764_v47 }
  0x22   : > { %774 = vmatpush.msrb.mxu1 %v763_v48 }
  0x23   : > { %657 = vmatpush.bf16.msra.mxu2 %v1092_v19  ;;  %v1139_v19 = vld [vmem:[%s1433_s4] ss:$0 sm:$0xff] }
  0x24   : > { %738 = vmatpush.bf16.msra.mxu0 %v1096_v27  ;;  %775 = vmatpush.msrb.mxu1 %v762_v49 }
  0x26   : > { %988 = vmatmul.msk.bf16.vlgmr.msrb.gmra.mxu2 %vm431_vm0, %v481_v32  ;;  %776 = vmatpush.msrb.mxu1 %v761_v50 }
  0x28   : > { %777 = vmatpush.msrb.mxu1 %v760_v51 }
  0x29   : > { %1061 = vmatmul.msk.bf16.vlgmr.msrb.gmra.mxu3 %vm431_vm0, %v680_v42 }
  0x2a   : > { %778 = vmatpush.msrb.mxu1 %v759_v52 }
  0x2c   : > { %779 = vmatpush.msrb.mxu1 %v758_v53 }
  0x2e   : > { %780 = vmatpush.msrb.mxu1 %v757_v54 }
  0x2f   : > { %1018 = vmatmul.msk.bf16.vlgmr.msrb.gmra.mxu0 %vm431_vm0, %v563_v41 }
  0x30   : > { %781 = vmatpush.msrb.mxu1 %v756_v56 }
  0x32   : > { %782 = vmatpush.msrb.mxu1 %v755_v58 }
  0x34   : > { %783 = vmatpush.msrb.mxu1 %v754_v59 }
  0x36   : > { %1044 = vmatmul.msk.bf16.vlgmr.msra.gmra.mxu2 %vm431_vm0, %v628_v43  ;;  %784 = vmatpush.msrb.mxu1 %v753_v60 }
  0x38   : > { %785 = vmatpush.msrb.mxu1 %v752_v62 }
  0x3a   : > { %786 = vmatpush.msrb.mxu1 %v751_v1 }
  0x3f   : > { %1074 = vmatmul.msk.bf16.vlgmr.msra.gmra.mxu0 %vm431_vm0, %v715_v44 }
  0x99   : > { %v472_v55 = vpop.f32.mrf.mxu2 }
  0x9b   : > { %v623_v63 = vpop.f32.mrf.mxu1 }
  0x9c   : > { %v444_v57 = vpop.f32.mrf.mxu0  ;;  %v542_v2 = vpop.f32.mrf.mxu3 }
  0x9d   : > { %v473_v4 = vadd.f32 %v472_v55, %v444_v57 }
  0xa1   : > { %v474_v61 = vpop.f32.mrf.mxu2 }
  0xa3   : > { %v625_v5 = vpop.f32.mrf.mxu1 }
  0xa4   : > { %v446_v0 = vpop.f32.mrf.mxu0  ;;  %v544_v8 = vpop.f32.mrf.mxu3 }
  0xa9   : > { %v506_v3 = vpop.f32.mrf.mxu2 }
  0xaa   : > { %v510_v6 = vadd.f32 %v506_v3, %v473_v4 }
  0xac   : > { %v588_v7 = vpop.f32.mrf.mxu0  ;;  %v546_v9 = vadd.f32 %v542_v2, %v510_v6  ;;  %v705_v13 = vpop.f32.mrf.mxu3 }
  0xae   : > { %v592_v11 = vadd.f32 %v588_v7, %v546_v9 }
  0xb0   : > { %v627_v14 = vadd.f32 %v623_v63, %v592_v11 }
  0xb1   : > { %v508_v10 = vpop.f32.mrf.mxu2 }
  0xb4   : > { %v590_v12 = vpop.f32.mrf.mxu0  ;;  %v707_v20 = vpop.f32.mrf.mxu3 }
  0xb9   : > { %v659_v15 = vpop.f32.mrf.mxu2 }
  0xba   : > { %v663_v16 = vadd.f32 %v659_v15, %v627_v14 }
  0xbc   : > { %v709_v17 = vadd.f32 %v705_v13, %v663_v16  ;;  %v740_v18 = vpop.f32.mrf.mxu0 }
  0xbe   : > { %v744_v21 = vadd.f32 %v740_v18, %v709_v17 }
  0xc0   : > { %v749_v22 = vadd.f32 %v1139_v19, %v744_v21 }
  0xc1   : > { %v661_v23 = vpop.f32.mrf.mxu2 }
  0xc2   : > { %v750_v24 = vmul.f32 %v749_v22, %v749_v22 }
  0xc4   : > { %v742_v25 = vpop.f32.mrf.mxu0  ;;  %787 = vmatmul.f32.vlgmr.msrb.gmra.mxu1 %v750_v24 }
 0x141   : > { %v788_v27 = vpop.f32.mrf.mxu1 }
 0x142   : > { %v789_v28 = vadd.f32 %v1140_v26, %v788_v27 }
 0x144   : > { %1141 = vrsqrt.f32 %v789_v28  ;;  %vm798_vm1 = vcmp.eq.f32.partialorder %v789_v28, inf  ;;  %v801_v36 = vand.u32 2147483648, %v789_v28  ;;  %vm800_vm2 = vcmp.eq.f32.partialorder %v789_v28, 0.0 }
 0x14a   : > { %v1142_v29 = vpop.eup %1141 }
 0x14b   : > { %v792_v30 = vmul.f32 %v1142_v29, %v789_v28 }
 0x14d   : > { %v793_v31 = vmul.f32 %v1142_v29, %v792_v30 }
 0x14f   : > { %v794_v32 = vmul.f32 0.5, %v793_v31 }
 0x151   : > { %v795_v33 = vsub.f32 1.5, %v794_v32 }
 0x153   : > { %v796_v34 = vmul.f32 %v1142_v29, %v795_v33 }
 0x155   : > { %v797_v35 = vmul.f32 %v796_v34, %v789_v28 }
 0x157   : > { %v799_v37 = vsel %vm798_vm1, %v789_v28, %v797_v35 }
 0x158   : > { %v802_v38 = vsel %vm800_vm2, %v801_v36, %v799_v37 }
 0x159   : > { %v803_v39 = vmul.f32 %v802_v38, %v749_v22 }
 0x15b   : > { %v804_v40 = vpack.c.bf16 %v803_v39, %v803_v39 }
 0x15d   : > { %805 = vst [vmem:[%s394_s19] sm:$0xf] %v804_v40 }
 0x15e PF: > { %s17_s28 = sadd.s32 1, %s1181_s28   ;;  %s1438_s24 = smov %s1173_s26 }
 0x15f   : > { %p14_p10 = scmp.ge.s32.totalorder %s17_s28, 18   ;;  %s1439_s25 = smov %s1177_s27 }
 0x160   : > { %s1440_s26 = smov %s1443_s29  ;;  %s1441_s27 = smov %s1447_s30 }
 0x161   :  { %16 = sbr.rel (!%p14_p10) target bundleno = 3 (0x3), region = 92 }

// kernel: comp_decompressor_forward.15
= control target key start
LH: loop header
LB: loop body
LE: loop exit
PB: predicated region body
PF: predicated region fallthrough
CT: control target
= control target key end

     0   :  { %s1165_s18 = smov 0   ;;  %s1167_s19 = smov 0   ;;  %s1323_s0 = inlined_call_operand.vmem [shape: bf16[2,18,18,32], index: 0, kind: input, shape index: {}, may-alias: {0,1,2}]   ;;  %s1324_s1 = inlined_call_operand.vmem [shape: bf16[2,18,18,32], index: 1, kind: input, shape index: {}, may-alias: {0,1,2}]   ;;  %s1325_s2 = inlined_call_operand.vmem [shape: bf16[2,18,18,32], index: 2, kind: input, shape index: {}, may-alias: {0,1,2}]   ;;  %s1326_s3 = inlined_call_operand.vmem [shape: bf16[9,32,12], index: 3, kind: input, shape index: {}]   ;;  %s1327_s4 = inlined_call_operand.vmem [shape: f32[1,12], index: 4, kind: input, shape index: {}]   ;;  %s1328_s5 = inlined_call_operand.vmem [shape: f32[2,16,16,12], index: 5, kind: output, shape index: {}]  }
   0x1   :  { %s1169_s20 = smov 0   ;;  %s1171_s21 = smov 0  }
   0x2   :  { %s1173_s22 = smov 0  }
   0x3 LB: > { %s24_s23 = sadd.s32 1, %s1125_s20  ;;  %s27_s24 = sadd.s32 1, %s1129_s21  ;;  %s1133_s22 = sphi %s1173_s22, %s15_s22   ;;  %s1129_s21 = sphi %s1171_s21, %s1334_s21   ;;  %s1125_s20 = sphi %s1169_s20, %s1333_s20   ;;  %s1121_s19 = sphi %s1167_s19, %s1332_s19   ;;  %s1117_s18 = sphi %s1165_s18, %s1331_s18  }
   0x4   : > { %p25_p0 = scmp.ge.s32.totalorder %s24_s23, 16  ;;  %p895_p1 = scmp.ge.s32.totalorder %s1133_s22, 1 }
   0x5   : > { %p247_p2 = scmp.lt.s32.totalorder %s1133_s22, 33 }
   0x6   : > { %s1336_s23 = smov (%p25_p0, %s24_s23), 0  ;;  %s1338_s24 = smov (!%p25_p0, %s27_s24), %s1129_s21 }
   0x7   : > { %p248_p3 = pnand %p895_p1, %p247_p2  ;;  %p29_p4 = scmp.ge.s32.totalorder %s1338_s24, 2 }
   0x8   : > { %p303_p5 = scmp.lt.s32.totalorder (!%p248_p3), %s1121_s19, 1  ;;  %p305_p6 = scmp.lt.s32.totalorder (!%p248_p3), %s1117_s18, 17 }
   0x9   : > { %s1340_s24 = smov (%p29_p4, %s1338_s24), 0  ;;  %251 = sbr.rel (%p248_p3) target bundleno = 207 (0xcf), region = 40 }
   0xa   : > { %s312_s25 = sadd.s32 (!%p248_p3), 1, %s1117_s18  ;;  %s323_s11 = sadd.s32 (!%p248_p3), 2, %s1117_s18 }
   0xb   : > { %p1241_p7 = scmp.lt.s32.totalorder (!%p248_p3), %s312_s25, 17  ;;  %p1247_p8 = scmp.lt.s32.totalorder (!%p248_p3), %s323_s11, 17 }
   0xc   : > { %p336_p9 = scmp.lt.s32.totalorder (!%p248_p3), %s1117_s18, 15 }
   0xe   : > { %v1035_v0 = vld [vmem:[%s1326_s3 + $0x28] sm:$0xff]  ;;  %v1033_v1 = vld [vmem:[%s1326_s3 + $0x18] sm:$0xff]  ;;  %v1034_v4 = vld [vmem:[%s1326_s3 + $0x20] sm:$0xff]  ;;  %s1342_s19 = smov (!%p303_p5, %s1121_s19), 1  ;;  %s1344_s25 = smov (!%p1241_p7, %s312_s25), 17  ;;  %vm389_vm0 = vcmask 261120  }
   0xf   : > { %v1031_v2 = vld [vmem:[%s1326_s3 + $0x8] sm:$0xff]  ;;  %v1038_v3 = vld [vmem:[%s1326_s3 + $0x38] sm:$0xff]  ;;  %465 = vmatpush.bf16.msra.mxu2 %v1035_v0  ;;  %399 = vmatpush.bf16.msra.mxu0 %v1033_v1  ;;  %v1032_v5 = vld [vmem:[%s1326_s3 + $0x10] sm:$0xff]  ;;  %s306_s16 = scalar_select %p305_p6, %s1117_s18, 17  ;;  %vm440_vm1 = vcmask 1046528   ;;  %vm751_vm3 = vcmask 97280  }
  0x10   : > { %427 = vmatpush.bf16.msra.mxu1 %v1031_v2  ;;  %509 = vmatpush.bf16.msra.mxu3 %v1038_v3  ;;  %v1030_v6 = vld [vmem:[%s1326_s3] sm:$0xff]  ;;  %v1037_v7 = vld [vmem:[%s1326_s3 + $0x30] sm:$0xff]  ;;  %s1226_s17 = smul.u32 54, %s1342_s19  ;;  %v1040_v8 = vld [vmem:[%s1326_s3 + $0x48] sm:$0xff]  ;;  %s1346_s11 = smov (!%p1247_p8, %s323_s11), 17 }
  0x11   : > { %v1045_v9 = vld [vmem:[%s1326_s3 + $0x68] sm:$0xff]  ;;  %s1050_s30 = smul.u32 3, %s306_s16  ;;  %v1047_v10 = vld [vmem:[%s1326_s3 + $0x78] sm:$0xff]  ;;  %v1039_v12 = vld [vmem:[%s1326_s3 + $0x40] sm:$0xff]  ;;  %vm364_vm2 = vsmask.f32 7424 }
  0x12   : > { %v1042_v11 = vld [vmem:[%s1326_s3 + $0x58] sm:$0xff]  ;;  %v1044_v13 = vld [vmem:[%s1326_s3 + $0x60] sm:$0xff]  ;;  %v1046_v14 = vld [vmem:[%s1326_s3 + $0x70] sm:$0xff]  ;;  %s1053_s10 = smul.u32 3, %s1346_s11  ;;  %s1348_s18 = smov (!%p336_p9, %s1117_s18), 15 }
  0x13   : > { %466 = vmatpush.bf16.msra.mxu2 %v1034_v4  ;;  %400 = vmatpush.bf16.msra.mxu0 %v1032_v5  ;;  %s309_s12 = sadd.s32 %s1226_s17, %s1050_s30  ;;  %v1041_v17 = vld [vmem:[%s1326_s3 + $0x50] sm:$0xff]  ;;  %v1049_v31 = vld [vmem:[%s1326_s3 + $0x88] sm:$0xff]  ;;  %v1048_v42 = vld [vmem:[%s1326_s3 + $0x80] sm:$0xff]  ;;  %s899_s8 = sshll.u32 %s1348_s18, 1 }
  0x14   : > { %428 = vmatpush.bf16.msra.mxu1 %v1030_v6  ;;  %510 = vmatpush.bf16.msra.mxu3 %v1037_v7  ;;  %s896_s14 = sshll.u32 %s309_s12, 2  ;;  %s1052_s12 = smul.u32 3, %s1344_s25 }
  0x15   : > { %s311_s28 = scalar_lea.vmem %s1323_s0, %s896_s14  ;;  %s330_s15 = sadd.s32 %s1053_s10, %s1226_s17 }
  0x16   : > { %v1029_v15 = vld [vmem:[%s311_s28] sm:$0xff]  ;;  %v346_v16 = vld [vmem:[%s311_s28 + $0x8] sm:$0x1]  ;;  %s319_s14 = sadd.s32 %s1052_s12, %s1226_s17  ;;  %s898_s27 = sshll.u32 %s330_s15, 2 }
  0x17   : > { %559 = vmatpush.bf16.msrb.mxu0 %v1040_v8  ;;  %642 = vmatpush.bf16.msrb.mxu2 %v1045_v9  ;;  %v361_v18 = vunpack.c.l.b16 %v346_v16  ;;  %v366_v19 = vshrl.u32 %v1029_v15, 16  ;;  %v368_v20 = vshll.u32 %v1029_v15, 16  ;;  %v441_v22 = vrot.slane %v1029_v15, 1  ;;  %s897_s13 = sshll.u32 %s319_s14, 2  ;;  %s332_s29 = scalar_lea.vmem %s1325_s2, %s898_s27 }
  0x18   : > { %692 = vmatpush.bf16.msrb.mxu3 %v1047_v10  ;;  %598 = vmatpush.bf16.msrb.mxu1 %v1042_v11  ;;  %s321_s25 = scalar_lea.vmem %s1324_s1, %s897_s13  ;;  %v1043_v32 = vld [vmem:[%s332_s29] sm:$0xff]  ;;  %v610_v34 = vld [vmem:[%s332_s29 + $0x8] sm:$0x1]  ;;  %s900_s9 = sshll.u32 %s1342_s19, 5 }
  0x19   : > { %927 = vmatmul.msk.bf16.vlgmr.msra.gmra.mxu1 %vm389_vm0, %v1029_v15  ;;  %v363_v21 = vpack.c.b16 %v361_v18, %v361_v18  ;;  %v370_v23 = vrot.slane %v368_v20, 1  ;;  %v1036_v29 = vld [vmem:[%s321_s25] sm:$0xff]  ;;  %v477_v30 = vld [vmem:[%s321_s25 + $0x8] sm:$0x1]  ;;  %v658_v36 = vunpack.c.l.b16 %v610_v34  ;;  %v662_v38 = vshll.u32 %v1043_v32, 16  ;;  %s340_s14 = sadd.s32 %s900_s9, %s899_s8 }
  0x1a   : > { %v525_v33 = vunpack.c.l.b16 %v477_v30  ;;  %957 = vmatmul.msk.bf16.vlgmr.msra.gmra.mxu3 %vm389_vm0, %v1036_v29  ;;  %v529_v39 = vshll.u32 %v1036_v29, 16  ;;  %v574_v41 = vrot.slane %v1036_v29, 1  ;;  %v660_v44 = vshrl.u32 %v1043_v32, 16  ;;  %s901_s13 = sshll.u32 %s340_s14, 3 }
  0x1b   : > { %560 = vmatpush.bf16.msrb.mxu0 %v1039_v12  ;;  %643 = vmatpush.bf16.msrb.mxu2 %v1044_v13  ;;  %v442_v24 = vrot.slane %v363_v21, 1  ;;  %v373_v25 = vshll.u32 %v363_v21, 16  ;;  %v371_v26 = vor.u32 %v370_v23, %v366_v19  ;;  %v659_v40 = vpack.c.b16 %v658_v36, %v658_v36  ;;  %s342_s18 = scalar_lea.vmem %s1328_s5, %s901_s13 }
  0x1c   : > { %693 = vmatpush.bf16.msrb.mxu3 %v1046_v14  ;;  %599 = vmatpush.bf16.msrb.mxu1 %v1041_v17  ;;  %v526_v37 = vpack.c.b16 %v525_v33, %v525_v33  ;;  %v664_v45 = vrot.slane %v662_v38, 1  ;;  %v527_v47 = vshrl.u32 %v1036_v29, 16  ;;  %v531_v48 = vrot.slane %v529_v39, 1 }
  0x1d   : > { %v443_v27 = vsel %vm440_vm1, %v441_v22, %v442_v24  ;;  %v375_v28 = vrot.slane %v373_v25, 1  ;;  %v667_v46 = vshll.u32 %v659_v40, 16  ;;  %v707_v57 = vrot.slane %v1043_v32, 1  ;;  %v1094_v22 = vld [vmem:[%s1327_s4] ss:$0 sm:$0xff] }
  0x1e   : > { %940 = vmatmul.msk.bf16.vlgmr.msra.gmra.mxu2 %vm389_vm0, %v443_v27  ;;  %v575_v43 = vrot.slane %v526_v37, 1  ;;  %v534_v49 = vshll.u32 %v526_v37, 16  ;;  %v665_v51 = vor.u32 %v664_v45, %v660_v44  ;;  %v532_v53 = vor.u32 %v531_v48, %v527_v47 }
  0x1f   : > { %v376_v35 = vsel %vm364_vm2, %v371_v26, %v375_v28  ;;  %v669_v52 = vrot.slane %v667_v46, 1  ;;  %v708_v58 = vrot.slane %v659_v40, 1 }
  0x20   : > { %918 = vmatmul.msk.bf16.vlgmr.msra.gmra.mxu0 %vm389_vm0, %v376_v35  ;;  %v576_v50 = vsel %vm440_vm1, %v574_v41, %v575_v43  ;;  %v536_v54 = vrot.slane %v534_v49, 1 }
  0x21   : > { %731 = vmatpush.bf16.msra.mxu0 %v1049_v31  ;;  %v670_v55 = vsel %vm364_vm2, %v665_v51, %v669_v52  ;;  %v709_v59 = vsel %vm440_vm1, %v707_v57, %v708_v58 }
  0x22   : > { %v537_v56 = vsel %vm364_vm2, %v532_v53, %v536_v54 }
  0x25   : > { %732 = vmatpush.bf16.msra.mxu0 %v1048_v42 }
  0x29   : > { %983 = vmatmul.msk.bf16.vlgmr.msrb.gmra.mxu1 %vm389_vm0, %v576_v50 }
  0x2a   : > { %1013 = vmatmul.msk.bf16.vlgmr.msrb.gmra.mxu3 %vm389_vm0, %v670_v55 }
  0x2e   : > { %1000 = vmatmul.msk.bf16.vlgmr.msrb.gmra.mxu2 %vm389_vm0, %v1043_v32 }
  0x30   : > { %970 = vmatmul.msk.bf16.vlgmr.msrb.gmra.mxu0 %vm389_vm0, %v537_v56 }
  0x40   : > { %1026 = vmatmul.msk.bf16.vlgmr.msra.gmra.mxu0 %vm389_vm0, %v709_v59 }
  0x96   : > { %v430_v61 = vpop.f32.mrf.mxu1 }
  0x9d   : > { %v402_v60 = vpop.f32.mrf.mxu0  ;;  %v512_v63 = vpop.f32.mrf.mxu3 }
  0x9e   : > { %v432_v1 = vpop.f32.mrf.mxu1  ;;  %v431_v2 = vadd.f32 %v430_v61, %v402_v60 }
  0xa1   : > { %v468_v62 = vpop.f32.mrf.mxu2 }
  0xa2   : > { %v473_v4 = vadd.f32 %v468_v62, %v431_v2 }
  0xa4   : > { %v517_v7 = vadd.f32 %v512_v63, %v473_v4 }
  0xa5   : > { %v404_v0 = vpop.f32.mrf.mxu0  ;;  %v514_v5 = vpop.f32.mrf.mxu3 }
  0xa6   : > { %v601_v8 = vpop.f32.mrf.mxu1  ;;  %v433_v9 = vadd.f32 %v432_v1, %v404_v0 }
  0xa9   : > { %v470_v3 = vpop.f32.mrf.mxu2 }
  0xaa   : > { %v474_v11 = vadd.f32 %v470_v3, %v433_v9 }
  0xac   : > { %v518_v15 = vadd.f32 %v514_v5, %v474_v11 }
  0xad   : > { %v562_v6 = vpop.f32.mrf.mxu0  ;;  %v695_v16 = vpop.f32.mrf.mxu3 }
  0xae   : > { %v567_v10 = vadd.f32 %v562_v6, %v517_v7  ;;  %v603_v19 = vpop.f32.mrf.mxu1 }
  0xb0   : > { %v606_v13 = vadd.f32 %v601_v8, %v567_v10 }
  0xb1   : > { %v645_v12 = vpop.f32.mrf.mxu2 }
  0xb2   : > { %v650_v17 = vadd.f32 %v645_v12, %v606_v13 }
  0xb4   : > { %v700_v20 = vadd.f32 %v695_v16, %v650_v17 }
  0xb5   : > { %v564_v14 = vpop.f32.mrf.mxu0  ;;  %v697_v28 = vpop.f32.mrf.mxu3 }
  0xb6   : > { %v568_v18 = vadd.f32 %v564_v14, %v518_v15 }
  0xb8   : > { %v607_v21 = vadd.f32 %v603_v19, %v568_v18 }
  0xb9   : > { %v647_v23 = vpop.f32.mrf.mxu2 }
  0xba   : > { %v651_v26 = vadd.f32 %v647_v23, %v607_v21 }
  0xbc   : > { %v701_v30 = vadd.f32 %v697_v28, %v651_v26 }
  0xbd   : > { %v734_v24 = vpop.f32.mrf.mxu0 }
  0xbe   : > { %v739_v25 = vadd.f32 %v734_v24, %v700_v20 }
  0xc0   : > { %v745_v27 = vadd.f32 %v1094_v22, %v739_v25 }
  0xc2   : > { %v747_v29 = vmax.f32 %v745_v27, 0.0 }
  0xc4   : > { %v749_v31 = vmin.f32 %v747_v29, 1.0 }
  0xc5   : > { %v736_v32 = vpop.f32.mrf.mxu0 }
  0xc6   : > { %752 = vst.msk [vmem:[%s342_s18] sm:$0xff] %vm751_vm3, %v749_v31  ;;  %v740_v33 = vadd.f32 %v736_v32, %v701_v30 }
  0xc8   : > { %v746_v34 = vadd.f32 %v1094_v22, %v740_v33 }
  0xca   : > { %v748_v35 = vmax.f32 %v746_v34, 0.0 }
  0xcc   : > { %v750_v36 = vmin.f32 %v748_v35, 1.0 }
  0xce   : > { %753 = vst.msk [vmem:[%s342_s18 + $0x8] sm:$0xff] %vm751_vm3, %v750_v36 }
  0xcf PF: > { %s15_s22 = sadd.s32 1, %s1133_s22   ;;  %s1331_s18 = smov %s1125_s20 }
  0xd0   : > { %p12_p10 = scmp.ge.s32.totalorder %s15_s22, 34   ;;  %s1332_s19 = smov %s1129_s21 }
  0xd1   : > { %s1333_s20 = smov %s1336_s23  ;;  %s1334_s21 = smov %s1340_s24 }
  0xd2   :  { %14 = sbr.rel (!%p12_p10) target bundleno = 3 (0x3), region = 84 }

</bundles_post_ra>
